<compile_context>
chip_gen: v7x
topology: tpu7x:2x2x1
jax: 0.10.0
libtpu: 0.0.40
codegen_flags: <defaults>
</compile_context>

<pallas_src>
import jax
import jax.numpy as jnp
from jax.experimental import pallas as pl
from jax.experimental.pallas import tpu as pltpu

# ----------------------------- configuration -------------------------------
VOCAB = 32
EMB = 16            # emb_dim (== seq_len, required by the axial embedding math)
HEADS = 4
HIDDEN = 32
LAYERS = 2
MAX_SEQ = 16
NUM_HASHES = 4      # LSH params exist in the module but its output is dead code
NUM_BUCKETS = 8
CHUNK = 8
B = 2
S = 16
LN_EPS = 1e-5

HD = EMB // HEADS
T = B * S                       # total tokens
N_CHUNKS = T // CHUNK           # independent chunk-attention groups
LANES = 128

assert S == EMB, "axial positional embedding requires seq_len == emb_dim"
assert S % 2 == 0 and S % CHUNK == 0 and EMB % HEADS == 0
assert CHUNK % 8 == 0, "chunk blocks must be sublane aligned"


# ------------------------- weight-slab layout (static) ----------------------
def _make_layout():
    off = {}
    r = 0

    def put(name, nrows):
        nonlocal r
        off[name] = r
        r += nrows

    put("tok_emb", VOCAB)            # [VOCAB, EMB]
    put("wpos", 2 * B * EMB)         # [row, col] * B, each [EMB, EMB]
    for l in range(LAYERS):
        put(f"wqkv{l}", EMB)         # [EMB, 3*EMB]
        put(f"wo{l}", EMB)           # [EMB, EMB]
        put(f"w1{l}", EMB)           # [EMB, HIDDEN]
        put(f"w2{l}", HIDDEN)        # [HIDDEN, EMB]
        put(f"vec{l}", 8)            # 8 single-row vectors (LN params + biases)
    put("fcw", EMB)                  # [EMB, VOCAB]
    put("fcb", 1)                    # [1, VOCAB]
    rows = ((r + 7) // 8) * 8        # pad rows to a sublane-tile multiple
    return off, rows


_OFF, _ROWS = _make_layout()
# row indices inside each per-layer "vec{l}" block
_V_LN1G, _V_LN1B, _V_BQKV, _V_BO, _V_LN2G, _V_LN2B, _V_B1, _V_B2 = range(8)


# ------------------------------ fused kernel --------------------------------
def _layernorm(v, g, b):
    mu = jnp.mean(v, axis=-1, keepdims=True)
    var = jnp.mean((v - mu) ** 2, axis=-1, keepdims=True)
    return (v - mu) * jax.lax.rsqrt(var + LN_EPS) * g + b


def fused_reformer_kernel(tok_ref, w_ref, out_ref):
    scale = 1.0 / (HD ** 0.5)

    def mat(name, nrows, ncols):                  # static slice -> zero-cost view
        r = _OFF[name]
        return w_ref[r:r + nrows, 0:ncols]

    def vecrow(l, i, ncols):                      # one bias / LN row, shape (1, n)
        r = _OFF[f"vec{l}"] + i
        return w_ref[r:r + 1, 0:ncols]

    # ---- token embedding gather, fused in-kernel (one-hot matmul) ----------
    tok = tok_ref[...]                                            # (T, 1) int32
    iota_v = jax.lax.broadcasted_iota(jnp.int32, (T, VOCAB), 1)
    onehot = jnp.where(iota_v == tok, 1.0, 0.0)                   # (T, VOCAB) f32
    x = jnp.dot(onehot, mat("tok_emb", VOCAB, EMB),
                preferred_element_type=jnp.float32)               # (T, E)

    # ---- axial positional embedding: one batched matmul --------------------
    # Token rows arrive per batch in [even positions, odd positions] order --
    # exactly the permuted order the reference produces -- so group g = (b,
    # even/odd half) maps to contiguous rows, and W_pos = [row, col] * B.
    G = 2 * B
    half = S // 2
    wpos = mat("wpos", G * EMB, EMB).reshape(G, EMB, EMB)
    x = jnp.einsum("gre,gef->grf", x.reshape(G, half, EMB), wpos,
                   preferred_element_type=jnp.float32).reshape(T, EMB)

    # dropout: eval mode -> identity.  LSH hashes: dead code -> removed.

    # ---- stacked Reformer layers (unrolled; includes the outer residual) ---
    for l in range(LAYERS):
        # sublayer 1: chunk-local multi-head self-attention
        a = _layernorm(x, vecrow(l, _V_LN1G, EMB), vecrow(l, _V_LN1B, EMB))
        qkv = (jnp.dot(a, mat(f"wqkv{l}", EMB, 3 * EMB),
                       preferred_element_type=jnp.float32)
               + vecrow(l, _V_BQKV, 3 * EMB))
        q = (qkv[:, 0:EMB] * scale).reshape(N_CHUNKS, CHUNK, EMB)  # scale folded
        k = qkv[:, EMB:2 * EMB].reshape(N_CHUNKS, CHUNK, EMB)
        v = qkv[:, 2 * EMB:3 * EMB].reshape(N_CHUNKS, CHUNK, EMB)

        wo_r = _OFF[f"wo{l}"]
        attn = None
        for h in range(HEADS):                    # heads are tiny: unroll
            sl = slice(h * HD, (h + 1) * HD)
            s = jnp.einsum("rld,rmd->rlm", q[:, :, sl], k[:, :, sl],
                           preferred_element_type=jnp.float32)     # (R, L, L)
            s = s - jnp.max(s, axis=-1, keepdims=True)
            p = jnp.exp(s)
            p = p * pl.reciprocal(jnp.sum(p, axis=-1, keepdims=True), approx=True)
            o = jnp.einsum("rlm,rmd->rld", p, v[:, :, sl],
                           preferred_element_type=jnp.float32)     # (R, L, hd)
            # fold the head concat into the out-projection: accumulate o_h @ Wo[h]
            contrib = jnp.dot(o.reshape(T, HD),
                              w_ref[wo_r + h * HD: wo_r + (h + 1) * HD, 0:EMB],
                              preferred_element_type=jnp.float32)
            attn = contrib if attn is None else attn + contrib
        y = attn + vecrow(l, _V_BO, EMB) + x                       # inner residual 1

        # sublayer 2: position-wise feed-forward
        yn = _layernorm(y, vecrow(l, _V_LN2G, EMB), vecrow(l, _V_LN2B, EMB))
        hmid = jnp.maximum(
            jnp.dot(yn, mat(f"w1{l}", EMB, HIDDEN),
                    preferred_element_type=jnp.float32) + vecrow(l, _V_B1, HIDDEN),
            0.0)
        ff = jnp.dot(hmid, mat(f"w2{l}", HIDDEN, EMB),
                     preferred_element_type=jnp.float32) + vecrow(l, _V_B2, EMB)
        z = ff + y                                                 # inner residual 2
        x = z + x                        # outer residual from Reformer.forward

    # ---- final vocab projection + lane-dense (8, 128) store -----------------
    logits = jnp.dot(x, mat("fcw", EMB, VOCAB),
                     preferred_element_type=jnp.float32) + mat("fcb", 1, VOCAB)
    blocks = [logits[c * CHUNK:(c + 1) * CHUNK, :] for c in range(N_CHUNKS)]
    out_ref[...] = jnp.concatenate(blocks, axis=-1).astype(out_ref.dtype)


# ------------------------------ wrapper --------------------------------------
@jax.jit
def reformer_forward(tokens, w_slab):
    assert tokens.shape == (B, S)
    # Per-batch [even positions, odd positions] order == the permuted sequence
    # order the reference AxialPositionalEmbedding outputs, so the kernel needs
    # no in-kernel row shuffles.  (Tiny int32 op; depends on tokens so it stays
    # in the jitted forward.)
    tok_perm = jnp.concatenate([tokens[:, 0::2], tokens[:, 1::2]], axis=1)
    tok = tok_perm.reshape(T, 1).astype(jnp.int32)

    out = pl.pallas_call(
        fused_reformer_kernel,
        out_shape=jax.ShapeDtypeStruct((CHUNK, N_CHUNKS * VOCAB), jnp.float32),
        grid=(1,),
        in_specs=[pl.BlockSpec((T, 1), lambda i: (0, 0)),
                  pl.BlockSpec((_ROWS, LANES), lambda i: (0, 0))],
        out_specs=pl.BlockSpec((CHUNK, N_CHUNKS * VOCAB), lambda i: (0, 0)),
        compiler_params=pltpu.CompilerParams(dimension_semantics=("arbitrary",)),
    )(tok, w_slab)

    # Undo the lane packing: (CHUNK, n_chunks * V) -> (B, S, V).  4 KB transpose
    # fused into the same jitted program.
    logits = out.reshape(CHUNK, N_CHUNKS, VOCAB)
    logits = jnp.transpose(logits, (1, 0, 2)).reshape(B, S, VOCAB)
    return logits


# ------------------ one-time parameter preparation (not hot path) -------------
def prepare_weights(params):
    """Pack every weight / bias / LN parameter into a single lane-dense f32 slab.

    Runs ONCE outside the jitted forward (weights are static at inference)."""
    w = jnp.zeros((_ROWS, LANES), jnp.float32)

    def put(w, name, val):
        val = jnp.asarray(val, jnp.float32)
        r = _OFF[name]
        nr, nc = val.shape
        return w.at[r:r + nr, 0:nc].set(val)

    w = put(w, "tok_emb", params["token_emb"])
    row = params["row_emb"][:S]
    col = params["col_emb"][:S]
    w = put(w, "wpos", jnp.concatenate([row, col] * B, axis=0))
    for l, lp in enumerate(params["layers"]):
        w = put(w, f"wqkv{l}", lp["in_proj_w"].T)     # [E, 3E]
        w = put(w, f"wo{l}", lp["out_proj_w"].T)      # [E, E]
        w = put(w, f"w1{l}", lp["ff_w1"].T)           # [E, H]
        w = put(w, f"w2{l}", lp["ff_w2"].T)           # [H, E]
        vec = jnp.zeros((8, LANES), jnp.float32)
        vec = vec.at[_V_LN1G, :EMB].set(lp["ln1_g"])
        vec = vec.at[_V_LN1B, :EMB].set(lp["ln1_b"])
        vec = vec.at[_V_BQKV, :3 * EMB].set(lp["in_proj_b"])
        vec = vec.at[_V_BO, :EMB].set(lp["out_proj_b"])
        vec = vec.at[_V_LN2G, :EMB].set(lp["ln2_g"])
        vec = vec.at[_V_LN2B, :EMB].set(lp["ln2_b"])
        vec = vec.at[_V_B1, :HIDDEN].set(lp["ff_b1"])
        vec = vec.at[_V_B2, :EMB].set(lp["ff_b2"])
        r = _OFF[f"vec{l}"]
        w = w.at[r:r + 8, :].set(vec)
    w = put(w, "fcw", params["fc_w"].T)               # [E, V]
    w = put(w, "fcb", params["fc_b"].reshape(1, VOCAB))
    return w


# ----------------------------- parameter init --------------------------------
def make_params(key):
    def nrm(k, shape, scale=0.1):
        return scale * jax.random.normal(k, shape, dtype=jnp.float32)

    ks = iter(jax.random.split(key, 64))
    params = {
        "token_emb": nrm(next(ks), (VOCAB, EMB), 1.0),
        "row_emb": nrm(next(ks), (MAX_SEQ, EMB), 1.0),
        "col_emb": nrm(next(ks), (MAX_SEQ, EMB), 1.0),
        "fc_w": nrm(next(ks), (VOCAB, EMB)),
        "fc_b": nrm(next(ks), (VOCAB,)),
        "layers": [],
    }
    for _ in range(LAYERS):
        params["layers"].append({
            "in_proj_w": nrm(next(ks), (3 * EMB, EMB)),
            "in_proj_b": nrm(next(ks), (3 * EMB,)),
            "out_proj_w": nrm(next(ks), (EMB, EMB)),
            "out_proj_b": nrm(next(ks), (EMB,)),
            "ln1_g": jnp.ones((EMB,), jnp.float32),
            "ln1_b": jnp.zeros((EMB,), jnp.float32),
            "ln2_g": jnp.ones((EMB,), jnp.float32),
            "ln2_b": jnp.zeros((EMB,), jnp.float32),
            "ff_w1": nrm(next(ks), (HIDDEN, EMB)),
            "ff_b1": nrm(next(ks), (HIDDEN,)),
            "ff_w2": nrm(next(ks), (EMB, HIDDEN)),
            "ff_b2": nrm(next(ks), (EMB,)),
        })
    return params


# --------------------------------- main ---------------------------------------
if __name__ == "__main__":
    key = jax.random.PRNGKey(0)
    pkey, tkey = jax.random.split(key)
    params = make_params(pkey)

    # One-time weight packing, hoisted out of the per-call hot path.
    w_slab = jax.block_until_ready(prepare_weights(params))

    tokens = jax.random.randint(tkey, (B, S), 0, VOCAB, dtype=jnp.int32)

    logits = reformer_forward(tokens, w_slab)
    logits = jax.block_until_ready(logits)

    assert logits.shape == (B, S, VOCAB), logits.shape
    assert bool(jnp.all(jnp.isfinite(logits)))
    print("KERNEL_OK")
</pallas_src>

<mosaic_0001>
module attributes {stable_mosaic.version = 11 : i64} {
  func.func @fused_reformer_kernel(%arg0: i32, %arg1: memref<32x1xi32, #tpu.memory_space<vmem>>, %arg2: memref<296x128xf32, #tpu.memory_space<vmem>>, %arg3: memref<8x128xf32, #tpu.memory_space<vmem>>) attributes {dimension_semantics = [#tpu.dimension_semantics<arbitrary>], iteration_bounds = array<i64: 1>, scalar_prefetch = 0 : i64, scratch_operands = 0 : i64, tpu.core_type = #tpu.core_type<tc>, window_params = [{pipeline_mode = #tpu.pipeline_mode<synchronous>, transform_indices = @transform_0, window_bounds = array<i64: 32, 1>}, {pipeline_mode = #tpu.pipeline_mode<synchronous>, transform_indices = @transform_1, window_bounds = array<i64: 296, 128>}, {pipeline_mode = #tpu.pipeline_mode<synchronous>, transform_indices = @transform_2, window_bounds = array<i64: 8, 128>}]} {
    %c0 = arith.constant 0 : index
    %c0_0 = arith.constant 0 : index
    %0 = vector.load %arg1[%c0, %c0_0] : memref<32x1xi32, #tpu.memory_space<vmem>>, vector<32x1xi32>
    %1 = tpu.iota {dimensions = array<i32: 1>} : vector<32x32xi32>
    %2 = vector.broadcast %0 : vector<32x1xi32> to vector<32x32xi32>
    %3 = arith.cmpi eq, %1, %2 : vector<32x32xi32>
    %cst = arith.constant 1.000000e+00 : f32
    %cst_1 = arith.constant 0.000000e+00 : f32
    %4 = vector.broadcast %cst : f32 to vector<32x32xf32>
    %5 = vector.broadcast %cst_1 : f32 to vector<32x32xf32>
    %6 = arith.select %3, %4, %5 : vector<32x32xi1>, vector<32x32xf32>
    %c0_2 = arith.constant 0 : index
    %c0_3 = arith.constant 0 : index
    %7 = vector.load %arg2[%c0_2, %c0_3] : memref<296x128xf32, #tpu.memory_space<vmem>>, vector<32x16xf32>
    %cst_4 = arith.constant dense<0.000000e+00> : vector<32x16xf32>
    %8 = tpu.matmul %6, %7, %cst_4 {dimension_numbers = #tpu.dot_dimension_numbers<[1], [0], [0], [1], [0, 0, 1, 1], [], []>} : vector<32x32xf32>, vector<32x16xf32>, vector<32x16xf32> -> vector<32x16xf32>
    %c32 = arith.constant 32 : index
    %c0_5 = arith.constant 0 : index
    %9 = vector.load %arg2[%c32, %c0_5] : memref<296x128xf32, #tpu.memory_space<vmem>>, vector<64x16xf32>
    %10 = vector.shape_cast %9 : vector<64x16xf32> to vector<4x16x16xf32>
    %11 = vector.shape_cast %8 : vector<32x16xf32> to vector<4x8x16xf32>
    "tpu.trace_start"() <{level = 10 : i32, message = "gre,gef->grf"}> : () -> ()
    %cst_6 = arith.constant dense<0.000000e+00> : vector<4x8x16xf32>
    %12 = tpu.matmul %11, %10, %cst_6 {dimension_numbers = #tpu.dot_dimension_numbers<[2], [1], [1], [2], [0, 0, 0, 1, 1, 2], [0], [0]>} : vector<4x8x16xf32>, vector<4x16x16xf32>, vector<4x8x16xf32> -> vector<4x8x16xf32>
    "tpu.trace_stop"() : () -> ()
    %13 = vector.shape_cast %12 : vector<4x8x16xf32> to vector<32x16xf32>
    %c176 = arith.constant 176 : index
    %c0_7 = arith.constant 0 : index
    %14 = vector.load %arg2[%c176, %c0_7] : memref<296x128xf32, #tpu.memory_space<vmem>>, vector<1x16xf32>
    %c177 = arith.constant 177 : index
    %c0_8 = arith.constant 0 : index
    %15 = vector.load %arg2[%c177, %c0_8] : memref<296x128xf32, #tpu.memory_space<vmem>>, vector<1x16xf32>
    %cst_9 = arith.constant dense<0.000000e+00> : vector<32xf32>
    %16 = vector.multi_reduction <add>, %13, %cst_9 [1] : vector<32x16xf32> to vector<32xf32>
    %17 = vector.shape_cast %16 : vector<32xf32> to vector<32x1xf32>
    %cst_10 = arith.constant 1.600000e+01 : f32
    %18 = vector.broadcast %cst_10 : f32 to vector<32x1xf32>
    %19 = arith.divf %17, %18 : vector<32x1xf32>
    %20 = vector.broadcast %19 : vector<32x1xf32> to vector<32x16xf32>
    %21 = arith.subf %13, %20 : vector<32x16xf32>
    %22 = arith.mulf %21, %21 : vector<32x16xf32>
    %cst_11 = arith.constant dense<0.000000e+00> : vector<32xf32>
    %23 = vector.multi_reduction <add>, %22, %cst_11 [1] : vector<32x16xf32> to vector<32xf32>
    %24 = vector.shape_cast %23 : vector<32xf32> to vector<32x1xf32>
    %cst_12 = arith.constant 1.600000e+01 : f32
    %25 = vector.broadcast %cst_12 : f32 to vector<32x1xf32>
    %26 = arith.divf %24, %25 : vector<32x1xf32>
    %27 = vector.broadcast %19 : vector<32x1xf32> to vector<32x16xf32>
    %28 = arith.subf %13, %27 : vector<32x16xf32>
    %cst_13 = arith.constant 9.99999974E-6 : f32
    %29 = vector.broadcast %cst_13 : f32 to vector<32x1xf32>
    %30 = arith.addf %26, %29 : vector<32x1xf32>
    %31 = math.rsqrt %30 : vector<32x1xf32>
    %32 = vector.broadcast %31 : vector<32x1xf32> to vector<32x16xf32>
    %33 = arith.mulf %28, %32 : vector<32x16xf32>
    %34 = vector.broadcast %14 : vector<1x16xf32> to vector<32x16xf32>
    %35 = arith.mulf %33, %34 : vector<32x16xf32>
    %36 = vector.broadcast %15 : vector<1x16xf32> to vector<32x16xf32>
    %37 = arith.addf %35, %36 : vector<32x16xf32>
    %c96 = arith.constant 96 : index
    %c0_14 = arith.constant 0 : index
    %38 = vector.load %arg2[%c96, %c0_14] : memref<296x128xf32, #tpu.memory_space<vmem>>, vector<16x48xf32>
    %cst_15 = arith.constant dense<0.000000e+00> : vector<32x48xf32>
    %39 = tpu.matmul %37, %38, %cst_15 {dimension_numbers = #tpu.dot_dimension_numbers<[1], [0], [0], [1], [0, 0, 1, 1], [], []>} : vector<32x16xf32>, vector<16x48xf32>, vector<32x48xf32> -> vector<32x48xf32>
    %c178 = arith.constant 178 : index
    %c0_16 = arith.constant 0 : index
    %40 = vector.load %arg2[%c178, %c0_16] : memref<296x128xf32, #tpu.memory_space<vmem>>, vector<1x48xf32>
    %41 = vector.broadcast %40 : vector<1x48xf32> to vector<32x48xf32>
    %42 = arith.addf %39, %41 : vector<32x48xf32>
    %43 = vector.extract_strided_slice %42 {offsets = [0, 0], sizes = [32, 16], strides = [1, 1]} : vector<32x48xf32> to vector<32x16xf32>
    %cst_17 = arith.constant 5.000000e-01 : f32
    %44 = vector.broadcast %cst_17 : f32 to vector<32x16xf32>
    %45 = arith.mulf %43, %44 : vector<32x16xf32>
    %46 = vector.shape_cast %45 : vector<32x16xf32> to vector<4x8x16xf32>
    %47 = vector.extract_strided_slice %42 {offsets = [0, 16], sizes = [32, 16], strides = [1, 1]} : vector<32x48xf32> to vector<32x16xf32>
    %48 = vector.shape_cast %47 : vector<32x16xf32> to vector<4x8x16xf32>
    %49 = vector.extract_strided_slice %42 {offsets = [0, 32], sizes = [32, 16], strides = [1, 1]} : vector<32x48xf32> to vector<32x16xf32>
    %50 = vector.shape_cast %49 : vector<32x16xf32> to vector<4x8x16xf32>
    %51 = vector.extract_strided_slice %46 {offsets = [0, 0, 0], sizes = [4, 8, 4], strides = [1, 1, 1]} : vector<4x8x16xf32> to vector<4x8x4xf32>
    %52 = vector.extract_strided_slice %48 {offsets = [0, 0, 0], sizes = [4, 8, 4], strides = [1, 1, 1]} : vector<4x8x16xf32> to vector<4x8x4xf32>
    "tpu.trace_start"() <{level = 10 : i32, message = "rld,rmd->rlm"}> : () -> ()
    %cst_18 = arith.constant dense<0.000000e+00> : vector<4x8x8xf32>
    %53 = tpu.matmul %51, %52, %cst_18 {dimension_numbers = #tpu.dot_dimension_numbers<[2], [2], [1], [1], [0, 0, 0, 1, 1, 1], [0], [0]>} : vector<4x8x4xf32>, vector<4x8x4xf32>, vector<4x8x8xf32> -> vector<4x8x8xf32>
    "tpu.trace_stop"() : () -> ()
    %cst_19 = arith.constant dense<0xFF800000> : vector<4x8xf32>
    %54 = vector.multi_reduction <maximumf>, %53, %cst_19 [2] : vector<4x8x8xf32> to vector<4x8xf32>
    %55 = vector.shape_cast %54 : vector<4x8xf32> to vector<4x8x1xf32>
    %56 = vector.broadcast %55 : vector<4x8x1xf32> to vector<4x8x8xf32>
    %57 = arith.subf %53, %56 : vector<4x8x8xf32>
    %58 = math.exp %57 : vector<4x8x8xf32>
    %cst_20 = arith.constant dense<0.000000e+00> : vector<4x8xf32>
    %59 = vector.multi_reduction <add>, %58, %cst_20 [2] : vector<4x8x8xf32> to vector<4x8xf32>
    %60 = vector.shape_cast %59 : vector<4x8xf32> to vector<4x8x1xf32>
    %61 = tpu.reciprocal %60 {approx = true} : vector<4x8x1xf32> -> vector<4x8x1xf32>
    %62 = vector.broadcast %61 : vector<4x8x1xf32> to vector<4x8x8xf32>
    %63 = arith.mulf %58, %62 : vector<4x8x8xf32>
    %64 = vector.extract_strided_slice %50 {offsets = [0, 0, 0], sizes = [4, 8, 4], strides = [1, 1, 1]} : vector<4x8x16xf32> to vector<4x8x4xf32>
    "tpu.trace_start"() <{level = 10 : i32, message = "rlm,rmd->rld"}> : () -> ()
    %cst_21 = arith.constant dense<0.000000e+00> : vector<4x8x4xf32>
    %65 = tpu.matmul %63, %64, %cst_21 {dimension_numbers = #tpu.dot_dimension_numbers<[2], [1], [1], [2], [0, 0, 0, 1, 1, 2], [0], [0]>} : vector<4x8x8xf32>, vector<4x8x4xf32>, vector<4x8x4xf32> -> vector<4x8x4xf32>
    "tpu.trace_stop"() : () -> ()
    %66 = vector.shape_cast %65 : vector<4x8x4xf32> to vector<32x4xf32>
    %c112 = arith.constant 112 : index
    %c0_22 = arith.constant 0 : index
    %67 = vector.load %arg2[%c112, %c0_22] : memref<296x128xf32, #tpu.memory_space<vmem>>, vector<4x16xf32>
    %cst_23 = arith.constant dense<0.000000e+00> : vector<32x16xf32>
    %68 = tpu.matmul %66, %67, %cst_23 {dimension_numbers = #tpu.dot_dimension_numbers<[1], [0], [0], [1], [0, 0, 1, 1], [], []>} : vector<32x4xf32>, vector<4x16xf32>, vector<32x16xf32> -> vector<32x16xf32>
    %69 = vector.extract_strided_slice %46 {offsets = [0, 0, 4], sizes = [4, 8, 4], strides = [1, 1, 1]} : vector<4x8x16xf32> to vector<4x8x4xf32>
    %70 = vector.extract_strided_slice %48 {offsets = [0, 0, 4], sizes = [4, 8, 4], strides = [1, 1, 1]} : vector<4x8x16xf32> to vector<4x8x4xf32>
    "tpu.trace_start"() <{level = 10 : i32, message = "rld,rmd->rlm"}> : () -> ()
    %cst_24 = arith.constant dense<0.000000e+00> : vector<4x8x8xf32>
    %71 = tpu.matmul %69, %70, %cst_24 {dimension_numbers = #tpu.dot_dimension_numbers<[2], [2], [1], [1], [0, 0, 0, 1, 1, 1], [0], [0]>} : vector<4x8x4xf32>, vector<4x8x4xf32>, vector<4x8x8xf32> -> vector<4x8x8xf32>
    "tpu.trace_stop"() : () -> ()
    %cst_25 = arith.constant dense<0xFF800000> : vector<4x8xf32>
    %72 = vector.multi_reduction <maximumf>, %71, %cst_25 [2] : vector<4x8x8xf32> to vector<4x8xf32>
    %73 = vector.shape_cast %72 : vector<4x8xf32> to vector<4x8x1xf32>
    %74 = vector.broadcast %73 : vector<4x8x1xf32> to vector<4x8x8xf32>
    %75 = arith.subf %71, %74 : vector<4x8x8xf32>
    %76 = math.exp %75 : vector<4x8x8xf32>
    %cst_26 = arith.constant dense<0.000000e+00> : vector<4x8xf32>
    %77 = vector.multi_reduction <add>, %76, %cst_26 [2] : vector<4x8x8xf32> to vector<4x8xf32>
    %78 = vector.shape_cast %77 : vector<4x8xf32> to vector<4x8x1xf32>
    %79 = tpu.reciprocal %78 {approx = true} : vector<4x8x1xf32> -> vector<4x8x1xf32>
    %80 = vector.broadcast %79 : vector<4x8x1xf32> to vector<4x8x8xf32>
    %81 = arith.mulf %76, %80 : vector<4x8x8xf32>
    %82 = vector.extract_strided_slice %50 {offsets = [0, 0, 4], sizes = [4, 8, 4], strides = [1, 1, 1]} : vector<4x8x16xf32> to vector<4x8x4xf32>
    "tpu.trace_start"() <{level = 10 : i32, message = "rlm,rmd->rld"}> : () -> ()
    %cst_27 = arith.constant dense<0.000000e+00> : vector<4x8x4xf32>
    %83 = tpu.matmul %81, %82, %cst_27 {dimension_numbers = #tpu.dot_dimension_numbers<[2], [1], [1], [2], [0, 0, 0, 1, 1, 2], [0], [0]>} : vector<4x8x8xf32>, vector<4x8x4xf32>, vector<4x8x4xf32> -> vector<4x8x4xf32>
    "tpu.trace_stop"() : () -> ()
    %84 = vector.shape_cast %83 : vector<4x8x4xf32> to vector<32x4xf32>
    %c116 = arith.constant 116 : index
    %c0_28 = arith.constant 0 : index
    %85 = vector.load %arg2[%c116, %c0_28] : memref<296x128xf32, #tpu.memory_space<vmem>>, vector<4x16xf32>
    %cst_29 = arith.constant dense<0.000000e+00> : vector<32x16xf32>
    %86 = tpu.matmul %84, %85, %cst_29 {dimension_numbers = #tpu.dot_dimension_numbers<[1], [0], [0], [1], [0, 0, 1, 1], [], []>} : vector<32x4xf32>, vector<4x16xf32>, vector<32x16xf32> -> vector<32x16xf32>
    %87 = arith.addf %68, %86 : vector<32x16xf32>
    %88 = vector.extract_strided_slice %46 {offsets = [0, 0, 8], sizes = [4, 8, 4], strides = [1, 1, 1]} : vector<4x8x16xf32> to vector<4x8x4xf32>
    %89 = vector.extract_strided_slice %48 {offsets = [0, 0, 8], sizes = [4, 8, 4], strides = [1, 1, 1]} : vector<4x8x16xf32> to vector<4x8x4xf32>
    "tpu.trace_start"() <{level = 10 : i32, message = "rld,rmd->rlm"}> : () -> ()
    %cst_30 = arith.constant dense<0.000000e+00> : vector<4x8x8xf32>
    %90 = tpu.matmul %88, %89, %cst_30 {dimension_numbers = #tpu.dot_dimension_numbers<[2], [2], [1], [1], [0, 0, 0, 1, 1, 1], [0], [0]>} : vector<4x8x4xf32>, vector<4x8x4xf32>, vector<4x8x8xf32> -> vector<4x8x8xf32>
    "tpu.trace_stop"() : () -> ()
    %cst_31 = arith.constant dense<0xFF800000> : vector<4x8xf32>
    %91 = vector.multi_reduction <maximumf>, %90, %cst_31 [2] : vector<4x8x8xf32> to vector<4x8xf32>
    %92 = vector.shape_cast %91 : vector<4x8xf32> to vector<4x8x1xf32>
    %93 = vector.broadcast %92 : vector<4x8x1xf32> to vector<4x8x8xf32>
    %94 = arith.subf %90, %93 : vector<4x8x8xf32>
    %95 = math.exp %94 : vector<4x8x8xf32>
    %cst_32 = arith.constant dense<0.000000e+00> : vector<4x8xf32>
    %96 = vector.multi_reduction <add>, %95, %cst_32 [2] : vector<4x8x8xf32> to vector<4x8xf32>
    %97 = vector.shape_cast %96 : vector<4x8xf32> to vector<4x8x1xf32>
    %98 = tpu.reciprocal %97 {approx = true} : vector<4x8x1xf32> -> vector<4x8x1xf32>
    %99 = vector.broadcast %98 : vector<4x8x1xf32> to vector<4x8x8xf32>
    %100 = arith.mulf %95, %99 : vector<4x8x8xf32>
    %101 = vector.extract_strided_slice %50 {offsets = [0, 0, 8], sizes = [4, 8, 4], strides = [1, 1, 1]} : vector<4x8x16xf32> to vector<4x8x4xf32>
    "tpu.trace_start"() <{level = 10 : i32, message = "rlm,rmd->rld"}> : () -> ()
    %cst_33 = arith.constant dense<0.000000e+00> : vector<4x8x4xf32>
    %102 = tpu.matmul %100, %101, %cst_33 {dimension_numbers = #tpu.dot_dimension_numbers<[2], [1], [1], [2], [0, 0, 0, 1, 1, 2], [0], [0]>} : vector<4x8x8xf32>, vector<4x8x4xf32>, vector<4x8x4xf32> -> vector<4x8x4xf32>
    "tpu.trace_stop"() : () -> ()
    %103 = vector.shape_cast %102 : vector<4x8x4xf32> to vector<32x4xf32>
    %c120 = arith.constant 120 : index
    %c0_34 = arith.constant 0 : index
    %104 = vector.load %arg2[%c120, %c0_34] : memref<296x128xf32, #tpu.memory_space<vmem>>, vector<4x16xf32>
    %cst_35 = arith.constant dense<0.000000e+00> : vector<32x16xf32>
    %105 = tpu.matmul %103, %104, %cst_35 {dimension_numbers = #tpu.dot_dimension_numbers<[1], [0], [0], [1], [0, 0, 1, 1], [], []>} : vector<32x4xf32>, vector<4x16xf32>, vector<32x16xf32> -> vector<32x16xf32>
    %106 = arith.addf %87, %105 : vector<32x16xf32>
    %107 = vector.extract_strided_slice %46 {offsets = [0, 0, 12], sizes = [4, 8, 4], strides = [1, 1, 1]} : vector<4x8x16xf32> to vector<4x8x4xf32>
    %108 = vector.extract_strided_slice %48 {offsets = [0, 0, 12], sizes = [4, 8, 4], strides = [1, 1, 1]} : vector<4x8x16xf32> to vector<4x8x4xf32>
    "tpu.trace_start"() <{level = 10 : i32, message = "rld,rmd->rlm"}> : () -> ()
    %cst_36 = arith.constant dense<0.000000e+00> : vector<4x8x8xf32>
    %109 = tpu.matmul %107, %108, %cst_36 {dimension_numbers = #tpu.dot_dimension_numbers<[2], [2], [1], [1], [0, 0, 0, 1, 1, 1], [0], [0]>} : vector<4x8x4xf32>, vector<4x8x4xf32>, vector<4x8x8xf32> -> vector<4x8x8xf32>
    "tpu.trace_stop"() : () -> ()
    %cst_37 = arith.constant dense<0xFF800000> : vector<4x8xf32>
    %110 = vector.multi_reduction <maximumf>, %109, %cst_37 [2] : vector<4x8x8xf32> to vector<4x8xf32>
    %111 = vector.shape_cast %110 : vector<4x8xf32> to vector<4x8x1xf32>
    %112 = vector.broadcast %111 : vector<4x8x1xf32> to vector<4x8x8xf32>
    %113 = arith.subf %109, %112 : vector<4x8x8xf32>
    %114 = math.exp %113 : vector<4x8x8xf32>
    %cst_38 = arith.constant dense<0.000000e+00> : vector<4x8xf32>
    %115 = vector.multi_reduction <add>, %114, %cst_38 [2] : vector<4x8x8xf32> to vector<4x8xf32>
    %116 = vector.shape_cast %115 : vector<4x8xf32> to vector<4x8x1xf32>
    %117 = tpu.reciprocal %116 {approx = true} : vector<4x8x1xf32> -> vector<4x8x1xf32>
    %118 = vector.broadcast %117 : vector<4x8x1xf32> to vector<4x8x8xf32>
    %119 = arith.mulf %114, %118 : vector<4x8x8xf32>
    %120 = vector.extract_strided_slice %50 {offsets = [0, 0, 12], sizes = [4, 8, 4], strides = [1, 1, 1]} : vector<4x8x16xf32> to vector<4x8x4xf32>
    "tpu.trace_start"() <{level = 10 : i32, message = "rlm,rmd->rld"}> : () -> ()
    %cst_39 = arith.constant dense<0.000000e+00> : vector<4x8x4xf32>
    %121 = tpu.matmul %119, %120, %cst_39 {dimension_numbers = #tpu.dot_dimension_numbers<[2], [1], [1], [2], [0, 0, 0, 1, 1, 2], [0], [0]>} : vector<4x8x8xf32>, vector<4x8x4xf32>, vector<4x8x4xf32> -> vector<4x8x4xf32>
    "tpu.trace_stop"() : () -> ()
    %122 = vector.shape_cast %121 : vector<4x8x4xf32> to vector<32x4xf32>
    %c124 = arith.constant 124 : index
    %c0_40 = arith.constant 0 : index
    %123 = vector.load %arg2[%c124, %c0_40] : memref<296x128xf32, #tpu.memory_space<vmem>>, vector<4x16xf32>
    %cst_41 = arith.constant dense<0.000000e+00> : vector<32x16xf32>
    %124 = tpu.matmul %122, %123, %cst_41 {dimension_numbers = #tpu.dot_dimension_numbers<[1], [0], [0], [1], [0, 0, 1, 1], [], []>} : vector<32x4xf32>, vector<4x16xf32>, vector<32x16xf32> -> vector<32x16xf32>
    %125 = arith.addf %106, %124 : vector<32x16xf32>
    %c179 = arith.constant 179 : index
    %c0_42 = arith.constant 0 : index
    %126 = vector.load %arg2[%c179, %c0_42] : memref<296x128xf32, #tpu.memory_space<vmem>>, vector<1x16xf32>
    %127 = vector.broadcast %126 : vector<1x16xf32> to vector<32x16xf32>
    %128 = arith.addf %125, %127 : vector<32x16xf32>
    %129 = arith.addf %128, %13 : vector<32x16xf32>
    %c180 = arith.constant 180 : index
    %c0_43 = arith.constant 0 : index
    %130 = vector.load %arg2[%c180, %c0_43] : memref<296x128xf32, #tpu.memory_space<vmem>>, vector<1x16xf32>
    %c181 = arith.constant 181 : index
    %c0_44 = arith.constant 0 : index
    %131 = vector.load %arg2[%c181, %c0_44] : memref<296x128xf32, #tpu.memory_space<vmem>>, vector<1x16xf32>
    %cst_45 = arith.constant dense<0.000000e+00> : vector<32xf32>
    %132 = vector.multi_reduction <add>, %129, %cst_45 [1] : vector<32x16xf32> to vector<32xf32>
    %133 = vector.shape_cast %132 : vector<32xf32> to vector<32x1xf32>
    %cst_46 = arith.constant 1.600000e+01 : f32
    %134 = vector.broadcast %cst_46 : f32 to vector<32x1xf32>
    %135 = arith.divf %133, %134 : vector<32x1xf32>
    %136 = vector.broadcast %135 : vector<32x1xf32> to vector<32x16xf32>
    %137 = arith.subf %129, %136 : vector<32x16xf32>
    %138 = arith.mulf %137, %137 : vector<32x16xf32>
    %cst_47 = arith.constant dense<0.000000e+00> : vector<32xf32>
    %139 = vector.multi_reduction <add>, %138, %cst_47 [1] : vector<32x16xf32> to vector<32xf32>
    %140 = vector.shape_cast %139 : vector<32xf32> to vector<32x1xf32>
    %cst_48 = arith.constant 1.600000e+01 : f32
    %141 = vector.broadcast %cst_48 : f32 to vector<32x1xf32>
    %142 = arith.divf %140, %141 : vector<32x1xf32>
    %143 = vector.broadcast %135 : vector<32x1xf32> to vector<32x16xf32>
    %144 = arith.subf %129, %143 : vector<32x16xf32>
    %cst_49 = arith.constant 9.99999974E-6 : f32
    %145 = vector.broadcast %cst_49 : f32 to vector<32x1xf32>
    %146 = arith.addf %142, %145 : vector<32x1xf32>
    %147 = math.rsqrt %146 : vector<32x1xf32>
    %148 = vector.broadcast %147 : vector<32x1xf32> to vector<32x16xf32>
    %149 = arith.mulf %144, %148 : vector<32x16xf32>
    %150 = vector.broadcast %130 : vector<1x16xf32> to vector<32x16xf32>
    %151 = arith.mulf %149, %150 : vector<32x16xf32>
    %152 = vector.broadcast %131 : vector<1x16xf32> to vector<32x16xf32>
    %153 = arith.addf %151, %152 : vector<32x16xf32>
    %c128 = arith.constant 128 : index
    %c0_50 = arith.constant 0 : index
    %154 = vector.load %arg2[%c128, %c0_50] : memref<296x128xf32, #tpu.memory_space<vmem>>, vector<16x32xf32>
    %cst_51 = arith.constant dense<0.000000e+00> : vector<32x32xf32>
    %155 = tpu.matmul %153, %154, %cst_51 {dimension_numbers = #tpu.dot_dimension_numbers<[1], [0], [0], [1], [0, 0, 1, 1], [], []>} : vector<32x16xf32>, vector<16x32xf32>, vector<32x32xf32> -> vector<32x32xf32>
    %c182 = arith.constant 182 : index
    %c0_52 = arith.constant 0 : index
    %156 = vector.load %arg2[%c182, %c0_52] : memref<296x128xf32, #tpu.memory_space<vmem>>, vector<1x32xf32>
    %157 = vector.broadcast %156 : vector<1x32xf32> to vector<32x32xf32>
    %158 = arith.addf %155, %157 : vector<32x32xf32>
    %cst_53 = arith.constant 0.000000e+00 : f32
    %159 = vector.broadcast %cst_53 : f32 to vector<32x32xf32>
    %160 = arith.maximumf %158, %159 : vector<32x32xf32>
    %c144 = arith.constant 144 : index
    %c0_54 = arith.constant 0 : index
    %161 = vector.load %arg2[%c144, %c0_54] : memref<296x128xf32, #tpu.memory_space<vmem>>, vector<32x16xf32>
    %cst_55 = arith.constant dense<0.000000e+00> : vector<32x16xf32>
    %162 = tpu.matmul %160, %161, %cst_55 {dimension_numbers = #tpu.dot_dimension_numbers<[1], [0], [0], [1], [0, 0, 1, 1], [], []>} : vector<32x32xf32>, vector<32x16xf32>, vector<32x16xf32> -> vector<32x16xf32>
    %c183 = arith.constant 183 : index
    %c0_56 = arith.constant 0 : index
    %163 = vector.load %arg2[%c183, %c0_56] : memref<296x128xf32, #tpu.memory_space<vmem>>, vector<1x16xf32>
    %164 = vector.broadcast %163 : vector<1x16xf32> to vector<32x16xf32>
    %165 = arith.addf %162, %164 : vector<32x16xf32>
    %166 = arith.addf %165, %129 : vector<32x16xf32>
    %167 = arith.addf %166, %13 : vector<32x16xf32>
    %c264 = arith.constant 264 : index
    %c0_57 = arith.constant 0 : index
    %168 = vector.load %arg2[%c264, %c0_57] : memref<296x128xf32, #tpu.memory_space<vmem>>, vector<1x16xf32>
    %c265 = arith.constant 265 : index
    %c0_58 = arith.constant 0 : index
    %169 = vector.load %arg2[%c265, %c0_58] : memref<296x128xf32, #tpu.memory_space<vmem>>, vector<1x16xf32>
    %cst_59 = arith.constant dense<0.000000e+00> : vector<32xf32>
    %170 = vector.multi_reduction <add>, %167, %cst_59 [1] : vector<32x16xf32> to vector<32xf32>
    %171 = vector.shape_cast %170 : vector<32xf32> to vector<32x1xf32>
    %cst_60 = arith.constant 1.600000e+01 : f32
    %172 = vector.broadcast %cst_60 : f32 to vector<32x1xf32>
    %173 = arith.divf %171, %172 : vector<32x1xf32>
    %174 = vector.broadcast %173 : vector<32x1xf32> to vector<32x16xf32>
    %175 = arith.subf %167, %174 : vector<32x16xf32>
    %176 = arith.mulf %175, %175 : vector<32x16xf32>
    %cst_61 = arith.constant dense<0.000000e+00> : vector<32xf32>
    %177 = vector.multi_reduction <add>, %176, %cst_61 [1] : vector<32x16xf32> to vector<32xf32>
    %178 = vector.shape_cast %177 : vector<32xf32> to vector<32x1xf32>
    %cst_62 = arith.constant 1.600000e+01 : f32
    %179 = vector.broadcast %cst_62 : f32 to vector<32x1xf32>
    %180 = arith.divf %178, %179 : vector<32x1xf32>
    %181 = vector.broadcast %173 : vector<32x1xf32> to vector<32x16xf32>
    %182 = arith.subf %167, %181 : vector<32x16xf32>
    %cst_63 = arith.constant 9.99999974E-6 : f32
    %183 = vector.broadcast %cst_63 : f32 to vector<32x1xf32>
    %184 = arith.addf %180, %183 : vector<32x1xf32>
    %185 = math.rsqrt %184 : vector<32x1xf32>
    %186 = vector.broadcast %185 : vector<32x1xf32> to vector<32x16xf32>
    %187 = arith.mulf %182, %186 : vector<32x16xf32>
    %188 = vector.broadcast %168 : vector<1x16xf32> to vector<32x16xf32>
    %189 = arith.mulf %187, %188 : vector<32x16xf32>
    %190 = vector.broadcast %169 : vector<1x16xf32> to vector<32x16xf32>
    %191 = arith.addf %189, %190 : vector<32x16xf32>
    %c184 = arith.constant 184 : index
    %c0_64 = arith.constant 0 : index
    %192 = vector.load %arg2[%c184, %c0_64] : memref<296x128xf32, #tpu.memory_space<vmem>>, vector<16x48xf32>
    %cst_65 = arith.constant dense<0.000000e+00> : vector<32x48xf32>
    %193 = tpu.matmul %191, %192, %cst_65 {dimension_numbers = #tpu.dot_dimension_numbers<[1], [0], [0], [1], [0, 0, 1, 1], [], []>} : vector<32x16xf32>, vector<16x48xf32>, vector<32x48xf32> -> vector<32x48xf32>
    %c266 = arith.constant 266 : index
    %c0_66 = arith.constant 0 : index
    %194 = vector.load %arg2[%c266, %c0_66] : memref<296x128xf32, #tpu.memory_space<vmem>>, vector<1x48xf32>
    %195 = vector.broadcast %194 : vector<1x48xf32> to vector<32x48xf32>
    %196 = arith.addf %193, %195 : vector<32x48xf32>
    %197 = vector.extract_strided_slice %196 {offsets = [0, 0], sizes = [32, 16], strides = [1, 1]} : vector<32x48xf32> to vector<32x16xf32>
    %cst_67 = arith.constant 5.000000e-01 : f32
    %198 = vector.broadcast %cst_67 : f32 to vector<32x16xf32>
    %199 = arith.mulf %197, %198 : vector<32x16xf32>
    %200 = vector.shape_cast %199 : vector<32x16xf32> to vector<4x8x16xf32>
    %201 = vector.extract_strided_slice %196 {offsets = [0, 16], sizes = [32, 16], strides = [1, 1]} : vector<32x48xf32> to vector<32x16xf32>
    %202 = vector.shape_cast %201 : vector<32x16xf32> to vector<4x8x16xf32>
    %203 = vector.extract_strided_slice %196 {offsets = [0, 32], sizes = [32, 16], strides = [1, 1]} : vector<32x48xf32> to vector<32x16xf32>
    %204 = vector.shape_cast %203 : vector<32x16xf32> to vector<4x8x16xf32>
    %205 = vector.extract_strided_slice %200 {offsets = [0, 0, 0], sizes = [4, 8, 4], strides = [1, 1, 1]} : vector<4x8x16xf32> to vector<4x8x4xf32>
    %206 = vector.extract_strided_slice %202 {offsets = [0, 0, 0], sizes = [4, 8, 4], strides = [1, 1, 1]} : vector<4x8x16xf32> to vector<4x8x4xf32>
    "tpu.trace_start"() <{level = 10 : i32, message = "rld,rmd->rlm"}> : () -> ()
    %cst_68 = arith.constant dense<0.000000e+00> : vector<4x8x8xf32>
    %207 = tpu.matmul %205, %206, %cst_68 {dimension_numbers = #tpu.dot_dimension_numbers<[2], [2], [1], [1], [0, 0, 0, 1, 1, 1], [0], [0]>} : vector<4x8x4xf32>, vector<4x8x4xf32>, vector<4x8x8xf32> -> vector<4x8x8xf32>
    "tpu.trace_stop"() : () -> ()
    %cst_69 = arith.constant dense<0xFF800000> : vector<4x8xf32>
    %208 = vector.multi_reduction <maximumf>, %207, %cst_69 [2] : vector<4x8x8xf32> to vector<4x8xf32>
    %209 = vector.shape_cast %208 : vector<4x8xf32> to vector<4x8x1xf32>
    %210 = vector.broadcast %209 : vector<4x8x1xf32> to vector<4x8x8xf32>
    %211 = arith.subf %207, %210 : vector<4x8x8xf32>
    %212 = math.exp %211 : vector<4x8x8xf32>
    %cst_70 = arith.constant dense<0.000000e+00> : vector<4x8xf32>
    %213 = vector.multi_reduction <add>, %212, %cst_70 [2] : vector<4x8x8xf32> to vector<4x8xf32>
    %214 = vector.shape_cast %213 : vector<4x8xf32> to vector<4x8x1xf32>
    %215 = tpu.reciprocal %214 {approx = true} : vector<4x8x1xf32> -> vector<4x8x1xf32>
    %216 = vector.broadcast %215 : vector<4x8x1xf32> to vector<4x8x8xf32>
    %217 = arith.mulf %212, %216 : vector<4x8x8xf32>
    %218 = vector.extract_strided_slice %204 {offsets = [0, 0, 0], sizes = [4, 8, 4], strides = [1, 1, 1]} : vector<4x8x16xf32> to vector<4x8x4xf32>
    "tpu.trace_start"() <{level = 10 : i32, message = "rlm,rmd->rld"}> : () -> ()
    %cst_71 = arith.constant dense<0.000000e+00> : vector<4x8x4xf32>
    %219 = tpu.matmul %217, %218, %cst_71 {dimension_numbers = #tpu.dot_dimension_numbers<[2], [1], [1], [2], [0, 0, 0, 1, 1, 2], [0], [0]>} : vector<4x8x8xf32>, vector<4x8x4xf32>, vector<4x8x4xf32> -> vector<4x8x4xf32>
    "tpu.trace_stop"() : () -> ()
    %220 = vector.shape_cast %219 : vector<4x8x4xf32> to vector<32x4xf32>
    %c200 = arith.constant 200 : index
    %c0_72 = arith.constant 0 : index
    %221 = vector.load %arg2[%c200, %c0_72] : memref<296x128xf32, #tpu.memory_space<vmem>>, vector<4x16xf32>
    %cst_73 = arith.constant dense<0.000000e+00> : vector<32x16xf32>
    %222 = tpu.matmul %220, %221, %cst_73 {dimension_numbers = #tpu.dot_dimension_numbers<[1], [0], [0], [1], [0, 0, 1, 1], [], []>} : vector<32x4xf32>, vector<4x16xf32>, vector<32x16xf32> -> vector<32x16xf32>
    %223 = vector.extract_strided_slice %200 {offsets = [0, 0, 4], sizes = [4, 8, 4], strides = [1, 1, 1]} : vector<4x8x16xf32> to vector<4x8x4xf32>
    %224 = vector.extract_strided_slice %202 {offsets = [0, 0, 4], sizes = [4, 8, 4], strides = [1, 1, 1]} : vector<4x8x16xf32> to vector<4x8x4xf32>
    "tpu.trace_start"() <{level = 10 : i32, message = "rld,rmd->rlm"}> : () -> ()
    %cst_74 = arith.constant dense<0.000000e+00> : vector<4x8x8xf32>
    %225 = tpu.matmul %223, %224, %cst_74 {dimension_numbers = #tpu.dot_dimension_numbers<[2], [2], [1], [1], [0, 0, 0, 1, 1, 1], [0], [0]>} : vector<4x8x4xf32>, vector<4x8x4xf32>, vector<4x8x8xf32> -> vector<4x8x8xf32>
    "tpu.trace_stop"() : () -> ()
    %cst_75 = arith.constant dense<0xFF800000> : vector<4x8xf32>
    %226 = vector.multi_reduction <maximumf>, %225, %cst_75 [2] : vector<4x8x8xf32> to vector<4x8xf32>
    %227 = vector.shape_cast %226 : vector<4x8xf32> to vector<4x8x1xf32>
    %228 = vector.broadcast %227 : vector<4x8x1xf32> to vector<4x8x8xf32>
    %229 = arith.subf %225, %228 : vector<4x8x8xf32>
    %230 = math.exp %229 : vector<4x8x8xf32>
    %cst_76 = arith.constant dense<0.000000e+00> : vector<4x8xf32>
    %231 = vector.multi_reduction <add>, %230, %cst_76 [2] : vector<4x8x8xf32> to vector<4x8xf32>
    %232 = vector.shape_cast %231 : vector<4x8xf32> to vector<4x8x1xf32>
    %233 = tpu.reciprocal %232 {approx = true} : vector<4x8x1xf32> -> vector<4x8x1xf32>
    %234 = vector.broadcast %233 : vector<4x8x1xf32> to vector<4x8x8xf32>
    %235 = arith.mulf %230, %234 : vector<4x8x8xf32>
    %236 = vector.extract_strided_slice %204 {offsets = [0, 0, 4], sizes = [4, 8, 4], strides = [1, 1, 1]} : vector<4x8x16xf32> to vector<4x8x4xf32>
    "tpu.trace_start"() <{level = 10 : i32, message = "rlm,rmd->rld"}> : () -> ()
    %cst_77 = arith.constant dense<0.000000e+00> : vector<4x8x4xf32>
    %237 = tpu.matmul %235, %236, %cst_77 {dimension_numbers = #tpu.dot_dimension_numbers<[2], [1], [1], [2], [0, 0, 0, 1, 1, 2], [0], [0]>} : vector<4x8x8xf32>, vector<4x8x4xf32>, vector<4x8x4xf32> -> vector<4x8x4xf32>
    "tpu.trace_stop"() : () -> ()
    %238 = vector.shape_cast %237 : vector<4x8x4xf32> to vector<32x4xf32>
    %c204 = arith.constant 204 : index
    %c0_78 = arith.constant 0 : index
    %239 = vector.load %arg2[%c204, %c0_78] : memref<296x128xf32, #tpu.memory_space<vmem>>, vector<4x16xf32>
    %cst_79 = arith.constant dense<0.000000e+00> : vector<32x16xf32>
    %240 = tpu.matmul %238, %239, %cst_79 {dimension_numbers = #tpu.dot_dimension_numbers<[1], [0], [0], [1], [0, 0, 1, 1], [], []>} : vector<32x4xf32>, vector<4x16xf32>, vector<32x16xf32> -> vector<32x16xf32>
    %241 = arith.addf %222, %240 : vector<32x16xf32>
    %242 = vector.extract_strided_slice %200 {offsets = [0, 0, 8], sizes = [4, 8, 4], strides = [1, 1, 1]} : vector<4x8x16xf32> to vector<4x8x4xf32>
    %243 = vector.extract_strided_slice %202 {offsets = [0, 0, 8], sizes = [4, 8, 4], strides = [1, 1, 1]} : vector<4x8x16xf32> to vector<4x8x4xf32>
    "tpu.trace_start"() <{level = 10 : i32, message = "rld,rmd->rlm"}> : () -> ()
    %cst_80 = arith.constant dense<0.000000e+00> : vector<4x8x8xf32>
    %244 = tpu.matmul %242, %243, %cst_80 {dimension_numbers = #tpu.dot_dimension_numbers<[2], [2], [1], [1], [0, 0, 0, 1, 1, 1], [0], [0]>} : vector<4x8x4xf32>, vector<4x8x4xf32>, vector<4x8x8xf32> -> vector<4x8x8xf32>
    "tpu.trace_stop"() : () -> ()
    %cst_81 = arith.constant dense<0xFF800000> : vector<4x8xf32>
    %245 = vector.multi_reduction <maximumf>, %244, %cst_81 [2] : vector<4x8x8xf32> to vector<4x8xf32>
    %246 = vector.shape_cast %245 : vector<4x8xf32> to vector<4x8x1xf32>
    %247 = vector.broadcast %246 : vector<4x8x1xf32> to vector<4x8x8xf32>
    %248 = arith.subf %244, %247 : vector<4x8x8xf32>
    %249 = math.exp %248 : vector<4x8x8xf32>
    %cst_82 = arith.constant dense<0.000000e+00> : vector<4x8xf32>
    %250 = vector.multi_reduction <add>, %249, %cst_82 [2] : vector<4x8x8xf32> to vector<4x8xf32>
    %251 = vector.shape_cast %250 : vector<4x8xf32> to vector<4x8x1xf32>
    %252 = tpu.reciprocal %251 {approx = true} : vector<4x8x1xf32> -> vector<4x8x1xf32>
    %253 = vector.broadcast %252 : vector<4x8x1xf32> to vector<4x8x8xf32>
    %254 = arith.mulf %249, %253 : vector<4x8x8xf32>
    %255 = vector.extract_strided_slice %204 {offsets = [0, 0, 8], sizes = [4, 8, 4], strides = [1, 1, 1]} : vector<4x8x16xf32> to vector<4x8x4xf32>
    "tpu.trace_start"() <{level = 10 : i32, message = "rlm,rmd->rld"}> : () -> ()
    %cst_83 = arith.constant dense<0.000000e+00> : vector<4x8x4xf32>
    %256 = tpu.matmul %254, %255, %cst_83 {dimension_numbers = #tpu.dot_dimension_numbers<[2], [1], [1], [2], [0, 0, 0, 1, 1, 2], [0], [0]>} : vector<4x8x8xf32>, vector<4x8x4xf32>, vector<4x8x4xf32> -> vector<4x8x4xf32>
    "tpu.trace_stop"() : () -> ()
    %257 = vector.shape_cast %256 : vector<4x8x4xf32> to vector<32x4xf32>
    %c208 = arith.constant 208 : index
    %c0_84 = arith.constant 0 : index
    %258 = vector.load %arg2[%c208, %c0_84] : memref<296x128xf32, #tpu.memory_space<vmem>>, vector<4x16xf32>
    %cst_85 = arith.constant dense<0.000000e+00> : vector<32x16xf32>
    %259 = tpu.matmul %257, %258, %cst_85 {dimension_numbers = #tpu.dot_dimension_numbers<[1], [0], [0], [1], [0, 0, 1, 1], [], []>} : vector<32x4xf32>, vector<4x16xf32>, vector<32x16xf32> -> vector<32x16xf32>
    %260 = arith.addf %241, %259 : vector<32x16xf32>
    %261 = vector.extract_strided_slice %200 {offsets = [0, 0, 12], sizes = [4, 8, 4], strides = [1, 1, 1]} : vector<4x8x16xf32> to vector<4x8x4xf32>
    %262 = vector.extract_strided_slice %202 {offsets = [0, 0, 12], sizes = [4, 8, 4], strides = [1, 1, 1]} : vector<4x8x16xf32> to vector<4x8x4xf32>
    "tpu.trace_start"() <{level = 10 : i32, message = "rld,rmd->rlm"}> : () -> ()
    %cst_86 = arith.constant dense<0.000000e+00> : vector<4x8x8xf32>
    %263 = tpu.matmul %261, %262, %cst_86 {dimension_numbers = #tpu.dot_dimension_numbers<[2], [2], [1], [1], [0, 0, 0, 1, 1, 1], [0], [0]>} : vector<4x8x4xf32>, vector<4x8x4xf32>, vector<4x8x8xf32> -> vector<4x8x8xf32>
    "tpu.trace_stop"() : () -> ()
    %cst_87 = arith.constant dense<0xFF800000> : vector<4x8xf32>
    %264 = vector.multi_reduction <maximumf>, %263, %cst_87 [2] : vector<4x8x8xf32> to vector<4x8xf32>
    %265 = vector.shape_cast %264 : vector<4x8xf32> to vector<4x8x1xf32>
    %266 = vector.broadcast %265 : vector<4x8x1xf32> to vector<4x8x8xf32>
    %267 = arith.subf %263, %266 : vector<4x8x8xf32>
    %268 = math.exp %267 : vector<4x8x8xf32>
    %cst_88 = arith.constant dense<0.000000e+00> : vector<4x8xf32>
    %269 = vector.multi_reduction <add>, %268, %cst_88 [2] : vector<4x8x8xf32> to vector<4x8xf32>
    %270 = vector.shape_cast %269 : vector<4x8xf32> to vector<4x8x1xf32>
    %271 = tpu.reciprocal %270 {approx = true} : vector<4x8x1xf32> -> vector<4x8x1xf32>
    %272 = vector.broadcast %271 : vector<4x8x1xf32> to vector<4x8x8xf32>
    %273 = arith.mulf %268, %272 : vector<4x8x8xf32>
    %274 = vector.extract_strided_slice %204 {offsets = [0, 0, 12], sizes = [4, 8, 4], strides = [1, 1, 1]} : vector<4x8x16xf32> to vector<4x8x4xf32>
    "tpu.trace_start"() <{level = 10 : i32, message = "rlm,rmd->rld"}> : () -> ()
    %cst_89 = arith.constant dense<0.000000e+00> : vector<4x8x4xf32>
    %275 = tpu.matmul %273, %274, %cst_89 {dimension_numbers = #tpu.dot_dimension_numbers<[2], [1], [1], [2], [0, 0, 0, 1, 1, 2], [0], [0]>} : vector<4x8x8xf32>, vector<4x8x4xf32>, vector<4x8x4xf32> -> vector<4x8x4xf32>
    "tpu.trace_stop"() : () -> ()
    %276 = vector.shape_cast %275 : vector<4x8x4xf32> to vector<32x4xf32>
    %c212 = arith.constant 212 : index
    %c0_90 = arith.constant 0 : index
    %277 = vector.load %arg2[%c212, %c0_90] : memref<296x128xf32, #tpu.memory_space<vmem>>, vector<4x16xf32>
    %cst_91 = arith.constant dense<0.000000e+00> : vector<32x16xf32>
    %278 = tpu.matmul %276, %277, %cst_91 {dimension_numbers = #tpu.dot_dimension_numbers<[1], [0], [0], [1], [0, 0, 1, 1], [], []>} : vector<32x4xf32>, vector<4x16xf32>, vector<32x16xf32> -> vector<32x16xf32>
    %279 = arith.addf %260, %278 : vector<32x16xf32>
    %c267 = arith.constant 267 : index
    %c0_92 = arith.constant 0 : index
    %280 = vector.load %arg2[%c267, %c0_92] : memref<296x128xf32, #tpu.memory_space<vmem>>, vector<1x16xf32>
    %281 = vector.broadcast %280 : vector<1x16xf32> to vector<32x16xf32>
    %282 = arith.addf %279, %281 : vector<32x16xf32>
    %283 = arith.addf %282, %167 : vector<32x16xf32>
    %c268 = arith.constant 268 : index
    %c0_93 = arith.constant 0 : index
    %284 = vector.load %arg2[%c268, %c0_93] : memref<296x128xf32, #tpu.memory_space<vmem>>, vector<1x16xf32>
    %c269 = arith.constant 269 : index
    %c0_94 = arith.constant 0 : index
    %285 = vector.load %arg2[%c269, %c0_94] : memref<296x128xf32, #tpu.memory_space<vmem>>, vector<1x16xf32>
    %cst_95 = arith.constant dense<0.000000e+00> : vector<32xf32>
    %286 = vector.multi_reduction <add>, %283, %cst_95 [1] : vector<32x16xf32> to vector<32xf32>
    %287 = vector.shape_cast %286 : vector<32xf32> to vector<32x1xf32>
    %cst_96 = arith.constant 1.600000e+01 : f32
    %288 = vector.broadcast %cst_96 : f32 to vector<32x1xf32>
    %289 = arith.divf %287, %288 : vector<32x1xf32>
    %290 = vector.broadcast %289 : vector<32x1xf32> to vector<32x16xf32>
    %291 = arith.subf %283, %290 : vector<32x16xf32>
    %292 = arith.mulf %291, %291 : vector<32x16xf32>
    %cst_97 = arith.constant dense<0.000000e+00> : vector<32xf32>
    %293 = vector.multi_reduction <add>, %292, %cst_97 [1] : vector<32x16xf32> to vector<32xf32>
    %294 = vector.shape_cast %293 : vector<32xf32> to vector<32x1xf32>
    %cst_98 = arith.constant 1.600000e+01 : f32
    %295 = vector.broadcast %cst_98 : f32 to vector<32x1xf32>
    %296 = arith.divf %294, %295 : vector<32x1xf32>
    %297 = vector.broadcast %289 : vector<32x1xf32> to vector<32x16xf32>
    %298 = arith.subf %283, %297 : vector<32x16xf32>
    %cst_99 = arith.constant 9.99999974E-6 : f32
    %299 = vector.broadcast %cst_99 : f32 to vector<32x1xf32>
    %300 = arith.addf %296, %299 : vector<32x1xf32>
    %301 = math.rsqrt %300 : vector<32x1xf32>
    %302 = vector.broadcast %301 : vector<32x1xf32> to vector<32x16xf32>
    %303 = arith.mulf %298, %302 : vector<32x16xf32>
    %304 = vector.broadcast %284 : vector<1x16xf32> to vector<32x16xf32>
    %305 = arith.mulf %303, %304 : vector<32x16xf32>
    %306 = vector.broadcast %285 : vector<1x16xf32> to vector<32x16xf32>
    %307 = arith.addf %305, %306 : vector<32x16xf32>
    %c216 = arith.constant 216 : index
    %c0_100 = arith.constant 0 : index
    %308 = vector.load %arg2[%c216, %c0_100] : memref<296x128xf32, #tpu.memory_space<vmem>>, vector<16x32xf32>
    %cst_101 = arith.constant dense<0.000000e+00> : vector<32x32xf32>
    %309 = tpu.matmul %307, %308, %cst_101 {dimension_numbers = #tpu.dot_dimension_numbers<[1], [0], [0], [1], [0, 0, 1, 1], [], []>} : vector<32x16xf32>, vector<16x32xf32>, vector<32x32xf32> -> vector<32x32xf32>
    %c270 = arith.constant 270 : index
    %c0_102 = arith.constant 0 : index
    %310 = vector.load %arg2[%c270, %c0_102] : memref<296x128xf32, #tpu.memory_space<vmem>>, vector<1x32xf32>
    %311 = vector.broadcast %310 : vector<1x32xf32> to vector<32x32xf32>
    %312 = arith.addf %309, %311 : vector<32x32xf32>
    %cst_103 = arith.constant 0.000000e+00 : f32
    %313 = vector.broadcast %cst_103 : f32 to vector<32x32xf32>
    %314 = arith.maximumf %312, %313 : vector<32x32xf32>
    %c232 = arith.constant 232 : index
    %c0_104 = arith.constant 0 : index
    %315 = vector.load %arg2[%c232, %c0_104] : memref<296x128xf32, #tpu.memory_space<vmem>>, vector<32x16xf32>
    %cst_105 = arith.constant dense<0.000000e+00> : vector<32x16xf32>
    %316 = tpu.matmul %314, %315, %cst_105 {dimension_numbers = #tpu.dot_dimension_numbers<[1], [0], [0], [1], [0, 0, 1, 1], [], []>} : vector<32x32xf32>, vector<32x16xf32>, vector<32x16xf32> -> vector<32x16xf32>
    %c271 = arith.constant 271 : index
    %c0_106 = arith.constant 0 : index
    %317 = vector.load %arg2[%c271, %c0_106] : memref<296x128xf32, #tpu.memory_space<vmem>>, vector<1x16xf32>
    %318 = vector.broadcast %317 : vector<1x16xf32> to vector<32x16xf32>
    %319 = arith.addf %316, %318 : vector<32x16xf32>
    %320 = arith.addf %319, %283 : vector<32x16xf32>
    %321 = arith.addf %320, %167 : vector<32x16xf32>
    %c272 = arith.constant 272 : index
    %c0_107 = arith.constant 0 : index
    %322 = vector.load %arg2[%c272, %c0_107] : memref<296x128xf32, #tpu.memory_space<vmem>>, vector<16x32xf32>
    %cst_108 = arith.constant dense<0.000000e+00> : vector<32x32xf32>
    %323 = tpu.matmul %321, %322, %cst_108 {dimension_numbers = #tpu.dot_dimension_numbers<[1], [0], [0], [1], [0, 0, 1, 1], [], []>} : vector<32x16xf32>, vector<16x32xf32>, vector<32x32xf32> -> vector<32x32xf32>
    %c288 = arith.constant 288 : index
    %c0_109 = arith.constant 0 : index
    %324 = vector.load %arg2[%c288, %c0_109] : memref<296x128xf32, #tpu.memory_space<vmem>>, vector<1x32xf32>
    %325 = vector.broadcast %324 : vector<1x32xf32> to vector<32x32xf32>
    %326 = arith.addf %323, %325 : vector<32x32xf32>
    %327 = vector.extract_strided_slice %326 {offsets = [0, 0], sizes = [8, 32], strides = [1, 1]} : vector<32x32xf32> to vector<8x32xf32>
    %328 = vector.extract_strided_slice %326 {offsets = [8, 0], sizes = [8, 32], strides = [1, 1]} : vector<32x32xf32> to vector<8x32xf32>
    %329 = vector.extract_strided_slice %326 {offsets = [16, 0], sizes = [8, 32], strides = [1, 1]} : vector<32x32xf32> to vector<8x32xf32>
    %330 = vector.extract_strided_slice %326 {offsets = [24, 0], sizes = [8, 32], strides = [1, 1]} : vector<32x32xf32> to vector<8x32xf32>
    %331 = tpu.concatenate %327, %328, %329, %330 in 1 : vector<8x32xf32>, vector<8x32xf32>, vector<8x32xf32>, vector<8x32xf32> -> vector<8x128xf32>
    %c0_110 = arith.constant 0 : index
    %c0_111 = arith.constant 0 : index
    %332 = vector.load %arg3[%c0_110, %c0_111] : memref<8x128xf32, #tpu.memory_space<vmem>>, vector<8x128xf32>
    tpu.vector_store %arg3[%c0_110, %c0_111], %331 {strides = array<i32>} : memref<8x128xf32, #tpu.memory_space<vmem>>, vector<8x128xf32>,
    return
  }
  func.func @transform_0(%arg0: i32) -> (i32, i32) {
    %c0_i32 = arith.constant 0 : i32
    %c0_i32_0 = arith.constant 0 : i32
    %c0_i32_1 = arith.constant 0 : i32
    return %c0_i32, %c0_i32_0 : i32, i32
  }
  func.func @transform_1(%arg0: i32) -> (i32, i32) {
    %c0_i32 = arith.constant 0 : i32
    %c0_i32_0 = arith.constant 0 : i32
    %c0_i32_1 = arith.constant 0 : i32
    return %c0_i32, %c0_i32_0 : i32, i32
  }
  func.func @transform_2(%arg0: i32) -> (i32, i32) {
    %c0_i32 = arith.constant 0 : i32
    %c0_i32_0 = arith.constant 0 : i32
    %c0_i32_1 = arith.constant 0 : i32
    return %c0_i32, %c0_i32_0 : i32, i32
  }
}

</mosaic_0001>

<bundles_post_ra>
// kernel: reformer_forward.1
= control target key start
LH: loop header
LB: loop body
LE: loop exit
PB: predicated region body
PF: predicated region fallthrough
CT: control target
= control target key end

     0   :  { %7 = vsyncpa [#allocation3], 0  ;;  %s8868_s9 = smov [#allocation2]   ;;  %s9788_s0 = inlined_call_operand.vmem [shape: s32[32,1], index: 0, kind: input, shape index: {}]   ;;  %s9789_s1 = inlined_call_operand.hbm [shape: f32[296,128], index: 1, kind: input, shape index: {}]   ;;  %s9790_s2 = inlined_call_operand.vmem [shape: f32[8,128], index: 2, kind: output, shape index: {}]  }
   0x1   :  { %s15_s10 = sshll.u32 %s8868_s9, 4  ;;  %s8844_s13 = scalar_lea.hbm %s9789_s1, 4736  ;;  %s16_s10 = int_to_ptr.vmem [resolvable:$true] %s15_s10 }
   0x2   :  { %p8845_p0 = scmp.ne.s32.totalorder %s9789_s1, %s8844_s13  ;;  %p8848_p1 = scmp.lt.u32.totalorder %s8844_s13, %s9789_s1 }
   0x4   :  { %p8850_p2 = pnand %p8848_p1, %p8845_p0 }
   0x6   :  { %8853 = shalt.err (!%p8850_p2)
}
   0x7   :  { %s8854_s18 = scalar_lea.vmem %s16_s10, 4736  ;;  %p8859_p4 = scmp.lt.s32.totalorder %s16_s10, %s16_s10 }
   0x8   :  { %p8855_p3 = scmp.ne.s32.totalorder %s16_s10, %s8854_s18  ;;  %p8860_p5 = scmp.lt.s32.totalorder %s8854_s18, %s8854_s18 }
   0xa   :  { %p8861_p6 = por %p8860_p5, %p8859_p4 }
   0xc   :  { %p8862_p7 = pnand %p8861_p6, %p8855_p3 }
   0xe   :  { %8865 = shalt.err (!%p8862_p7)
}
   0xf   :  { %s8869_s19 = smov 128   ;;  %s8870_s20 = smov 8  }
  0x10   :  { %21 = dma.hbm_to_vmem [thread:$0]  %s9789_s1, 4736, %s16_s10, [#allocation3], %s8869_s19, %s8869_s19, %s8870_s20  }
  0x11   :  { %8866 = dma.done.wait [#allocation3], 4736  }
  0x12   :  { %8867 = vsyncadd [#allocation3], 4294962560  ;;  %v8871_v0 = vmov 0   ;;  %v25_v1 = vld [vmem:[%s9788_s0] sm:$0xff]  ;;  %v27_v2 = vld [vmem:[%s9788_s0 + $0x10] sm:$0xff]  ;;  %v8872_v13 = vmov 0.0|0.0   ;;  %v29_v15 = vlaneseq }
  0x13   :  { %8682 = vset.pattern.permute.xlu0 %v8871_v0  ;;  %8683 = vset.pattern.permute.xlu1 %v8871_v0  ;;  %v26_v3 = vld [vmem:[%s9788_s0 + $0x8] sm:$0xff]  ;;  %v51_v4 = vld [vmem:[#allocation2] sm:$0xff]  ;;  %v28_v6 = vld [vmem:[%s9788_s0 + $0x18] sm:$0xff]  ;;  %vm55_vm0 = vcmask 261120   ;;  %v8873_v19 = vmov 0.0   ;;  %vm8874_vm5 = vmmov 0  }
  0x14   :  { %32 = vperm.xlu0 %8682, %v25_v1   ;;  %38 = vperm.xlu1 %8683, %v27_v2   ;;  %v52_v5 = vld [vmem:[#allocation2 + $0x8] sm:$0xff]  ;;  %v53_v8 = vld [vmem:[#allocation2 + $0x10] sm:$0xff]  ;;  %v54_v9 = vld [vmem:[#allocation2 + $0x18] sm:$0xff]  ;;  %v30_v16 = vand.u32 127, %v29_v15  ;;  %vm161_vm6 = vcmask 130048   ;;  %s8875_s0 = smov 112  }
  0x15   :  { %v8582_v7 = vpack.c.bf16 %v52_v5, %v51_v4  ;;  %v8586_v10 = vpack.c.bf16 %v54_v9, %v53_v8  ;;  %v153_v11 = vld [vmem:[#allocation2 + $0x20] sm:$0xff]  ;;  %v154_v12 = vld [vmem:[#allocation2 + $0x28] sm:$0xff]  ;;  %8590 = vmatprep.subr.bf16.mxu1 %v8872_v13  ;;  %8096 = vmatprep.mubr.msk.f32.mxu1 %vm8874_vm5, %v8873_v19  ;;  %v159_v26 = vld [vmem:[#allocation2 + $0x50] sm:$0xff]  ;;  %vm636_vm7 = vcmask 31744   ;;  %vm946_vm8 = vcmask 64512   ;;  %s8876_s30 = smov 96  }
  0x16   :  { %v8591_v14 = vpack.c.bf16 %v154_v12, %v153_v11  ;;  %v160_v27 = vld [vmem:[#allocation2 + $0x58] sm:$0xff]  ;;  %v155_v29 = vld [vmem:[#allocation2 + $0x30] sm:$0xff]  ;;  %v157_v33 = vld [vmem:[#allocation2 + $0x40] sm:$0xff]  ;;  %s8877_s3 = smov 108   ;;  %s8878_s4 = smov 124   ;;  %vm1969_vm9 = vcmask 1043456  }
  0x17   :  { %8583 = vmatprep.subr.bf16.mxu0 %v8582_v7  ;;  %v8600_v28 = vpack.c.bf16 %v160_v27, %v159_v26  ;;  %v156_v30 = vld [vmem:[#allocation2 + $0x38] sm:$0xff]  ;;  %v158_v34 = vld [vmem:[#allocation2 + $0x48] sm:$0xff]  ;;  %v7664_v26 = vld [vmem:[#allocation2 + $0xb1] ss:$0 sm:$0xff]  ;;  %s8879_s5 = smov 92   ;;  %s8880_s6 = smov 104  }
  0x18   :  { %35 = vperm.xlu0 %8682, %v26_v3   ;;  %41 = vperm.xlu1 %8683, %v28_v6   ;;  %v8594_v31 = vpack.c.bf16 %v156_v30, %v155_v29  ;;  %v8597_v36 = vpack.c.bf16 %v158_v34, %v157_v33  ;;  %v526_v8 = vld [vmem:[#allocation2 + $0x68] sm:$0xff]  ;;  %s8881_s7 = smov 120   ;;  %s8882_s8 = smov 88   ;;  %vm7645_vm10 = vcmask 523264   ;;  %vm7647_vm11 = vcmask 785408  }
  0x19   :  { %8585 = vmatpush3.bf16.msra.mxu0 %v8582_v7  ;;  %8592 = vmatpush3.bf16.msra.mxu1 %v8591_v14  ;;  %v525_v7 = vld [vmem:[#allocation2 + $0x60] sm:$0xff]  ;;  %s8883_s9 = smov 116   ;;  %s8884_s10 = smov 100  }
  0x1a   :  { %8587 = vmatprep.subr.bf16.mxu0 %v8586_v10  ;;  %8593 = vmatprep.subr.bf16.mxu1 %v8872_v13  ;;  %v8602_v9 = vpack.c.bf16 %v526_v8, %v525_v7  ;;  %s8885_s11 = smov 84   ;;  %s8886_s12 = smov 32  }
  0x1b   :  { %s8887_s13 = smov 64  }
  0x1d   :  { %8589 = vmatpush3.bf16.msra.mxu0 %v8586_v10 }
  0x1e   :  { %8599 = vmatprep.subr.bf16.mxu0 %v8872_v13 }
  0x93   :  { %v33_v17 = vpop.permute.xlu0 %32  ;;  %v39_v18 = vpop.permute.xlu1 %38 }
  0x94   :  { %vm43_vm1 = vcmp.eq.s32.totalorder %v30_v16, %v33_v17  ;;  %vm45_vm2 = vcmp.eq.s32.totalorder %v30_v16, %v39_v18 }
  0x95   :  { %v47_v20 = vsel %vm43_vm1, 1.0, %v8873_v19  ;;  %v49_v23 = vsel %vm45_vm2, 1.0, %v8873_v19 }
  0x96   :  { %8086 = vmatprep.mubr.msk.f32.mxu0 %vm55_vm0, %v47_v20 }
  0x97   :  { %v36_v21 = vpop.permute.xlu0 %35  ;;  %v42_v22 = vpop.permute.xlu1 %41 }
  0x98   :  { %vm44_vm3 = vcmp.eq.s32.totalorder %v30_v16, %v36_v21  ;;  %vm46_vm4 = vcmp.eq.s32.totalorder %v30_v16, %v42_v22 }
  0x99   :  { %v48_v24 = vsel %vm44_vm3, 1.0, %v8873_v19  ;;  %v50_v25 = vsel %vm46_vm4, 1.0, %v8873_v19 }
  0x9a   :  { %8087 = vmatmul.mubr.msk.f32.vlgmr.msra.gmra.mrb[0].mxu0 %vm55_vm0, %v48_v24  ;;  %v7663_v24 = vld [vmem:[#allocation2 + $0xb0] ss:$0 sm:$0xff] }
  0x9b   :  { %8089 = vmatprep.mubr.msk.f32.mxu0 %vm55_vm0, %v49_v23  ;;  %8601 = vmatpush3.bf16.msra.mxu0 %v8600_v28 }
  0x9c   :  { %8130 = vmatprep.subr.mxu0 %v8873_v19 }
  0x9e   :  { %8090 = vmatmul.mubr.msk.f32.gmra.mrb[2].mxu0 %vm55_vm0, %v50_v25 }
  0x9f   :  { %8117 = vmatprep.mubr.msk.f32.mxu0 %vm8874_vm5, %v8873_v19 }
 0x16d   :  { %v8088_v32 = vpop.f32.mrb[0].mxu0 }
 0x16e   :  { %v134_v35 = vpop.f32.mrb[1].mxu0 }
 0x16f   :  { %8097 = vmatmul.mubr.msk.f32.vlgmr.msra.gmra.mrb[0].mxu1 %vm161_vm6, %v134_v35 }
 0x170   :  { %8595 = vmatpush3.bf16.msra.mxu1 %v8594_v31  ;;  %8103 = vmatprep.mubr.msk.f32.mxu1 %vm8874_vm5, %v8873_v19 }
 0x171   :  { %v8091_v37 = vpop.f32.mrb[2].mxu0  ;;  %8596 = vmatprep.subr.bf16.mxu1 %v8872_v13 }
 0x172   :  { %v144_v38 = vpop.f32.mrb[3].mxu0  ;;  %8118 = vmatmul.mubr.msk.f32.vlgmr.msra.gmra.mrb[4].mxu0 %vm161_vm6, %v8091_v37 }
 0x173   :  { %8104 = vmatmul.mubr.msk.f32.vlgmr.msra.gmra.mrb[2].mxu1 %vm161_vm6, %v8088_v32  ;;  %8132 = vmatprep.mubr.msk.f32.mxu0 %vm8874_vm5, %v8873_v19 }
 0x174   :  { %8598 = vmatpush3.bf16.msra.mxu1 %v8597_v36  ;;  %8110 = vmatprep.mubr.msk.f32.mxu1 %vm8874_vm5, %v8873_v19 }
 0x175   :  { %8603 = vmatprep.subr.bf16.mxu1 %v8602_v9 }
 0x177   :  { %8111 = vmatmul.mubr.msk.f32.vlgmr.msra.gmra.mrb[4].mxu1 %vm161_vm6, %v144_v38 }
 0x178   :  { %8605 = vmatpush3.bf16.msra.mxu1 %v8602_v9 }
 0x179   :  { %8140 = vmatprep.subr.mxu1 %v8873_v19 }
 0x242   :  { %v8950_v39 = vpop.f32.mrb[0].mxu1 }
 0x243   :  { %v8098_v40 = vpop.f32.mrb[1].mxu1  ;;  %v456_v41 = vsel %vm161_vm6, %v8950_v39, 0.0 }
 0x244   :  { %457 = vadd.xlane.f32.xlu0 %v456_v41 }
 0x245   :  { %v8954_v42 = vpop.f32.mrb[4].mxu0 }
 0x246   :  { %v8956_v43 = vpop.f32.mrb[2].mxu1  ;;  %v8119_v44 = vpop.f32.mrb[5].mxu0  ;;  %v465_v50 = vsel %vm161_vm6, %v8954_v42, 0.0 }
 0x247   :  { %v8105_v45 = vpop.f32.mrb[3].mxu1  ;;  %v459_v46 = vsel %vm161_vm6, %v8956_v43, 0.0  ;;  %v7665_v44 = vld [vmem:[#allocation2 + $0xb2] ss:$0 sm:$0xff] }
 0x248   :  { %460 = vadd.xlane.f32.xlu1 %v459_v46 }
 0x24a   :  { %v8960_v47 = vpop.f32.mrb[4].mxu1 }
 0x24b   :  { %v8112_v48 = vpop.f32.mrb[5].mxu1  ;;  %v462_v49 = vsel %vm161_vm6, %v8960_v47, 0.0 }
 0x24c   :  { %463 = vadd.xlane.f32.xlu0 %v462_v49 }
 0x250   :  { %466 = vadd.xlane.f32.xlu0 %v465_v50 }
 0x2d1   :  { %v458_v51 = vpop.xlane.xlu0 %457 }
 0x2d2   :  { %v469_v52 = vmul.f32 0.0625, %v458_v51 }
 0x2d4   :  { %v473_v53 = vsub.f32 %v8950_v39, %v469_v52 }
 0x2d5   :  { %v461_v54 = vpop.xlane.xlu1 %460 }
 0x2d6   :  { %v470_v55 = vmul.f32 0.0625, %v461_v54  ;;  %v477_v56 = vmul.f32 %v473_v53, %v473_v53 }
 0x2d8   :  { %v474_v57 = vsub.f32 %v8956_v43, %v470_v55  ;;  %v481_v58 = vsel %vm161_vm6, %v477_v56, 0.0 }
 0x2d9   :  { %482 = vadd.xlane.f32.xlu1 %v481_v58  ;;  %v464_v59 = vpop.xlane.xlu0 %463 }
 0x2da   :  { %v471_v60 = vmul.f32 0.0625, %v464_v59  ;;  %v478_v61 = vmul.f32 %v474_v57, %v474_v57 }
 0x2dc   :  { %v475_v62 = vsub.f32 %v8960_v47, %v471_v60  ;;  %v484_v63 = vsel %vm161_vm6, %v478_v61, 0.0 }
 0x2dd   :  { %485 = vadd.xlane.f32.xlu0 %v484_v63  ;;  %v467_v0 = vpop.xlane.xlu0 %466 }
 0x2de   :  { %v472_v1 = vmul.f32 0.0625, %v467_v0  ;;  %v479_v2 = vmul.f32 %v475_v62, %v475_v62 }
 0x2e0   :  { %v476_v3 = vsub.f32 %v8954_v42, %v472_v1  ;;  %v487_v4 = vsel %vm161_vm6, %v479_v2, 0.0 }
 0x2e1   :  { %488 = vadd.xlane.f32.xlu1 %v487_v4 }
 0x2e2   :  { %v480_v5 = vmul.f32 %v476_v3, %v476_v3 }
 0x2e4   :  { %v490_v6 = vsel %vm161_vm6, %v480_v5, 0.0 }
 0x2e5   :  { %491 = vadd.xlane.f32.xlu0 %v490_v6 }
 0x366   :  { %v483_v10 = vpop.xlane.xlu1 %482 }
 0x367   :  { %v493_v11 = vmul.f32 0.0625, %v483_v10 }
 0x369   :  { %v497_v12 = vadd.f32 1e-05, %v493_v11 }
 0x36a   :  { %v486_v13 = vpop.xlane.xlu0 %485 }
 0x36b   :  { %8684 = vrsqrt.f32 %v497_v12  ;;  %v494_v14 = vmul.f32 0.0625, %v486_v13 }
 0x36d   :  { %v498_v15 = vadd.f32 1e-05, %v494_v14 }
 0x36e   :  { %v489_v16 = vpop.xlane.xlu1 %488 }
 0x36f   :  { %8686 = vrsqrt.f32 %v498_v15  ;;  %v495_v17 = vmul.f32 0.0625, %v489_v16 }
 0x371   :  { %v499_v18 = vadd.f32 1e-05, %v495_v17 }
 0x372   :  { %v492_v20 = vpop.xlane.xlu0 %491 }
 0x373   :  { %8688 = vrsqrt.f32 %v499_v18  ;;  %v496_v21 = vmul.f32 0.0625, %v492_v20 }
 0x375   :  { %v8685_v22 = vpop.eup %8684  ;;  %v500_v23 = vadd.f32 1e-05, %v496_v21 }
 0x376   :  { %v505_v25 = vmul.f32 %v8685_v22, %v473_v53 }
 0x377   :  { %8690 = vrsqrt.f32 %v500_v23 }
 0x378   :  { %v513_v27 = vmul.f32 %v7663_v24, %v505_v25 }
 0x379   :  { %v8687_v28 = vpop.eup %8686 }
 0x37a   :  { %v506_v29 = vmul.f32 %v8687_v28, %v474_v57  ;;  %v521_v30 = vadd.f32 %v7664_v26, %v513_v27 }
 0x37c   :  { %8124 = vmatprep.mubr.msk.f32.mxu1 %vm161_vm6, %v521_v30  ;;  %v514_v31 = vmul.f32 %v7663_v24, %v506_v29 }
 0x37d   :  { %v8689_v32 = vpop.eup %8688 }
 0x37e   :  { %v522_v33 = vadd.f32 %v7664_v26, %v514_v31  ;;  %v507_v34 = vmul.f32 %v8689_v32, %v475_v62 }
 0x380   :  { %8125 = vmatmul.mubr.msk.f32.vlgmr.msra.gmra.mrb[6].mxu1 %vm161_vm6, %v522_v33  ;;  %v515_v35 = vmul.f32 %v7663_v24, %v507_v34 }
 0x381   :  { %v8691_v36 = vpop.eup %8690 }
 0x382   :  { %v523_v37 = vadd.f32 %v7664_v26, %v515_v35  ;;  %v508_v38 = vmul.f32 %v8691_v36, %v476_v3 }
 0x384   :  { %8127 = vmatprep.mubr.msk.f32.mxu1 %vm161_vm6, %v523_v37  ;;  %v516_v40 = vmul.f32 %v7663_v24, %v508_v38 }
 0x386   :  { %v524_v41 = vadd.f32 %v7664_v26, %v516_v40 }
 0x388   :  { %8128 = vmatmul.mubr.msk.f32.gmra.mrb[8].mxu1 %vm161_vm6, %v524_v41 }
 0x389   :  { %8142 = vmatprep.mubr.msk.f32.mxu1 %vm8874_vm5, %v8873_v19 }
 0x453   :  { %v8126_v45 = vpop.f32.mrb[6].mxu1 }
 0x454   :  { %v8981_v46 = vadd.f32 %v8126_v45, %v7665_v44  ;;  %v610_v48 = vpop.f32.mrb[7].mxu1 }
 0x455   :  { %v8983_v49 = vadd.f32 %v7665_v44, %v610_v48 }
 0x456   :  { %713 = vrot.lane.b32.xlu0 %v8981_v46, %s8875_s0  ;;  %v9008_v57 = vmul.f32 0.5, %v8981_v46 }
 0x457   :  { %634 = vrot.lane.b32.xlu1 %v8983_v49, %s8875_s0  ;;  %v8999_v55 = vmul.f32 0.5, %v8983_v49 }
 0x45b   :  { %v8129_v50 = vpop.f32.mrb[8].mxu1 }
 0x45c   :  { %v8989_v51 = vadd.f32 %v8129_v50, %v7665_v44  ;;  %v620_v52 = vpop.f32.mrb[9].mxu1 }
 0x45d   :  { %v8993_v53 = vadd.f32 %v7665_v44, %v620_v52 }
 0x45e   :  { %869 = vrot.lane.b32.xlu1 %v8989_v51, %s8875_s0  ;;  %v9017_v59 = vmul.f32 0.5, %v8989_v51 }
 0x45f   :  { %v9024_v61 = vmul.f32 0.5, %v8993_v53 }
 0x462   :  { %791 = vrot.lane.b32.xlu1 %v8993_v53, %s8875_s0 }
 0x4c8   :  { %v714_v56 = vpop.permute.xlu0 %713 }
 0x4c9   :  { %v635_v54 = vpop.permute.xlu1 %634 }
 0x4ca   :  { %8131 = vmatpush3.xpose.msk.msra.mxu0 %vm636_vm7, %v635_v54 }
 0x4cb   :  { %8135 = vmatprep.subr.mxu0 %v8873_v19 }
 0x4cd   :  { %8133 = vmatmul.mubr.msk.f32.vlgmr.msra.gmra.mrb[6].mxu0 %vm636_vm7, %v8999_v55 }
 0x4ce   :  { %8136 = vmatpush3.xpose.msk.msra.mxu0 %vm636_vm7, %v714_v56  ;;  %8137 = vmatprep.mubr.msk.f32.mxu0 %vm8874_vm5, %v8873_v19 }
 0x4cf   :  { %8145 = vmatprep.subr.mxu0 %v8873_v19 }
 0x4d0   :  { %v870_v58 = vpop.permute.xlu1 %869 }
 0x4d1   :  { %8138 = vmatmul.mubr.msk.f32.vlgmr.msra.gmra.mrb[8].mxu0 %vm636_vm7, %v9008_v57 }
 0x4d2   :  { %8146 = vmatpush3.xpose.msk.msra.mxu0 %vm636_vm7, %v870_v58  ;;  %8147 = vmatprep.mubr.msk.f32.mxu0 %vm8874_vm5, %v8873_v19 }
 0x4d3   :  { %8155 = vmatprep.subr.mxu0 %v8873_v19 }
 0x4d4   :  { %v792_v60 = vpop.permute.xlu1 %791 }
 0x4d5   :  { %8141 = vmatpush3.xpose.msk.msra.mxu1 %vm636_vm7, %v792_v60  ;;  %8148 = vmatmul.mubr.msk.f32.vlgmr.msra.gmra.mrb[10].mxu0 %vm636_vm7, %v9017_v59 }
 0x4d6   :  { %8150 = vmatprep.subr.mxu1 %v8873_v19  ;;  %8157 = vmatprep.mubr.msk.f32.mxu0 %vm8874_vm5, %v8873_v19 }
 0x4d8   :  { %8143 = vmatmul.mubr.msk.f32.vlgmr.msra.gmra.mrb[10].mxu1 %vm636_vm7, %v9024_v61 }
 0x4d9   :  { %8152 = vmatprep.mubr.msk.f32.mxu1 %vm8874_vm5, %v8873_v19 }
 0x5a0   :  { %v9033_v62 = vpop.f32.mrb[6].mxu0 }
 0x5a1   :  { %v8134_v63 = vpop.f32.mrb[7].mxu0  ;;  %v947_v26 = vsel %vm946_vm8, %v9033_v62, -inf }
 0x5a4   :  { %v786_v0 = vpop.f32.mrb[8].mxu0 }
 0x5a5   :  { %v8139_v1 = vpop.f32.mrb[9].mxu0  ;;  %v950_v2 = vsel %vm946_vm8, %v786_v0, -inf }
 0x5a6   :  { %951 = vmax.xlane.f32.xlu0 %v950_v2 }
 0x5a8   :  { %v942_v3 = vpop.f32.mrb[10].mxu0 }
 0x5a9   :  { %v8149_v4 = vpop.f32.mrb[11].mxu0  ;;  %v956_v5 = vsel %vm946_vm8, %v942_v3, -inf }
 0x5aa   :  { %957 = vmax.xlane.f32.xlu1 %v956_v5 }
 0x5ab   :  { %v9037_v6 = vpop.f32.mrb[10].mxu1 }
 0x5ac   :  { %v8144_v7 = vpop.f32.mrb[11].mxu1  ;;  %v953_v8 = vsel %vm946_vm8, %v9037_v6, -inf }
 0x5bb   :  { %1067 = vrot.lane.b32.xlu1 %v8981_v46, %s8876_s30 }
 0x5bf   :  { %1376 = vrot.lane.b32.xlu1 %v8981_v46, %s8877_s3 }
 0x5c3   :  { %1374 = vrot.lane.b32.xlu1 %v9008_v57, %s8878_s4 }
 0x5c7   :  { %1530 = vrot.lane.b32.xlu1 %v9017_v59, %s8878_s4 }
 0x5eb   :  { %954 = vmax.xlane.f32.xlu1 %v953_v8 }
 0x5fc   :  { %991 = vrot.lane.b32.xlu1 %v8983_v49, %s8876_s30 }
 0x600   :  { %1298 = vrot.lane.b32.xlu1 %v8983_v49, %s8877_s3 }
 0x604   :  { %1296 = vrot.lane.b32.xlu1 %v8999_v55, %s8878_s4 }
 0x608   :  { %1452 = vrot.lane.b32.xlu1 %v9024_v61, %s8878_s4 }
 0x633   :  { %v952_v9 = vpop.xlane.xlu0 %951 }
 0x634   :  { %v960_v10 = vsub.f32 %v786_v0, %v952_v9 }
 0x636   :  { %v965_v11 = vmul.f32 1.442695, %v960_v10 }
 0x637   :  { %v958_v12 = vpop.xlane.xlu1 %957 }
 0x638   :  { %8692 = vpow2.f32 %v965_v11  ;;  %v962_v13 = vsub.f32 %v942_v3, %v958_v12 }
 0x63a   :  { %v969_v14 = vmul.f32 1.442695, %v962_v13 }
 0x63b   :  { %v1068_v15 = vpop.permute.xlu1 %1067 }
 0x63c   :  { %8694 = vpow2.f32 %v969_v14  ;;  %8156 = vmatpush3.msra.mxu0 %v1068_v15 }
 0x63d   :  { %8165 = vmatprep.subr.mxu0 %v8873_v19 }
 0x63f   :  { %v1377_v21 = vpop.permute.xlu1 %1376 }
 0x642   :  { %v8693_v16 = vpop.eup %8692 }
 0x643   :  { %v974_v17 = vsel %vm946_vm8, %v8693_v16, 0.0  ;;  %v1375_v22 = vpop.permute.xlu1 %1374 }
 0x644   :  { %975 = vadd.xlane.f32.xlu0 %v974_v17 }
 0x646   :  { %v8695_v18 = vpop.eup %8694 }
 0x647   :  { %v980_v20 = vsel %vm946_vm8, %v8695_v18, 0.0  ;;  %v1531_v23 = vpop.permute.xlu1 %1530 }
 0x648   :  { %981 = vadd.xlane.f32.xlu0 %v980_v20 }
 0x65e   :  { %1219 = vrot.lane.b32.xlu0 %v8989_v51, %s8876_s30 }
 0x662   :  { %1532 = vrot.lane.b32.xlu0 %v8989_v51, %s8877_s3 }
 0x678   :  { %v955_v24 = vpop.xlane.xlu1 %954 }
 0x679   :  { %v961_v35 = vsub.f32 %v9037_v6, %v955_v24 }
 0x67b   :  { %v967_v38 = vmul.f32 1.442695, %v961_v35 }
 0x67c   :  { %v992_v25 = vpop.permute.xlu1 %991 }
 0x67d   :  { %8151 = vmatpush3.msra.mxu1 %v992_v25 }
 0x67e   :  { %8160 = vmatprep.subr.mxu1 %v8873_v19 }
 0x680   :  { %v1299_v2 = vpop.permute.xlu1 %1298 }
 0x681   :  { %948 = vmax.xlane.f32.xlu0 %v947_v26 }
 0x684   :  { %v1297_v8 = vpop.permute.xlu1 %1296 }
 0x688   :  { %v1453_v12 = vpop.permute.xlu1 %1452 }
 0x6d1   :  { %v976_v27 = vpop.xlane.xlu0 %975 }
 0x6d2   :  { %8696 = vrcp.f32 %v976_v27 }
 0x6d5   :  { %v982_v28 = vpop.xlane.xlu0 %981 }
 0x6d6   :  { %8698 = vrcp.f32 %v982_v28 }
 0x6d9   :  { %v1220_v31 = vpop.permute.xlu0 %1219 }
 0x6dc   :  { %v8697_v29 = vpop.eup %8696 }
 0x6dd   :  { %v988_v30 = vmul.f32 %v8697_v29, %v8693_v16  ;;  %v1533_v34 = vpop.permute.xlu0 %1532 }
 0x6df   :  { %8158 = vmatmul.mubr.msk.f32.vlgmr.msra.gmra.mrb[12].mxu0 %vm946_vm8, %v988_v30 }
 0x6e0   :  { %v8699_v32 = vpop.eup %8698  ;;  %8166 = vmatpush3.msra.mxu0 %v1220_v31  ;;  %8167 = vmatprep.mubr.msk.f32.mxu0 %vm8874_vm5, %v8873_v19 }
 0x6e1   :  { %v990_v33 = vmul.f32 %v8699_v32, %v8695_v18  ;;  %8175 = vmatprep.subr.mxu0 %v8873_v19 }
 0x6e3   :  { %8168 = vmatmul.mubr.msk.f32.vlgmr.msra.gmra.mrb[14].mxu0 %vm946_vm8, %v990_v33 }
 0x6e4   :  { %8177 = vmatprep.mubr.msk.f32.mxu0 %vm8874_vm5, %v8873_v19 }
 0x6e7   :  { %8176 = vmatpush3.xpose.msk.msra.mxu0 %vm636_vm7, %v1377_v21 }
 0x6e8   :  { %8185 = vmatprep.subr.mxu0 %v8873_v19 }
 0x6ea   :  { %8178 = vmatmul.mubr.msk.f32.vlgmr.msra.gmra.mrb[16].mxu0 %vm636_vm7, %v1375_v22 }
 0x6eb   :  { %8186 = vmatpush3.xpose.msk.msra.mxu0 %vm636_vm7, %v1533_v34  ;;  %8187 = vmatprep.mubr.msk.f32.mxu0 %vm8874_vm5, %v8873_v19 }
 0x6ec   :  { %8195 = vmatprep.subr.mxu0 %v8873_v19 }
 0x6ee   :  { %8188 = vmatmul.mubr.msk.f32.vlgmr.msra.gmra.mrb[18].mxu0 %vm636_vm7, %v1531_v23 }
 0x6ef   :  { %8197 = vmatprep.mubr.msk.f32.mxu0 %vm8874_vm5, %v8873_v19 }
 0x70e   :  { %v949_v36 = vpop.xlane.xlu0 %948 }
 0x70f   :  { %v959_v37 = vsub.f32 %v9033_v62, %v949_v36 }
 0x711   :  { %v963_v40 = vmul.f32 1.442695, %v959_v37 }
 0x713   :  { %8700 = vpow2.f32 %v963_v40 }
 0x714   :  { %8702 = vpow2.f32 %v967_v38 }
 0x71d   :  { %v8701_v41 = vpop.eup %8700 }
 0x71e   :  { %v971_v44 = vsel %vm946_vm8, %v8701_v41, 0.0  ;;  %v8703_v45 = vpop.eup %8702 }
 0x71f   :  { %972 = vadd.xlane.f32.xlu0 %v971_v44  ;;  %v977_v48 = vsel %vm946_vm8, %v8703_v45, 0.0 }
 0x723   :  { %978 = vadd.xlane.f32.xlu0 %v977_v48 }
 0x739   :  { %1143 = vrot.lane.b32.xlu0 %v8993_v53, %s8876_s30 }
 0x73d   :  { %1454 = vrot.lane.b32.xlu0 %v8993_v53, %s8877_s3 }
 0x7ac   :  { %v973_v50 = vpop.xlane.xlu0 %972 }
 0x7ad   :  { %8704 = vrcp.f32 %v973_v50 }
 0x7b0   :  { %v979_v52 = vpop.xlane.xlu0 %978 }
 0x7b1   :  { %8706 = vrcp.f32 %v979_v52 }
 0x7b2   :  { %v9092_v54 = vpop.f32.mrb[12].mxu0 }
 0x7b3   :  { %v8159_v56 = vpop.f32.mrb[13].mxu0 }
 0x7b4   :  { %v1144_v0 = vpop.permute.xlu0 %1143 }
 0x7b6   :  { %v9094_v58 = vpop.f32.mrb[14].mxu0 }
 0x7b7   :  { %v8705_v60 = vpop.eup %8704  ;;  %v8169_v62 = vpop.f32.mrb[15].mxu0 }
 0x7b8   :  { %v987_v63 = vmul.f32 %v8705_v60, %v8701_v41  ;;  %v1455_v11 = vpop.permute.xlu0 %1454 }
 0x7ba   :  { %8153 = vmatmul.mubr.msk.f32.vlgmr.msra.gmra.mrb[12].mxu1 %vm946_vm8, %v987_v63 }
 0x7bb   :  { %v8707_v1 = vpop.eup %8706  ;;  %8161 = vmatpush3.msra.mxu1 %v1144_v0  ;;  %8162 = vmatprep.mubr.msk.f32.mxu1 %vm8874_vm5, %v8873_v19 }
 0x7bc   :  { %v989_v3 = vmul.f32 %v8707_v1, %v8703_v45  ;;  %8170 = vmatprep.subr.mxu1 %v8873_v19 }
 0x7bd   :  { %v1448_v4 = vpop.f32.mrb[16].mxu0 }
 0x7be   :  { %v8179_v5 = vpop.f32.mrb[17].mxu0  ;;  %8163 = vmatmul.mubr.msk.f32.vlgmr.msra.gmra.mrb[14].mxu1 %vm946_vm8, %v989_v3  ;;  %v1611_v6 = vsel %vm946_vm8, %v1448_v4, -inf }
 0x7bf   :  { %1612 = vmax.xlane.f32.xlu0 %v1611_v6  ;;  %8172 = vmatprep.mubr.msk.f32.mxu1 %vm8874_vm5, %v8873_v19 }
 0x7c1   :  { %v1604_v7 = vpop.f32.mrb[18].mxu0 }
 0x7c2   :  { %8171 = vmatpush3.xpose.msk.msra.mxu1 %vm636_vm7, %v1299_v2  ;;  %v8189_v9 = vpop.f32.mrb[19].mxu0  ;;  %v1617_v10 = vsel %vm946_vm8, %v1604_v7, -inf }
 0x7c3   :  { %1618 = vmax.xlane.f32.xlu1 %v1617_v10  ;;  %8180 = vmatprep.subr.mxu1 %v8873_v19 }
 0x7c5   :  { %8173 = vmatmul.mubr.msk.f32.vlgmr.msra.gmra.mrb[16].mxu1 %vm636_vm7, %v1297_v8 }
 0x7c6   :  { %8181 = vmatpush3.xpose.msk.msra.mxu1 %vm636_vm7, %v1455_v11  ;;  %8182 = vmatprep.mubr.msk.f32.mxu1 %vm8874_vm5, %v8873_v19 }
 0x7c7   :  { %8190 = vmatprep.subr.mxu1 %v8873_v19 }
 0x7c9   :  { %8183 = vmatmul.mubr.msk.f32.vlgmr.msra.gmra.mrb[18].mxu1 %vm636_vm7, %v1453_v12 }
 0x7ca   :  { %8192 = vmatprep.mubr.msk.f32.mxu1 %vm8874_vm5, %v8873_v19 }
 0x7d4   :  { %1728 = vrot.lane.b32.xlu1 %v8981_v46, %s8879_s5 }
 0x7d8   :  { %2160 = vrot.lane.b32.xlu1 %v8983_v49, %s8880_s6 }
 0x7dc   :  { %2158 = vrot.lane.b32.xlu1 %v8999_v55, %s8881_s7 }
 0x7e0   :  { %2236 = vrot.lane.b32.xlu1 %v9008_v57, %s8881_s7 }
 0x7e4   :  { %2314 = vrot.lane.b32.xlu1 %v9024_v61, %s8881_s7 }
 0x7e8   :  { %2392 = vrot.lane.b32.xlu1 %v9017_v59, %s8881_s7 }
 0x84c   :  { %v1613_v13 = vpop.xlane.xlu0 %1612 }
 0x84d   :  { %v1621_v14 = vsub.f32 %v1448_v4, %v1613_v13 }
 0x84f   :  { %v1626_v15 = vmul.f32 1.442695, %v1621_v14 }
 0x850   :  { %v1619_v16 = vpop.xlane.xlu1 %1618 }
 0x851   :  { %8708 = vpow2.f32 %v1626_v15  ;;  %v1623_v17 = vsub.f32 %v1604_v7, %v1619_v16 }
 0x853   :  { %v1630_v18 = vmul.f32 1.442695, %v1623_v17 }
 0x854   :  { %v1729_v20 = vpop.permute.xlu1 %1728 }
 0x855   :  { %8710 = vpow2.f32 %v1630_v18  ;;  %8196 = vmatpush3.msra.mxu0 %v1729_v20 }
 0x856   :  { %8205 = vmatprep.subr.mxu0 %v8873_v19 }
 0x858   :  { %v2161_v38 = vpop.permute.xlu1 %2160 }
 0x85b   :  { %v8709_v21 = vpop.eup %8708 }
 0x85c   :  { %v1635_v22 = vsel %vm946_vm8, %v8709_v21, 0.0  ;;  %v2159_v48 = vpop.permute.xlu1 %2158 }
 0x85d   :  { %1636 = vadd.xlane.f32.xlu0 %v1635_v22 }
 0x85f   :  { %v8711_v23 = vpop.eup %8710 }
 0x860   :  { %v1641_v24 = vsel %vm946_vm8, %v8711_v23, 0.0  ;;  %v2237_v52 = vpop.permute.xlu1 %2236 }
 0x861   :  { %1642 = vadd.xlane.f32.xlu0 %v1641_v24 }
 0x864   :  { %v2315_v60 = vpop.permute.xlu1 %2314 }
 0x868   :  { %v2393_v63 = vpop.permute.xlu1 %2392 }
 0x877   :  { %1880 = vrot.lane.b32.xlu0 %v8989_v51, %s8879_s5 }
 0x87b   :  { %2238 = vrot.lane.b32.xlu0 %v8981_v46, %s8880_s6 }
 0x87f   :  { %2316 = vrot.lane.b32.xlu0 %v8993_v53, %s8880_s6 }
 0x883   :  { %2394 = vrot.lane.b32.xlu0 %v8989_v51, %s8880_s6 }
 0x88d   :  { %v9138_v25 = vpop.f32.mrb[12].mxu1 }
 0x88e   :  { %v8154_v26 = vpop.f32.mrb[13].mxu1 }
 0x891   :  { %v9140_v27 = vpop.f32.mrb[14].mxu1 }
 0x892   :  { %v8164_v28 = vpop.f32.mrb[15].mxu1 }
 0x898   :  { %v1370_v29 = vpop.f32.mrb[16].mxu1 }
 0x899   :  { %v8174_v30 = vpop.f32.mrb[17].mxu1  ;;  %v1608_v34 = vsel %vm946_vm8, %v1370_v29, -inf }
 0x89c   :  { %v1526_v31 = vpop.f32.mrb[18].mxu1 }
 0x89d   :  { %v8184_v32 = vpop.f32.mrb[19].mxu1  ;;  %v1614_v33 = vsel %vm946_vm8, %v1526_v31, -inf }
 0x89e   :  { %1615 = vmax.xlane.f32.xlu1 %v1614_v33 }
 0x8a2   :  { %1609 = vmax.xlane.f32.xlu0 %v1608_v34 }
 0x8af   :  { %1652 = vrot.lane.b32.xlu1 %v8983_v49, %s8879_s5 }
 0x8ea   :  { %v1637_v35 = vpop.xlane.xlu0 %1636 }
 0x8eb   :  { %8712 = vrcp.f32 %v1637_v35 }
 0x8ee   :  { %v1643_v36 = vpop.xlane.xlu0 %1642 }
 0x8ef   :  { %8714 = vrcp.f32 %v1643_v36 }
 0x8f2   :  { %v1881_v41 = vpop.permute.xlu0 %1880 }
 0x8f5   :  { %v8713_v37 = vpop.eup %8712 }
 0x8f6   :  { %v1649_v40 = vmul.f32 %v8713_v37, %v8709_v21  ;;  %v2239_v50 = vpop.permute.xlu0 %2238  ;;  %v1956_v37 = vld [vmem:[#allocation2 + $0x74] sm:$0xf] }
 0x8f8   :  { %8198 = vmatmul.mubr.msk.f32.vlgmr.msra.gmra.mrb[20].mxu0 %vm946_vm8, %v1649_v40 }
 0x8f9   :  { %v8715_v44 = vpop.eup %8714  ;;  %8206 = vmatpush3.msra.mxu0 %v1881_v41  ;;  %8207 = vmatprep.mubr.msk.f32.mxu0 %vm8874_vm5, %v8873_v19 }
 0x8fa   :  { %v1651_v45 = vmul.f32 %v8715_v44, %v8711_v23  ;;  %8226 = vmatprep.subr.mxu0 %v8873_v19  ;;  %v2317_v56 = vpop.permute.xlu0 %2316 }
 0x8fc   :  { %8208 = vmatmul.mubr.msk.f32.vlgmr.msra.gmra.mrb[22].mxu0 %vm946_vm8, %v1651_v45 }
 0x8fd   :  { %8228 = vmatprep.mubr.msk.f32.mxu0 %vm8874_vm5, %v8873_v19 }
 0x8fe   :  { %v2395_v62 = vpop.permute.xlu0 %2394 }
 0x900   :  { %8227 = vmatpush3.xpose.msk.msra.mxu0 %vm636_vm7, %v2161_v38  ;;  %v1295_v38 = vld [vmem:[#allocation2 + $0x70] sm:$0xf] }
 0x901   :  { %8231 = vmatprep.subr.mxu0 %v8873_v19 }
 0x903   :  { %8229 = vmatmul.mubr.msk.f32.vlgmr.msra.gmra.mrb[24].mxu0 %vm636_vm7, %v2159_v48 }
 0x904   :  { %8232 = vmatpush3.xpose.msk.msra.mxu0 %vm636_vm7, %v2239_v50  ;;  %8233 = vmatprep.mubr.msk.f32.mxu0 %vm8874_vm5, %v8873_v19 }
 0x905   :  { %8236 = vmatprep.subr.mxu0 %v8873_v19 }
 0x907   :  { %8234 = vmatmul.mubr.msk.f32.vlgmr.msra.gmra.mrb[26].mxu0 %vm636_vm7, %v2237_v52 }
 0x908   :  { %8237 = vmatpush3.xpose.msk.msra.mxu0 %vm636_vm7, %v2317_v56  ;;  %8238 = vmatprep.mubr.msk.f32.mxu0 %vm8874_vm5, %v8873_v19 }
 0x909   :  { %8241 = vmatprep.subr.mxu0 %v8873_v19 }
 0x90b   :  { %8239 = vmatmul.mubr.msk.f32.vlgmr.msra.gmra.mrb[28].mxu0 %vm636_vm7, %v2315_v60 }
 0x90c   :  { %8242 = vmatpush3.xpose.msk.msra.mxu0 %vm636_vm7, %v2395_v62  ;;  %8243 = vmatprep.mubr.msk.f32.mxu0 %vm8874_vm5, %v8873_v19 }
 0x90d   :  { %8251 = vmatprep.subr.mxu0 %v8873_v19 }
 0x90f   :  { %8244 = vmatmul.mubr.msk.f32.vlgmr.msra.gmra.mrb[30].mxu0 %vm636_vm7, %v2393_v63 }
 0x910   :  { %8253 = vmatprep.mubr.msk.f32.mxu0 %vm8874_vm5, %v8873_v19 }
 0x92b   :  { %v1616_v0 = vpop.xlane.xlu1 %1615 }
 0x92c   :  { %v1622_v1 = vsub.f32 %v1526_v31, %v1616_v0 }
 0x92e   :  { %v1628_v5 = vmul.f32 1.442695, %v1622_v1 }
 0x92f   :  { %v1610_v2 = vpop.xlane.xlu0 %1609  ;;  %v1653_v3 = vpop.permute.xlu1 %1652 }
 0x930   :  { %v1620_v4 = vsub.f32 %v1370_v29, %v1610_v2  ;;  %8191 = vmatpush3.msra.mxu1 %v1653_v3 }
 0x931   :  { %8200 = vmatprep.subr.mxu1 %v8873_v19 }
 0x932   :  { %v1624_v6 = vmul.f32 1.442695, %v1620_v4 }
 0x934   :  { %8716 = vpow2.f32 %v1624_v6 }
 0x935   :  { %8718 = vpow2.f32 %v1628_v5 }
 0x93e   :  { %v8717_v7 = vpop.eup %8716 }
 0x93f   :  { %v1632_v8 = vsel %vm946_vm8, %v8717_v7, 0.0  ;;  %v8719_v9 = vpop.eup %8718 }
 0x940   :  { %1633 = vadd.xlane.f32.xlu0 %v1632_v8  ;;  %v1638_v10 = vsel %vm946_vm8, %v8719_v9, 0.0 }
 0x944   :  { %1639 = vadd.xlane.f32.xlu0 %v1638_v10 }
 0x95a   :  { %1804 = vrot.lane.b32.xlu0 %v8993_v53, %s8879_s5 }
 0x9cb   :  { %v9178_v11 = vpop.f32.mrb[20].mxu0 }
 0x9cc   :  { %v8199_v12 = vpop.f32.mrb[21].mxu0 }
 0x9cd   :  { %v1634_v13 = vpop.xlane.xlu0 %1633 }
 0x9ce   :  { %8720 = vrcp.f32 %v1634_v13 }
 0x9cf   :  { %v9180_v14 = vpop.f32.mrb[22].mxu0 }
 0x9d0   :  { %v8209_v15 = vpop.f32.mrb[23].mxu0 }
 0x9d1   :  { %v1640_v16 = vpop.xlane.xlu0 %1639 }
 0x9d2   :  { %8722 = vrcp.f32 %v1640_v16 }
 0x9d5   :  { %v1805_v24 = vpop.permute.xlu0 %1804 }
 0x9d6   :  { %v2232_v17 = vpop.f32.mrb[24].mxu0 }
 0x9d7   :  { %v8230_v18 = vpop.f32.mrb[25].mxu0  ;;  %v2470_v20 = vsel %vm946_vm8, %v2232_v17, -inf }
 0x9d8   :  { %v8721_v21 = vpop.eup %8720  ;;  %2471 = vmax.xlane.f32.xlu1 %v2470_v20 }
 0x9d9   :  { %v1648_v22 = vmul.f32 %v8721_v21, %v8717_v7 }
 0x9da   :  { %v2310_v23 = vpop.f32.mrb[26].mxu0 }
 0x9db   :  { %v8235_v26 = vpop.f32.mrb[27].mxu0  ;;  %8193 = vmatmul.mubr.msk.f32.vlgmr.msra.gmra.mrb[20].mxu1 %vm946_vm8, %v1648_v22  ;;  %v2473_v28 = vsel %vm946_vm8, %v2310_v23, -inf }
 0x9dc   :  { %v8723_v29 = vpop.eup %8722  ;;  %8201 = vmatpush3.msra.mxu1 %v1805_v24  ;;  %2474 = vmax.xlane.f32.xlu0 %v2473_v28 }
 0x9dd   :  { %8202 = vmatprep.mubr.msk.f32.mxu1 %vm8874_vm5, %v8873_v19  ;;  %v1650_v30 = vmul.f32 %v8723_v29, %v8719_v9  ;;  %8210 = vmatprep.subr.msk.mxu1 %vm1969_vm9, %v1956_v37 }
 0x9de   :  { %v2388_v31 = vpop.f32.mrb[28].mxu0 }
 0x9df   :  { %v8240_v32 = vpop.f32.mrb[29].mxu0  ;;  %8203 = vmatmul.mubr.msk.f32.vlgmr.msra.gmra.mrb[22].mxu1 %vm946_vm8, %v1650_v30  ;;  %v2476_v33 = vsel %vm946_vm8, %v2388_v31, -inf }
 0x9e0   :  { %2477 = vmax.xlane.f32.xlu1 %v2476_v33  ;;  %8211 = vmatpush3.msk.msra.mxu1 %vm1969_vm9, %v1956_v37 }
 0x9e1   :  { %8218 = vmatprep.subr.msk.mxu1 %vm1969_vm9, %v1295_v38 }
 0x9e2   :  { %v2466_v34 = vpop.f32.mrb[30].mxu0 }
 0x9e3   :  { %v8245_v35 = vpop.f32.mrb[31].mxu0  ;;  %v2479_v36 = vsel %vm946_vm8, %v2466_v34, -inf }
 0x9e4   :  { %2480 = vmax.xlane.f32.xlu0 %v2479_v36 }
 0x9f1   :  { %2514 = vrot.lane.b32.xlu1 %v8983_v49, %s8882_s8 }
 0xa65   :  { %v2472_v40 = vpop.xlane.xlu1 %2471 }
 0xa66   :  { %v2482_v41 = vsub.f32 %v2232_v17, %v2472_v40 }
 0xa68   :  { %v2486_v44 = vmul.f32 1.442695, %v2482_v41 }
 0xa69   :  { %v2475_v45 = vpop.xlane.xlu0 %2474 }
 0xa6a   :  { %8724 = vpow2.f32 %v2486_v44  ;;  %v2483_v48 = vsub.f32 %v2310_v23, %v2475_v45 }
 0xa6c   :  { %v2488_v50 = vmul.f32 1.442695, %v2483_v48 }
 0xa6d   :  { %v2478_v52 = vpop.xlane.xlu1 %2477 }
 0xa6e   :  { %8726 = vpow2.f32 %v2488_v50  ;;  %v2484_v56 = vsub.f32 %v2388_v31, %v2478_v52 }
 0xa70   :  { %v2490_v60 = vmul.f32 1.442695, %v2484_v56 }
 0xa71   :  { %v2481_v62 = vpop.xlane.xlu0 %2480 }
 0xa72   :  { %8728 = vpow2.f32 %v2490_v60  ;;  %v2485_v63 = vsub.f32 %v2466_v34, %v2481_v62 }
 0xa74   :  { %v8725_v0 = vpop.eup %8724  ;;  %v2492_v1 = vmul.f32 1.442695, %v2485_v63 }
 0xa75   :  { %v2494_v2 = vsel %vm946_vm8, %v8725_v0, 0.0 }
 0xa76   :  { %8730 = vpow2.f32 %v2492_v1  ;;  %2495 = vadd.xlane.f32.xlu1 %v2494_v2 }
 0xa78   :  { %v8727_v3 = vpop.eup %8726 }
 0xa79   :  { %v2497_v4 = vsel %vm946_vm8, %v8727_v3, 0.0 }
 0xa7a   :  { %2498 = vadd.xlane.f32.xlu0 %v2497_v4 }
 0xa7c   :  { %v9197_v5 = vpop.eup %8728 }
 0xa7d   :  { %v2500_v6 = vsel %vm946_vm8, %v9197_v5, 0.0 }
 0xa7e   :  { %2501 = vadd.xlane.f32.xlu1 %v2500_v6 }
 0xa80   :  { %v9201_v7 = vpop.eup %8730 }
 0xa81   :  { %v2503_v8 = vsel %vm946_vm8, %v9201_v7, 0.0 }
 0xa82   :  { %2504 = vadd.xlane.f32.xlu0 %v2503_v8 }
 0xa8f   :  { %2666 = vrot.lane.b32.xlu1 %v8993_v53, %s8882_s8 }
 0xa93   :  { %2742 = vrot.lane.b32.xlu1 %v8989_v51, %s8882_s8 }
 0xa97   :  { %2923 = vrot.lane.b32.xlu1 %v8999_v55, %s8883_s9 }
 0xa98   :  { %2590 = vrot.lane.b32.xlu0 %v8981_v46, %s8882_s8 }
 0xa9b   :  { %3001 = vrot.lane.b32.xlu1 %v9008_v57, %s8883_s9 }
 0xa9c   :  { %2925 = vrot.lane.b32.xlu0 %v8983_v49, %s8884_s10 }
 0xa9f   :  { %3159 = vrot.lane.b32.xlu1 %v8989_v51, %s8884_s10 }
 0xaa0   :  { %3003 = vrot.lane.b32.xlu0 %v8981_v46, %s8884_s10 }
 0xaa3   :  { %3157 = vrot.lane.b32.xlu1 %v9017_v59, %s8883_s9  ;;  %v2515_v59 = vpop.permute.xlu1 %2514 }
 0xaa4   :  { %3081 = vrot.lane.b32.xlu0 %v8993_v53, %s8884_s10 }
 0xaa8   :  { %3079 = vrot.lane.b32.xlu0 %v9024_v61, %s8883_s9 }
 0xaae   :  { %v1724_v55 = vpop.f32.mrb[20].mxu1 }
 0xaaf   :  { %v8194_v57 = vpop.f32.mrb[21].mxu1  ;;  %8212 = vmatprep.mubr.msk.f32.mxu1 %vm636_vm7, %v1724_v55 }
 0xab0   :  { %8213 = vmatmul.mubr.msk.f32.vlgmr.msra.gmra.mrb[24].mxu1 %vm636_vm7, %v9178_v11 }
 0xab1   :  { %8219 = vmatpush3.msk.msra.mxu1 %vm1969_vm9, %v1295_v38 }
 0xab2   :  { %v1876_v9 = vpop.f32.mrb[22].mxu1  ;;  %8246 = vmatprep.subr.mxu1 %v8873_v19 }
 0xab3   :  { %v8204_v10 = vpop.f32.mrb[23].mxu1  ;;  %8215 = vmatprep.mubr.msk.f32.mxu1 %vm636_vm7, %v1876_v9 }
 0xab4   :  { %8216 = vmatmul.mubr.msk.f32.gmra.mrb[26].mxu1 %vm636_vm7, %v9180_v14 }
 0xab5   :  { %8220 = vmatprep.mubr.msk.f32.mxu1 %vm636_vm7, %v9138_v25 }
 0xab8   :  { %8221 = vmatmul.mubr.msk.f32.vlgmr.msra.gmra.mrb[24].mxu1 %vm636_vm7, %v9092_v54 }
 0xab9   :  { %8247 = vmatpush3.msra.mxu1 %v2515_v59  ;;  %8223 = vmatprep.mubr.msk.f32.mxu1 %vm636_vm7, %v9140_v27  ;;  %v2818_v27 = vld [vmem:[#allocation2 + $0x78] sm:$0xf] }
 0xaba   :  { %8256 = vmatprep.subr.mxu1 %v8873_v19 }
 0xabc   :  { %8224 = vmatmul.mubr.msk.f32.gmra.mrb[26].mxu1 %vm636_vm7, %v9094_v58 }
 0xabd   :  { %8248 = vmatprep.mubr.msk.f32.mxu1 %vm8874_vm5, %v8873_v19 }
 0xb03   :  { %v2496_v61 = vpop.xlane.xlu1 %2495 }
 0xb04   :  { %8732 = vrcp.f32 %v2496_v61 }
 0xb07   :  { %v2499_v11 = vpop.xlane.xlu0 %2498 }
 0xb08   :  { %8734 = vrcp.f32 %v2499_v11 }
 0xb0b   :  { %v2502_v25 = vpop.xlane.xlu1 %2501 }
 0xb0c   :  { %8736 = vrcp.f32 %v2502_v25 }
 0xb0e   :  { %v8733_v12 = vpop.eup %8732 }
 0xb0f   :  { %v2510_v54 = vmul.f32 %v8733_v12, %v8725_v0  ;;  %v2667_v13 = vpop.permute.xlu1 %2666  ;;  %v2505_v14 = vpop.xlane.xlu0 %2504 }
 0xb10   :  { %8738 = vrcp.f32 %v2505_v14 }
 0xb11   :  { %8249 = vmatmul.mubr.msk.f32.vlgmr.msra.gmra.mrb[28].mxu1 %vm946_vm8, %v2510_v54 }
 0xb12   :  { %v8735_v15 = vpop.eup %8734  ;;  %8257 = vmatpush3.msra.mxu1 %v2667_v13  ;;  %8258 = vmatprep.mubr.msk.f32.mxu1 %vm8874_vm5, %v8873_v19 }
 0xb13   :  { %v2743_v58 = vpop.permute.xlu1 %2742  ;;  %v2591_v16 = vpop.permute.xlu0 %2590  ;;  %v2511_v17 = vmul.f32 %v8735_v15, %v8727_v3  ;;  %8266 = vmatprep.subr.msk.mxu1 %vm1969_vm9, %v2818_v27 }
 0xb14   :  { %8252 = vmatpush3.msra.mxu0 %v2591_v16 }
 0xb15   :  { %8254 = vmatmul.mubr.msk.f32.vlgmr.msra.gmra.mrb[32].mxu0 %vm946_vm8, %v2511_v17  ;;  %8261 = vmatprep.subr.mxu0 %v8873_v19 }
 0xb16   :  { %v8737_v18 = vpop.eup %8736  ;;  %8262 = vmatpush3.msra.mxu0 %v2743_v58  ;;  %8263 = vmatprep.mubr.msk.f32.mxu0 %vm8874_vm5, %v8873_v19 }
 0xb17   :  { %v2924_v20 = vpop.permute.xlu1 %2923  ;;  %v2512_v21 = vmul.f32 %v8737_v18, %v9197_v5  ;;  %8274 = vmatprep.subr.mxu0 %v8873_v19  ;;  %v2926_v23 = vpop.permute.xlu0 %2925  ;;  %v3583_v18 = vld [vmem:[#allocation2 + $0x7c] sm:$0xf] }
 0xb19   :  { %8259 = vmatmul.mubr.msk.f32.vlgmr.msra.gmra.mrb[30].mxu1 %vm946_vm8, %v2512_v21 }
 0xb1a   :  { %v8739_v22 = vpop.eup %8738  ;;  %8267 = vmatpush3.msk.msra.mxu1 %vm1969_vm9, %v2818_v27 }
 0xb1b   :  { %v2513_v24 = vmul.f32 %v8739_v22, %v9201_v7  ;;  %8284 = vmatprep.subr.mxu1 %v8873_v19  ;;  %v3002_v26 = vpop.permute.xlu1 %3001  ;;  %v3004_v28 = vpop.permute.xlu0 %3003 }
 0xb1d   :  { %8264 = vmatmul.mubr.msk.f32.vlgmr.msra.gmra.mrb[34].mxu0 %vm946_vm8, %v2513_v24 }
 0xb1e   :  { %8275 = vmatpush3.xpose.msk.msra.mxu0 %vm636_vm7, %v2926_v23  ;;  %8276 = vmatprep.mubr.msk.f32.mxu0 %vm8874_vm5, %v8873_v19 }
 0xb1f   :  { %8279 = vmatprep.subr.mxu0 %v8873_v19  ;;  %v3160_v29 = vpop.permute.xlu1 %3159  ;;  %v3082_v34 = vpop.permute.xlu0 %3081 }
 0xb21   :  { %8277 = vmatmul.mubr.msk.f32.vlgmr.msra.gmra.mrb[36].mxu0 %vm636_vm7, %v2924_v20 }
 0xb22   :  { %8280 = vmatpush3.xpose.msk.msra.mxu0 %vm636_vm7, %v3004_v28  ;;  %8281 = vmatprep.mubr.msk.f32.mxu0 %vm8874_vm5, %v8873_v19 }
 0xb23   :  { %8289 = vmatprep.subr.mxu0 %v8873_v19  ;;  %v3158_v30 = vpop.permute.xlu1 %3157  ;;  %v3080_v41 = vpop.permute.xlu0 %3079 }
 0xb25   :  { %8282 = vmatmul.mubr.msk.f32.vlgmr.msra.gmra.mrb[38].mxu0 %vm636_vm7, %v3002_v26 }
 0xb26   :  { %8290 = vmatpush3.xpose.msk.msra.mxu0 %vm636_vm7, %v3160_v29  ;;  %8291 = vmatprep.mubr.msk.f32.mxu0 %vm8874_vm5, %v8873_v19 }
 0xb27   :  { %8299 = vmatprep.subr.mxu0 %v8873_v19 }
 0xb29   :  { %8292 = vmatmul.mubr.msk.f32.vlgmr.msra.gmra.mrb[40].mxu0 %vm636_vm7, %v3158_v30 }
 0xb2a   :  { %8301 = vmatprep.mubr.msk.f32.mxu0 %vm8874_vm5, %v8873_v19 }
 0xbe4   :  { %v2586_v31 = vpop.f32.mrb[28].mxu1 }
 0xbe5   :  { %v8250_v32 = vpop.f32.mrb[29].mxu1  ;;  %8268 = vmatprep.mubr.msk.f32.mxu1 %vm636_vm7, %v2586_v31 }
 0xbe8   :  { %v2662_v33 = vpop.f32.mrb[32].mxu0 }
 0xbe9   :  { %v8255_v35 = vpop.f32.mrb[33].mxu0  ;;  %8269 = vmatmul.mubr.msk.f32.vlgmr.msra.gmra.mrb[24].mxu1 %vm636_vm7, %v2662_v33 }
 0xbea   :  { %8285 = vmatpush3.xpose.msk.msra.mxu1 %vm636_vm7, %v3082_v34 }
 0xbeb   :  { %8294 = vmatprep.subr.mxu1 %v8873_v19 }
 0xbec   :  { %v2738_v36 = vpop.f32.mrb[30].mxu1 }
 0xbed   :  { %v8260_v37 = vpop.f32.mrb[31].mxu1  ;;  %8271 = vmatprep.mubr.msk.f32.mxu1 %vm636_vm7, %v2738_v36 }
 0xbf0   :  { %v2814_v38 = vpop.f32.mrb[34].mxu0 }
 0xbf1   :  { %v8265_v40 = vpop.f32.mrb[35].mxu0  ;;  %8272 = vmatmul.mubr.msk.f32.gmra.mrb[26].mxu1 %vm636_vm7, %v2814_v38 }
 0xbf2   :  { %8286 = vmatprep.mubr.msk.f32.mxu1 %vm8874_vm5, %v8873_v19  ;;  %v7738_v40 = vld [vmem:[#allocation2 + $0xb3] ss:$0 sm:$0xff] }
 0xbf4   :  { %v2997_v44 = vpop.f32.mrb[36].mxu0 }
 0xbf5   :  { %v8278_v45 = vpop.f32.mrb[37].mxu0  ;;  %8287 = vmatmul.mubr.msk.f32.vlgmr.msra.gmra.mrb[32].mxu1 %vm636_vm7, %v3080_v41  ;;  %v3235_v48 = vsel %vm946_vm8, %v2997_v44, -inf }
 0xbf6   :  { %3236 = vmax.xlane.f32.xlu0 %v3235_v48  ;;  %8296 = vmatprep.mubr.msk.f32.mxu1 %vm8874_vm5, %v8873_v19 }
 0xbf8   :  { %v3075_v50 = vpop.f32.mrb[38].mxu0 }
 0xbf9   :  { %v8283_v52 = vpop.f32.mrb[39].mxu0  ;;  %v3238_v56 = vsel %vm946_vm8, %v3075_v50, -inf }
 0xbfa   :  { %3239 = vmax.xlane.f32.xlu1 %v3238_v56 }
 0xbfc   :  { %v3231_v60 = vpop.f32.mrb[40].mxu0 }
 0xbfd   :  { %v8293_v62 = vpop.f32.mrb[41].mxu0  ;;  %v3244_v57 = vsel %vm946_vm8, %v3231_v60, -inf }
 0xc83   :  { %v3237_v63 = vpop.xlane.xlu0 %3236 }
 0xc84   :  { %v3247_v0 = vsub.f32 %v2997_v44, %v3237_v63 }
 0xc86   :  { %v3251_v1 = vmul.f32 1.442695, %v3247_v0 }
 0xc87   :  { %v3240_v4 = vpop.xlane.xlu1 %3239 }
 0xc88   :  { %8740 = vpow2.f32 %v3251_v1  ;;  %v3248_v5 = vsub.f32 %v3075_v50, %v3240_v4 }
 0xc8a   :  { %v3253_v6 = vmul.f32 1.442695, %v3248_v5 }
 0xc8c   :  { %8742 = vpow2.f32 %v3253_v6 }
 0xc92   :  { %v8741_v2 = vpop.eup %8740 }
 0xc93   :  { %v3259_v3 = vsel %vm946_vm8, %v8741_v2, 0.0 }
 0xc94   :  { %3260 = vadd.xlane.f32.xlu1 %v3259_v3 }
 0xc96   :  { %v8743_v9 = vpop.eup %8742 }
 0xc97   :  { %v3262_v10 = vsel %vm946_vm8, %v8743_v9, 0.0 }
 0xca5   :  { %3279 = vrot.lane.b32.xlu1 %v8983_v49, %s8885_s11 }
 0xca9   :  { %3431 = vrot.lane.b32.xlu1 %v8993_v53, %s8885_s11 }
 0xcc8   :  { %v3153_v7 = vpop.f32.mrb[32].mxu1 }
 0xcc9   :  { %v8288_v8 = vpop.f32.mrb[33].mxu1  ;;  %v3241_v55 = vsel %vm946_vm8, %v3153_v7, -inf }
 0xcca   :  { %3242 = vmax.xlane.f32.xlu0 %v3241_v55 }
 0xcce   :  { %3245 = vmax.xlane.f32.xlu0 %v3244_v57 }
 0xcd2   :  { %3263 = vadd.xlane.f32.xlu0 %v3262_v10 }
 0xd21   :  { %v3261_v49 = vpop.xlane.xlu1 %3260 }
 0xd22   :  { %8744 = vrcp.f32 %v3261_v49 }
 0xd25   :  { %v3280_v59 = vpop.permute.xlu1 %3279 }
 0xd26   :  { %8295 = vmatpush3.msra.mxu1 %v3280_v59 }
 0xd27   :  { %8304 = vmatprep.subr.mxu1 %v8873_v19 }
 0xd29   :  { %v3432_v11 = vpop.permute.xlu1 %3431 }
 0xd2c   :  { %v8745_v53 = vpop.eup %8744 }
 0xd2d   :  { %v3275_v61 = vmul.f32 %v8745_v53, %v8741_v2 }
 0xd2f   :  { %8297 = vmatmul.mubr.msk.f32.vlgmr.msra.gmra.mrb[34].mxu1 %vm946_vm8, %v3275_v61 }
 0xd30   :  { %8305 = vmatpush3.msra.mxu1 %v3432_v11  ;;  %8306 = vmatprep.mubr.msk.f32.mxu1 %vm8874_vm5, %v8873_v19 }
 0xd31   :  { %8314 = vmatprep.subr.msk.mxu1 %vm1969_vm9, %v3583_v18 }
 0xd57   :  { %v3243_v25 = vpop.xlane.xlu0 %3242 }
 0xd58   :  { %v3249_v12 = vsub.f32 %v3153_v7, %v3243_v25 }
 0xd5a   :  { %v3255_v54 = vmul.f32 1.442695, %v3249_v12 }
 0xd5b   :  { %v3246_v13 = vpop.xlane.xlu0 %3245 }
 0xd5c   :  { %8746 = vpow2.f32 %v3255_v54  ;;  %v3250_v14 = vsub.f32 %v3231_v60, %v3246_v13 }
 0xd5e   :  { %v3257_v27 = vmul.f32 1.442695, %v3250_v14 }
 0xd5f   :  { %v3264_v20 = vpop.xlane.xlu0 %3263 }
 0xd60   :  { %8748 = vpow2.f32 %v3257_v27 }
 0xd61   :  { %8750 = vrcp.f32 %v3264_v20  ;;  %v3879_v20 = vld [vmem:[#allocation2 + $0x90] sm:$0xff] }
 0xd66   :  { %v8747_v15 = vpop.eup %8746 }
 0xd67   :  { %v3265_v58 = vsel %vm946_vm8, %v8747_v15, 0.0 }
 0xd68   :  { %3266 = vadd.xlane.f32.xlu1 %v3265_v58 }
 0xd6a   :  { %v8749_v16 = vpop.eup %8748 }
 0xd6b   :  { %v3268_v17 = vsel %vm946_vm8, %v8749_v16, 0.0  ;;  %v8751_v23 = vpop.eup %8750 }
 0xd6c   :  { %3269 = vadd.xlane.f32.xlu0 %v3268_v17  ;;  %v3276_v26 = vmul.f32 %v8751_v23, %v8743_v9  ;;  %v3772_v17 = vld [vmem:[#allocation2 + $0x88] sm:$0xff] }
 0xd79   :  { %3507 = vrot.lane.b32.xlu1 %v8989_v51, %s8885_s11 }
 0xd82   :  { %3355 = vrot.lane.b32.xlu0 %v8981_v46, %s8885_s11 }
 0xdf5   :  { %v3267_v21 = vpop.xlane.xlu1 %3266 }
 0xdf6   :  { %8752 = vrcp.f32 %v3267_v21  ;;  %v3880_v21 = vld [vmem:[#allocation2 + $0x98] sm:$0xff] }
 0xdf9   :  { %v3270_v22 = vpop.xlane.xlu0 %3269  ;;  %v3508_v28 = vpop.permute.xlu1 %3507 }
 0xdfa   :  { %8754 = vrcp.f32 %v3270_v22  ;;  %v8610_v22 = vpack.c.bf16 %v3880_v21, %v3879_v20 }
 0xdfd   :  { %v3356_v24 = vpop.permute.xlu0 %3355 }
 0xdfe   :  { %8300 = vmatpush3.msra.mxu0 %v3356_v24 }
 0xdff   :  { %8302 = vmatmul.mubr.msk.f32.vlgmr.msra.gmra.mrb[42].mxu0 %vm946_vm8, %v3276_v26  ;;  %8309 = vmatprep.subr.mxu0 %v8873_v19 }
 0xe00   :  { %v8753_v51 = vpop.eup %8752  ;;  %8310 = vmatpush3.msra.mxu0 %v3508_v28  ;;  %8311 = vmatprep.mubr.msk.f32.mxu0 %vm8874_vm5, %v8873_v19 }
 0xe01   :  { %v3277_v46 = vmul.f32 %v8753_v51, %v8747_v15 }
 0xe02   :  { %v3351_v29 = vpop.f32.mrb[34].mxu1 }
 0xe03   :  { %v8298_v30 = vpop.f32.mrb[35].mxu1  ;;  %8307 = vmatmul.mubr.msk.f32.vlgmr.msra.gmra.mrb[36].mxu1 %vm946_vm8, %v3277_v46 }
 0xe04   :  { %v8755_v31 = vpop.eup %8754  ;;  %8316 = vmatprep.mubr.msk.f32.mxu1 %vm636_vm7, %v3351_v29  ;;  %8315 = vmatpush3.msk.msra.mxu1 %vm1969_vm9, %v3583_v18 }
 0xe05   :  { %v3278_v32 = vmul.f32 %v8755_v31, %v8749_v16  ;;  %v3771_v16 = vld [vmem:[#allocation2 + $0x80] sm:$0xff]  ;;  %8611 = vmatprep.subr.bf16.mxu1 %v8610_v22 }
 0xe06   :  { %v8606_v18 = vpack.c.bf16 %v3772_v17, %v3771_v16 }
 0xe07   :  { %8312 = vmatmul.mubr.msk.f32.vlgmr.msra.gmra.mrb[44].mxu0 %vm946_vm8, %v3278_v32 }
 0xe08   :  { %8607 = vmatprep.subr.bf16.mxu0 %v8606_v18 }
 0xe09   :  { %8609 = vmatpush3.bf16.msra.mxu0 %v8606_v18 }
 0xed2   :  { %v3427_v33 = vpop.f32.mrb[42].mxu0 }
 0xed3   :  { %v8303_v34 = vpop.f32.mrb[43].mxu0  ;;  %8317 = vmatmul.mubr.msk.f32.vlgmr.msra.gmra.mrb[24].mxu1 %vm636_vm7, %v3427_v33 }
 0xed4   :  { %8613 = vmatpush3.bf16.msra.mxu1 %v8610_v22 }
 0xed6   :  { %v3503_v35 = vpop.f32.mrb[36].mxu1 }
 0xed7   :  { %v8308_v36 = vpop.f32.mrb[37].mxu1  ;;  %8319 = vmatprep.mubr.msk.f32.mxu1 %vm636_vm7, %v3503_v35  ;;  %v7739_v35 = vld [vmem:[#allocation2 + $0xb4] ss:$0 sm:$0xff] }
 0xeda   :  { %v3579_v37 = vpop.f32.mrb[44].mxu0 }
 0xedb   :  { %v8313_v38 = vpop.f32.mrb[45].mxu0  ;;  %8320 = vmatmul.mubr.msk.f32.gmra.mrb[26].mxu1 %vm636_vm7, %v3579_v37 }
 0xfa6   :  { %v8318_v41 = vpop.f32.mrb[24].mxu1 }
 0xfa7   :  { %v3694_v44 = vadd.f32 %v8318_v41, %v7738_v40  ;;  %v3665_v45 = vpop.f32.mrb[25].mxu1  ;;  %v7740_v41 = vld [vmem:[#allocation2 + $0xb5] ss:$0 sm:$0xff] }
 0xfa8   :  { %v3693_v48 = vadd.f32 %v7738_v40, %v3665_v45 }
 0xfa9   :  { %v9322_v50 = vadd.f32 %v3694_v44, %v8956_v43 }
 0xfaa   :  { %v9325_v52 = vadd.f32 %v3693_v48, %v8950_v39 }
 0xfab   :  { %v3706_v56 = vsel %vm161_vm6, %v9322_v50, 0.0 }
 0xfac   :  { %3707 = vadd.xlane.f32.xlu1 %v3706_v56  ;;  %v3703_v60 = vsel %vm161_vm6, %v9325_v52, 0.0 }
 0xfad   :  { %3704 = vadd.xlane.f32.xlu0 %v3703_v60 }
 0xfae   :  { %v8321_v62 = vpop.f32.mrb[26].mxu1 }
 0xfaf   :  { %v3696_v63 = vadd.f32 %v8321_v62, %v7738_v40  ;;  %v3675_v0 = vpop.f32.mrb[27].mxu1 }
 0xfb0   :  { %v3695_v1 = vadd.f32 %v7738_v40, %v3675_v0 }
 0xfb1   :  { %v9332_v2 = vadd.f32 %v3696_v63, %v8954_v42 }
 0xfb2   :  { %v9335_v3 = vadd.f32 %v3695_v1, %v8960_v47 }
 0xfb3   :  { %v3712_v5 = vsel %vm161_vm6, %v9332_v2, 0.0 }
 0xfb4   :  { %v3709_v4 = vsel %vm161_vm6, %v9335_v3, 0.0 }
 0xfb5   :  { %3710 = vadd.xlane.f32.xlu0 %v3709_v4 }
 0xfb9   :  { %3713 = vadd.xlane.f32.xlu0 %v3712_v5 }
0x1039   :  { %v3708_v6 = vpop.xlane.xlu1 %3707 }
0x103a   :  { %v3716_v7 = vmul.f32 0.0625, %v3708_v6  ;;  %v3705_v8 = vpop.xlane.xlu0 %3704 }
0x103b   :  { %v3715_v55 = vmul.f32 0.0625, %v3705_v8  ;;  %v3882_v8 = vld [vmem:[#allocation2 + $0xa8] sm:$0xff] }
0x103c   :  { %v3720_v57 = vsub.f32 %v9322_v50, %v3716_v7  ;;  %v3881_v7 = vld [vmem:[#allocation2 + $0xa0] sm:$0xff] }
0x103d   :  { %v3719_v9 = vsub.f32 %v9325_v52, %v3715_v55  ;;  %v8614_v55 = vpack.c.bf16 %v3882_v8, %v3881_v7 }
0x103e   :  { %v3724_v10 = vmul.f32 %v3720_v57, %v3720_v57 }
0x103f   :  { %v3723_v49 = vmul.f32 %v3719_v9, %v3719_v9  ;;  %8615 = vmatprep.subr.bf16.mxu1 %v8614_v55 }
0x1040   :  { %v3730_v59 = vsel %vm161_vm6, %v3724_v10, 0.0  ;;  %8617 = vmatpush3.bf16.msra.mxu1 %v8614_v55 }
0x1041   :  { %3731 = vadd.xlane.f32.xlu0 %v3730_v59  ;;  %v3727_v53 = vsel %vm161_vm6, %v3723_v49, 0.0  ;;  %8356 = vmatprep.subr.mxu1 %v8873_v19 }
0x1042   :  { %3728 = vadd.xlane.f32.xlu1 %v3727_v53  ;;  %v3711_v61 = vpop.xlane.xlu0 %3710 }
0x1043   :  { %v3717_v11 = vmul.f32 0.0625, %v3711_v61 }
0x1045   :  { %v3721_v25 = vsub.f32 %v9335_v3, %v3717_v11 }
0x1046   :  { %v3714_v12 = vpop.xlane.xlu0 %3713 }
0x1047   :  { %v3718_v54 = vmul.f32 0.0625, %v3714_v12  ;;  %v3725_v13 = vmul.f32 %v3721_v25, %v3721_v25 }
0x1049   :  { %v3722_v14 = vsub.f32 %v9332_v2, %v3718_v54  ;;  %v3733_v27 = vsel %vm161_vm6, %v3725_v13, 0.0 }
0x104a   :  { %3734 = vadd.xlane.f32.xlu1 %v3733_v27  ;;  %v7746_v27 = vld [vmem:[#allocation2 + $0xb7] ss:$0 sm:$0xff] }
0x104b   :  { %v3726_v15 = vmul.f32 %v3722_v14, %v3722_v14 }
0x104d   :  { %v3736_v58 = vsel %vm161_vm6, %v3726_v15, 0.0 }
0x104e   :  { %3737 = vadd.xlane.f32.xlu0 %v3736_v58 }
0x10ce   :  { %v3732_v23 = vpop.xlane.xlu0 %3731 }
0x10cf   :  { %v3740_v24 = vmul.f32 0.0625, %v3732_v23  ;;  %v3729_v26 = vpop.xlane.xlu1 %3728 }
0x10d0   :  { %v3739_v28 = vmul.f32 0.0625, %v3729_v26 }
0x10d1   :  { %v3744_v51 = vadd.f32 1e-05, %v3740_v24 }
0x10d2   :  { %v3743_v46 = vadd.f32 1e-05, %v3739_v28 }
0x10d3   :  { %8756 = vrsqrt.f32 %v3744_v51 }
0x10d4   :  { %8758 = vrsqrt.f32 %v3743_v46 }
0x10d7   :  { %v3735_v29 = vpop.xlane.xlu1 %3734 }
0x10d8   :  { %v3741_v30 = vmul.f32 0.0625, %v3735_v29 }
0x10da   :  { %v3745_v31 = vadd.f32 1e-05, %v3741_v30 }
0x10db   :  { %v3738_v32 = vpop.xlane.xlu0 %3737 }
0x10dc   :  { %8760 = vrsqrt.f32 %v3745_v31  ;;  %v3742_v33 = vmul.f32 0.0625, %v3738_v32 }
0x10dd   :  { %v8757_v34 = vpop.eup %8756 }
0x10de   :  { %v8759_v36 = vpop.eup %8758  ;;  %v3752_v37 = vmul.f32 %v8757_v34, %v3720_v57  ;;  %v3746_v38 = vadd.f32 1e-05, %v3742_v33  ;;  %v7741_v57 = vld [vmem:[#allocation2 + $0xb6] ss:$0 sm:$0xff] }
0x10df   :  { %v3751_v40 = vmul.f32 %v8759_v36, %v3719_v9 }
0x10e0   :  { %8762 = vrsqrt.f32 %v3746_v38  ;;  %v3760_v44 = vmul.f32 %v7739_v35, %v3752_v37 }
0x10e1   :  { %v3759_v45 = vmul.f32 %v7739_v35, %v3751_v40 }
0x10e2   :  { %v3768_v56 = vadd.f32 %v7740_v41, %v3760_v44 }
0x10e3   :  { %v3767_v48 = vadd.f32 %v7740_v41, %v3759_v45 }
0x10e5   :  { %8326 = vmatprep.mubr.msk.f32.mxu0 %vm161_vm6, %v3767_v48 }
0x10e6   :  { %v8761_v60 = vpop.eup %8760  ;;  %8327 = vmatmul.mubr.msk.f32.vlgmr.msra.gmra.mrb[46].mxu0 %vm161_vm6, %v3768_v56 }
0x10e7   :  { %v3753_v62 = vmul.f32 %v8761_v60, %v3721_v25 }
0x10e9   :  { %v3761_v63 = vmul.f32 %v7739_v35, %v3753_v62 }
0x10ea   :  { %v8763_v0 = vpop.eup %8762 }
0x10eb   :  { %v3769_v1 = vadd.f32 %v7740_v41, %v3761_v63  ;;  %v3754_v4 = vmul.f32 %v8763_v0, %v3722_v14  ;;  %v4063_v63 = vld [vmem:[#allocation2 + $0xb8] sm:$0xff]  ;;  %v4064_v0 = vld [vmem:[#allocation2 + $0xc0] sm:$0xff] }
0x10ed   :  { %8329 = vmatprep.mubr.msk.f32.mxu0 %vm161_vm6, %v3769_v1  ;;  %v3762_v5 = vmul.f32 %v7739_v35, %v3754_v4  ;;  %v8618_v1 = vpack.c.bf16 %v4064_v0, %v4063_v63 }
0x10ef   :  { %v3770_v6 = vadd.f32 %v7740_v41, %v3762_v5  ;;  %8619 = vmatprep.subr.bf16.mxu0 %v8618_v1 }
0x10f0   :  { %8621 = vmatpush3.bf16.msra.mxu0 %v8618_v1 }
0x10f1   :  { %8330 = vmatmul.mubr.msk.f32.gmra.mrb[48].mxu0 %vm161_vm6, %v3770_v6  ;;  %8361 = vmatprep.subr.mxu0 %v8873_v19 }
0x11b9   :  { %v8328_v9 = vpop.f32.mrb[46].mxu0 }
0x11ba   :  { %v3862_v10 = vadd.f32 %v8328_v9, %v7741_v57  ;;  %v3856_v49 = vpop.f32.mrb[47].mxu0 }
0x11bb   :  { %v3857_v59 = vadd.f32 %v7741_v57, %v3856_v49 }
0x11bc   :  { %v3876_v61 = vmax.f32 %v3862_v10, 0.0 }
0x11bd   :  { %v3875_v53 = vmax.f32 %v3857_v59, 0.0 }
0x11bf   :  { %8340 = vmatprep.mubr.msk.f32.mxu1 %vm55_vm0, %v3875_v53 }
0x11c0   :  { %8341 = vmatmul.mubr.msk.f32.vlgmr.msra.gmra.mrb[38].mxu1 %vm55_vm0, %v3876_v61 }
0x11c4   :  { %v8331_v11 = vpop.f32.mrb[48].mxu0 }
0x11c5   :  { %v3872_v25 = vadd.f32 %v8331_v11, %v7741_v57  ;;  %v3866_v12 = vpop.f32.mrb[49].mxu0  ;;  %v7751_v11 = vld [vmem:[#allocation2 + $0x108] ss:$0 sm:$0xff] }
0x11c6   :  { %v3867_v54 = vadd.f32 %v7741_v57, %v3866_v12 }
0x11c7   :  { %v3878_v14 = vmax.f32 %v3872_v25, 0.0 }
0x11c8   :  { %v3877_v13 = vmax.f32 %v3867_v54, 0.0 }
0x11ca   :  { %8343 = vmatprep.mubr.msk.f32.mxu1 %vm55_vm0, %v3877_v13  ;;  %v7752_v13 = vld [vmem:[#allocation2 + $0x109] ss:$0 sm:$0xff] }
0x11cb   :  { %8344 = vmatmul.mubr.msk.f32.gmra.mrb[40].mxu1 %vm55_vm0, %v3878_v14 }
0x11cc   :  { %8358 = vmatprep.mubr.msk.f32.mxu1 %vm8874_vm5, %v8873_v19 }
0x1293   :  { %v8342_v15 = vpop.f32.mrb[38].mxu1 }
0x1294   :  { %v3972_v58 = vadd.f32 %v8342_v15, %v7746_v27  ;;  %v3966_v16 = vpop.f32.mrb[39].mxu1 }
0x1295   :  { %v3967_v17 = vadd.f32 %v7746_v27, %v3966_v16 }
0x1296   :  { %v3986_v18 = vadd.f32 %v3972_v58, %v9322_v50 }
0x1297   :  { %v3985_v20 = vadd.f32 %v3967_v17, %v9325_v52 }
0x1298   :  { %v9363_v21 = vadd.f32 %v3986_v18, %v8956_v43 }
0x1299   :  { %v9366_v22 = vadd.f32 %v3985_v20, %v8950_v39 }
0x129a   :  { %v3998_v23 = vsel %vm161_vm6, %v9363_v21, 0.0 }
0x129b   :  { %3999 = vadd.xlane.f32.xlu0 %v3998_v23  ;;  %v3995_v24 = vsel %vm161_vm6, %v9366_v22, 0.0 }
0x129c   :  { %3996 = vadd.xlane.f32.xlu1 %v3995_v24 }
0x129e   :  { %v8345_v26 = vpop.f32.mrb[40].mxu1 }
0x129f   :  { %v3982_v28 = vadd.f32 %v8345_v26, %v7746_v27  ;;  %v3976_v51 = vpop.f32.mrb[41].mxu1 }
0x12a0   :  { %v3977_v50 = vadd.f32 %v7746_v27, %v3976_v51  ;;  %v7753_v51 = vld [vmem:[#allocation2 + $0x10a] ss:$0 sm:$0xff] }
0x12a1   :  { %v3988_v52 = vadd.f32 %v3982_v28, %v9332_v2 }
0x12a2   :  { %v3987_v43 = vadd.f32 %v3977_v50, %v9335_v3 }
0x12a3   :  { %v9375_v46 = vadd.f32 %v3988_v52, %v8954_v42 }
0x12a4   :  { %v9378_v39 = vadd.f32 %v3987_v43, %v8960_v47 }
0x12a5   :  { %v4004_v29 = vsel %vm161_vm6, %v9375_v46, 0.0 }
0x12a6   :  { %4005 = vadd.xlane.f32.xlu0 %v4004_v29  ;;  %v4001_v30 = vsel %vm161_vm6, %v9378_v39, 0.0 }
0x12a7   :  { %4002 = vadd.xlane.f32.xlu1 %v4001_v30 }
0x1328   :  { %v4000_v31 = vpop.xlane.xlu0 %3999 }
0x1329   :  { %v4008_v32 = vmul.f32 0.0625, %v4000_v31  ;;  %v3997_v33 = vpop.xlane.xlu1 %3996 }
0x132a   :  { %v4007_v2 = vmul.f32 0.0625, %v3997_v33 }
0x132b   :  { %v4012_v3 = vsub.f32 %v9363_v21, %v4008_v32 }
0x132c   :  { %v4011_v42 = vsub.f32 %v9366_v22, %v4007_v2 }
0x132d   :  { %v4016_v34 = vmul.f32 %v4012_v3, %v4012_v3 }
0x132e   :  { %v4015_v35 = vmul.f32 %v4011_v42, %v4011_v42 }
0x132f   :  { %v4022_v47 = vsel %vm161_vm6, %v4016_v34, 0.0 }
0x1330   :  { %4023 = vadd.xlane.f32.xlu0 %v4022_v47  ;;  %v4019_v36 = vsel %vm161_vm6, %v4015_v35, 0.0 }
0x1331   :  { %4020 = vadd.xlane.f32.xlu1 %v4019_v36 }
0x1333   :  { %v4006_v37 = vpop.xlane.xlu0 %4005 }
0x1334   :  { %v4010_v38 = vmul.f32 0.0625, %v4006_v37  ;;  %v4003_v40 = vpop.xlane.xlu1 %4002 }
0x1335   :  { %v4009_v41 = vmul.f32 0.0625, %v4003_v40 }
0x1336   :  { %v4014_v44 = vsub.f32 %v9375_v46, %v4010_v38 }
0x1337   :  { %v4013_v45 = vsub.f32 %v9378_v39, %v4009_v41 }
0x1338   :  { %v4018_v48 = vmul.f32 %v4014_v44, %v4014_v44 }
0x1339   :  { %v4017_v56 = vmul.f32 %v4013_v45, %v4013_v45 }
0x133a   :  { %v4028_v60 = vsel %vm161_vm6, %v4018_v48, 0.0 }
0x133b   :  { %4029 = vadd.xlane.f32.xlu0 %v4028_v60  ;;  %v4025_v62 = vsel %vm161_vm6, %v4017_v56, 0.0 }
0x133c   :  { %4026 = vadd.xlane.f32.xlu1 %v4025_v62 }
0x13bd   :  { %v4024_v4 = vpop.xlane.xlu0 %4023 }
0x13be   :  { %v4032_v5 = vmul.f32 0.0625, %v4024_v4  ;;  %v4021_v6 = vpop.xlane.xlu1 %4020 }
0x13bf   :  { %v4031_v7 = vmul.f32 0.0625, %v4021_v6 }
0x13c0   :  { %v4036_v8 = vadd.f32 1e-05, %v4032_v5 }
0x13c1   :  { %v4035_v55 = vadd.f32 1e-05, %v4031_v7 }
0x13c2   :  { %8764 = vrsqrt.f32 %v4036_v8 }
0x13c3   :  { %8766 = vrsqrt.f32 %v4035_v55 }
0x13c8   :  { %v4030_v57 = vpop.xlane.xlu0 %4029 }
0x13c9   :  { %v4034_v9 = vmul.f32 0.0625, %v4030_v57  ;;  %v4027_v10 = vpop.xlane.xlu1 %4026 }
0x13ca   :  { %v4033_v49 = vmul.f32 0.0625, %v4027_v10 }
0x13cb   :  { %v4038_v59 = vadd.f32 1e-05, %v4034_v9 }
0x13cc   :  { %v8765_v53 = vpop.eup %8764  ;;  %v4037_v61 = vadd.f32 1e-05, %v4033_v49 }
0x13cd   :  { %v8767_v25 = vpop.eup %8766  ;;  %v4044_v12 = vmul.f32 %v8765_v53, %v4012_v3  ;;  %8768 = vrsqrt.f32 %v4038_v59 }
0x13ce   :  { %8770 = vrsqrt.f32 %v4037_v61  ;;  %v4043_v54 = vmul.f32 %v8767_v25, %v4011_v42 }
0x13cf   :  { %v4052_v14 = vmul.f32 %v7751_v11, %v4044_v12 }
0x13d0   :  { %v4051_v27 = vmul.f32 %v7751_v11, %v4043_v54 }
0x13d1   :  { %v4060_v58 = vadd.f32 %v7752_v13, %v4052_v14 }
0x13d2   :  { %v4059_v15 = vadd.f32 %v7752_v13, %v4051_v27 }
0x13d4   :  { %8350 = vmatprep.mubr.msk.f32.mxu0 %vm161_vm6, %v4059_v15 }
0x13d5   :  { %8351 = vmatmul.mubr.msk.f32.vlgmr.msra.gmra.mrb[50].mxu0 %vm161_vm6, %v4060_v58 }
0x13d7   :  { %v8769_v16 = vpop.eup %8768 }
0x13d8   :  { %v8771_v17 = vpop.eup %8770  ;;  %v4046_v18 = vmul.f32 %v8769_v16, %v4014_v44 }
0x13d9   :  { %v4045_v20 = vmul.f32 %v8771_v17, %v4013_v45 }
0x13da   :  { %v4054_v23 = vmul.f32 %v7751_v11, %v4046_v18 }
0x13db   :  { %v4053_v24 = vmul.f32 %v7751_v11, %v4045_v20 }
0x13dc   :  { %v4062_v28 = vadd.f32 %v7752_v13, %v4054_v23 }
0x13dd   :  { %v4061_v26 = vadd.f32 %v7752_v13, %v4053_v24 }
0x13df   :  { %8353 = vmatprep.mubr.msk.f32.mxu0 %vm161_vm6, %v4061_v26 }
0x13e0   :  { %8354 = vmatmul.mubr.msk.f32.gmra.mrb[52].mxu0 %vm161_vm6, %v4062_v28 }
0x13e1   :  { %8363 = vmatprep.mubr.msk.f32.mxu0 %vm8874_vm5, %v8873_v19 }
0x14a8   :  { %v8352_v50 = vpop.f32.mrb[50].mxu0 }
0x14a9   :  { %v9399_v52 = vadd.f32 %v8352_v50, %v7753_v51  ;;  %v4148_v43 = vpop.f32.mrb[51].mxu0 }
0x14aa   :  { %v9403_v29 = vadd.f32 %v7753_v51, %v4148_v43 }
0x14ab   :  { %4250 = vrot.lane.b32.xlu1 %v9399_v52, %s8875_s0  ;;  %v9417_v3 = vmul.f32 0.5, %v9399_v52 }
0x14ac   :  { %v9426_v34 = vmul.f32 0.5, %v9403_v29 }
0x14af   :  { %4172 = vrot.lane.b32.xlu1 %v9403_v29, %s8875_s0 }
0x14b3   :  { %v8355_v30 = vpop.f32.mrb[52].mxu0 }
0x14b4   :  { %v9407_v31 = vadd.f32 %v8355_v30, %v7753_v51  ;;  %v4158_v32 = vpop.f32.mrb[53].mxu0 }
0x14b5   :  { %v9409_v33 = vadd.f32 %v7753_v51, %v4158_v32 }
0x14b6   :  { %4406 = vrot.lane.b32.xlu0 %v9407_v31, %s8875_s0  ;;  %v9436_v36 = vmul.f32 0.5, %v9407_v31 }
0x14b7   :  { %4328 = vrot.lane.b32.xlu1 %v9409_v33, %s8875_s0  ;;  %v9440_v37 = vmul.f32 0.5, %v9409_v33 }
0x151d   :  { %v4251_v2 = vpop.permute.xlu1 %4250 }
0x151e   :  { %8362 = vmatpush3.xpose.msk.msra.mxu0 %vm636_vm7, %v4251_v2 }
0x151f   :  { %8371 = vmatprep.subr.mxu0 %v8873_v19 }
0x1521   :  { %8364 = vmatmul.mubr.msk.f32.vlgmr.msra.gmra.mrb[54].mxu0 %vm636_vm7, %v9417_v3  ;;  %v4173_v42 = vpop.permute.xlu1 %4172 }
0x1522   :  { %8357 = vmatpush3.xpose.msk.msra.mxu1 %vm636_vm7, %v4173_v42  ;;  %8373 = vmatprep.mubr.msk.f32.mxu0 %vm8874_vm5, %v8873_v19 }
0x1523   :  { %8366 = vmatprep.subr.mxu1 %v8873_v19 }
0x1525   :  { %8359 = vmatmul.mubr.msk.f32.vlgmr.msra.gmra.mrb[42].mxu1 %vm636_vm7, %v9426_v34 }
0x1526   :  { %8368 = vmatprep.mubr.msk.f32.mxu1 %vm8874_vm5, %v8873_v19 }
0x1528   :  { %v4407_v35 = vpop.permute.xlu0 %4406 }
0x1529   :  { %8372 = vmatpush3.xpose.msk.msra.mxu0 %vm636_vm7, %v4407_v35  ;;  %v4329_v47 = vpop.permute.xlu1 %4328 }
0x152a   :  { %8367 = vmatpush3.xpose.msk.msra.mxu1 %vm636_vm7, %v4329_v47  ;;  %8381 = vmatprep.subr.mxu0 %v8873_v19 }
0x152b   :  { %8376 = vmatprep.subr.mxu1 %v8873_v19 }
0x152c   :  { %8374 = vmatmul.mubr.msk.f32.vlgmr.msra.gmra.mrb[56].mxu0 %vm636_vm7, %v9436_v36 }
0x152d   :  { %8369 = vmatmul.mubr.msk.f32.vlgmr.msra.gmra.mrb[44].mxu1 %vm636_vm7, %v9440_v37  ;;  %8383 = vmatprep.mubr.msk.f32.mxu0 %vm8874_vm5, %v8873_v19 }
0x152e   :  { %8378 = vmatprep.mubr.msk.f32.mxu1 %vm8874_vm5, %v8873_v19 }
0x15f4   :  { %v4323_v38 = vpop.f32.mrb[54].mxu0 }
0x15f5   :  { %v8365_v40 = vpop.f32.mrb[55].mxu0  ;;  %v4486_v41 = vsel %vm946_vm8, %v4323_v38, -inf }
0x15f6   :  { %4487 = vmax.xlane.f32.xlu0 %v4486_v41 }
0x15f8   :  { %v9452_v44 = vpop.f32.mrb[42].mxu1 }
0x15f9   :  { %v8360_v45 = vpop.f32.mrb[43].mxu1  ;;  %v4483_v54 = vsel %vm946_vm8, %v9452_v44, -inf }
0x15ff   :  { %v4479_v48 = vpop.f32.mrb[56].mxu0 }
0x1600   :  { %v9454_v56 = vpop.f32.mrb[44].mxu1  ;;  %v8375_v60 = vpop.f32.mrb[57].mxu0  ;;  %v4492_v62 = vsel %vm946_vm8, %v4479_v48, -inf }
0x1601   :  { %4493 = vmax.xlane.f32.xlu1 %v4492_v62  ;;  %v8370_v63 = vpop.f32.mrb[45].mxu1  ;;  %v4489_v0 = vsel %vm946_vm8, %v9454_v56, -inf }
0x1612   :  { %4603 = vrot.lane.b32.xlu1 %v9399_v52, %s8876_s30 }
0x1616   :  { %4912 = vrot.lane.b32.xlu1 %v9399_v52, %s8877_s3 }
0x161a   :  { %4910 = vrot.lane.b32.xlu1 %v9417_v3, %s8878_s4 }
0x161e   :  { %5066 = vrot.lane.b32.xlu1 %v9436_v36, %s8878_s4 }
0x1642   :  { %4490 = vmax.xlane.f32.xlu1 %v4489_v0 }
0x1653   :  { %4527 = vrot.lane.b32.xlu1 %v9403_v29, %s8876_s30 }
0x1657   :  { %4834 = vrot.lane.b32.xlu1 %v9403_v29, %s8877_s3 }
0x165b   :  { %4832 = vrot.lane.b32.xlu1 %v9426_v34, %s8878_s4 }
0x165f   :  { %4988 = vrot.lane.b32.xlu1 %v9440_v37, %s8878_s4 }
0x1683   :  { %v4488_v1 = vpop.xlane.xlu0 %4487 }
0x1684   :  { %v4496_v4 = vsub.f32 %v4323_v38, %v4488_v1 }
0x1686   :  { %v4501_v5 = vmul.f32 1.442695, %v4496_v4 }
0x1688   :  { %8772 = vpow2.f32 %v4501_v5 }
0x168e   :  { %v4494_v6 = vpop.xlane.xlu1 %4493 }
0x168f   :  { %v4498_v7 = vsub.f32 %v4479_v48, %v4494_v6 }
0x1691   :  { %v4505_v8 = vmul.f32 1.442695, %v4498_v7 }
0x1692   :  { %v8773_v55 = vpop.eup %8772  ;;  %v4604_v57 = vpop.permute.xlu1 %4603 }
0x1693   :  { %8774 = vpow2.f32 %v4505_v8  ;;  %8382 = vmatpush3.msra.mxu0 %v4604_v57  ;;  %v4510_v9 = vsel %vm946_vm8, %v8773_v55, 0.0 }
0x1694   :  { %4511 = vadd.xlane.f32.xlu0 %v4510_v9  ;;  %8391 = vmatprep.subr.mxu0 %v8873_v19 }
0x1696   :  { %v4913_v59 = vpop.permute.xlu1 %4912 }
0x169a   :  { %v4911_v53 = vpop.permute.xlu1 %4910 }
0x169d   :  { %v8775_v10 = vpop.eup %8774 }
0x169e   :  { %v4516_v49 = vsel %vm946_vm8, %v8775_v10, 0.0  ;;  %v5067_v61 = vpop.permute.xlu1 %5066 }
0x169f   :  { %4517 = vadd.xlane.f32.xlu0 %v4516_v49 }
0x16b5   :  { %4755 = vrot.lane.b32.xlu0 %v9407_v31, %s8876_s30 }
0x16b9   :  { %5068 = vrot.lane.b32.xlu0 %v9407_v31, %s8877_s3 }
0x16cf   :  { %v4491_v11 = vpop.xlane.xlu1 %4490 }
0x16d0   :  { %v4497_v25 = vsub.f32 %v9454_v56, %v4491_v11 }
0x16d2   :  { %v4503_v24 = vmul.f32 1.442695, %v4497_v25 }
0x16d3   :  { %v4528_v12 = vpop.permute.xlu1 %4527 }
0x16d4   :  { %8377 = vmatpush3.msra.mxu1 %v4528_v12 }
0x16d5   :  { %8386 = vmatprep.subr.mxu1 %v8873_v19 }
0x16d7   :  { %v4835_v60 = vpop.permute.xlu1 %4834 }
0x16d8   :  { %4484 = vmax.xlane.f32.xlu0 %v4483_v54 }
0x16db   :  { %v4833_v4 = vpop.permute.xlu1 %4832 }
0x16df   :  { %v4989_v6 = vpop.permute.xlu1 %4988 }
0x1721   :  { %v4512_v13 = vpop.xlane.xlu0 %4511 }
0x1722   :  { %8776 = vrcp.f32 %v4512_v13 }
0x172c   :  { %v8777_v14 = vpop.eup %8776  ;;  %v4518_v27 = vpop.xlane.xlu0 %4517 }
0x172d   :  { %v4524_v15 = vmul.f32 %v8777_v14, %v8773_v55  ;;  %8778 = vrcp.f32 %v4518_v27 }
0x172f   :  { %8384 = vmatmul.mubr.msk.f32.vlgmr.msra.gmra.mrb[58].mxu0 %vm946_vm8, %v4524_v15 }
0x1730   :  { %v4756_v58 = vpop.permute.xlu0 %4755  ;;  %8393 = vmatprep.mubr.msk.f32.mxu0 %vm8874_vm5, %v8873_v19 }
0x1731   :  { %8392 = vmatpush3.msra.mxu0 %v4756_v58 }
0x1732   :  { %8401 = vmatprep.subr.mxu0 %v8873_v19 }
0x1734   :  { %v5069_v18 = vpop.permute.xlu0 %5068 }
0x1737   :  { %v8779_v16 = vpop.eup %8778 }
0x1738   :  { %v4526_v17 = vmul.f32 %v8779_v16, %v8775_v10 }
0x173a   :  { %8394 = vmatmul.mubr.msk.f32.vlgmr.msra.gmra.mrb[60].mxu0 %vm946_vm8, %v4526_v17 }
0x173b   :  { %8402 = vmatpush3.xpose.msk.msra.mxu0 %vm636_vm7, %v4913_v59  ;;  %8403 = vmatprep.mubr.msk.f32.mxu0 %vm8874_vm5, %v8873_v19 }
0x173c   :  { %8411 = vmatprep.subr.mxu0 %v8873_v19 }
0x173e   :  { %8404 = vmatmul.mubr.msk.f32.vlgmr.msra.gmra.mrb[62].mxu0 %vm636_vm7, %v4911_v53 }
0x173f   :  { %8412 = vmatpush3.xpose.msk.msra.mxu0 %vm636_vm7, %v5069_v18  ;;  %8413 = vmatprep.mubr.msk.f32.mxu0 %vm8874_vm5, %v8873_v19 }
0x1740   :  { %8421 = vmatprep.subr.mxu0 %v8873_v19 }
0x1742   :  { %8414 = vmatmul.mubr.msk.f32.vlgmr.msra.gmra.mrb[64].mxu0 %vm636_vm7, %v5067_v61 }
0x1743   :  { %8423 = vmatprep.mubr.msk.f32.mxu0 %vm8874_vm5, %v8873_v19 }
0x1765   :  { %v4485_v20 = vpop.xlane.xlu0 %4484 }
0x1766   :  { %v4495_v23 = vsub.f32 %v9452_v44, %v4485_v20 }
0x1768   :  { %v4499_v26 = vmul.f32 1.442695, %v4495_v23 }
0x176a   :  { %8780 = vpow2.f32 %v4499_v26 }
0x176b   :  { %8782 = vpow2.f32 %v4503_v24 }
0x1774   :  { %v8781_v28 = vpop.eup %8780 }
0x1775   :  { %v4507_v51 = vsel %vm946_vm8, %v8781_v28, 0.0  ;;  %v8783_v50 = vpop.eup %8782 }
0x1776   :  { %4508 = vadd.xlane.f32.xlu0 %v4507_v51  ;;  %v4513_v43 = vsel %vm946_vm8, %v8783_v50, 0.0 }
0x177a   :  { %4514 = vadd.xlane.f32.xlu0 %v4513_v43 }
0x1790   :  { %4679 = vrot.lane.b32.xlu0 %v9409_v33, %s8876_s30 }
0x1794   :  { %4990 = vrot.lane.b32.xlu0 %v9409_v33, %s8877_s3 }
0x1802   :  { %v9510_v30 = vpop.f32.mrb[58].mxu0 }
0x1803   :  { %v4509_v32 = vpop.xlane.xlu0 %4508  ;;  %v8385_v2 = vpop.f32.mrb[59].mxu0 }
0x1804   :  { %8784 = vrcp.f32 %v4509_v32 }
0x1807   :  { %v4515_v42 = vpop.xlane.xlu0 %4514 }
0x1808   :  { %8786 = vrcp.f32 %v4515_v42 }
0x180b   :  { %v4680_v41 = vpop.permute.xlu0 %4679 }
0x180d   :  { %v9512_v35 = vpop.f32.mrb[60].mxu0 }
0x180e   :  { %v8785_v47 = vpop.eup %8784  ;;  %v8395_v38 = vpop.f32.mrb[61].mxu0 }
0x180f   :  { %v4523_v40 = vmul.f32 %v8785_v47, %v8781_v28  ;;  %v4991_v5 = vpop.permute.xlu0 %4990 }
0x1811   :  { %8379 = vmatmul.mubr.msk.f32.vlgmr.msra.gmra.mrb[46].mxu1 %vm946_vm8, %v4523_v40  ;;  %v4984_v44 = vpop.f32.mrb[62].mxu0 }
0x1812   :  { %v8787_v45 = vpop.eup %8786  ;;  %8387 = vmatpush3.msra.mxu1 %v4680_v41  ;;  %v8405_v48 = vpop.f32.mrb[63].mxu0  ;;  %v5147_v56 = vsel %vm946_vm8, %v4984_v44, -inf  ;;  %8388 = vmatprep.mubr.msk.f32.mxu1 %vm8874_vm5, %v8873_v19 }
0x1813   :  { %v4525_v62 = vmul.f32 %v8787_v45, %v8783_v50  ;;  %5148 = vmax.xlane.f32.xlu0 %v5147_v56  ;;  %8396 = vmatprep.subr.mxu1 %v8873_v19 }
0x1815   :  { %8389 = vmatmul.mubr.msk.f32.vlgmr.msra.gmra.mrb[48].mxu1 %vm946_vm8, %v4525_v62  ;;  %v5140_v63 = vpop.f32.mrb[64].mxu0 }
0x1816   :  { %v8415_v0 = vpop.f32.mrb[65].mxu0  ;;  %v5153_v1 = vsel %vm946_vm8, %v5140_v63, -inf  ;;  %8398 = vmatprep.mubr.msk.f32.mxu1 %vm8874_vm5, %v8873_v19 }
0x1817   :  { %5154 = vmax.xlane.f32.xlu1 %v5153_v1 }
0x1819   :  { %8397 = vmatpush3.xpose.msk.msra.mxu1 %vm636_vm7, %v4835_v60 }
0x181a   :  { %8406 = vmatprep.subr.mxu1 %v8873_v19 }
0x181c   :  { %8399 = vmatmul.mubr.msk.f32.vlgmr.msra.gmra.mrb[50].mxu1 %vm636_vm7, %v4833_v4 }
0x181d   :  { %8407 = vmatpush3.xpose.msk.msra.mxu1 %vm636_vm7, %v4991_v5  ;;  %8408 = vmatprep.mubr.msk.f32.mxu1 %vm8874_vm5, %v8873_v19 }
0x181e   :  { %8416 = vmatprep.subr.mxu1 %v8873_v19 }
0x1820   :  { %8409 = vmatmul.mubr.msk.f32.vlgmr.msra.gmra.mrb[52].mxu1 %vm636_vm7, %v4989_v6 }
0x1821   :  { %8418 = vmatprep.mubr.msk.f32.mxu1 %vm8874_vm5, %v8873_v19 }
0x1828   :  { %5264 = vrot.lane.b32.xlu1 %v9399_v52, %s8879_s5 }
0x182c   :  { %5695 = vrot.lane.b32.xlu1 %v9403_v29, %s8880_s6 }
0x1830   :  { %5693 = vrot.lane.b32.xlu1 %v9426_v34, %s8881_s7 }
0x1834   :  { %5771 = vrot.lane.b32.xlu1 %v9417_v3, %s8881_s7 }
0x1838   :  { %5849 = vrot.lane.b32.xlu1 %v9440_v37, %s8881_s7 }
0x183c   :  { %5927 = vrot.lane.b32.xlu1 %v9436_v36, %s8881_s7 }
0x18a0   :  { %v5149_v7 = vpop.xlane.xlu0 %5148 }
0x18a1   :  { %v5157_v8 = vsub.f32 %v4984_v44, %v5149_v7 }
0x18a3   :  { %v5162_v55 = vmul.f32 1.442695, %v5157_v8 }
0x18a4   :  { %v5155_v57 = vpop.xlane.xlu1 %5154 }
0x18a5   :  { %8788 = vpow2.f32 %v5162_v55  ;;  %v5159_v9 = vsub.f32 %v5140_v63, %v5155_v57 }
0x18a7   :  { %v5166_v10 = vmul.f32 1.442695, %v5159_v9 }
0x18a8   :  { %v5265_v49 = vpop.permute.xlu1 %5264 }
0x18a9   :  { %8790 = vpow2.f32 %v5166_v10  ;;  %8422 = vmatpush3.msra.mxu0 %v5265_v49 }
0x18aa   :  { %8431 = vmatprep.subr.mxu0 %v8873_v19 }
0x18ac   :  { %v5696_v24 = vpop.permute.xlu1 %5695 }
0x18af   :  { %v8789_v59 = vpop.eup %8788 }
0x18b0   :  { %v5171_v53 = vsel %vm946_vm8, %v8789_v59, 0.0  ;;  %v5694_v43 = vpop.permute.xlu1 %5693 }
0x18b1   :  { %5172 = vadd.xlane.f32.xlu0 %v5171_v53 }
0x18b3   :  { %v8791_v61 = vpop.eup %8790 }
0x18b4   :  { %v5177_v11 = vsel %vm946_vm8, %v8791_v61, 0.0  ;;  %v5772_v2 = vpop.permute.xlu1 %5771 }
0x18b5   :  { %5178 = vadd.xlane.f32.xlu0 %v5177_v11 }
0x18b8   :  { %v5850_v47 = vpop.permute.xlu1 %5849 }
0x18bc   :  { %v5928_v40 = vpop.permute.xlu1 %5927 }
0x18cb   :  { %5416 = vrot.lane.b32.xlu0 %v9407_v31, %s8879_s5 }
0x18cf   :  { %5773 = vrot.lane.b32.xlu0 %v9399_v52, %s8880_s6 }
0x18d3   :  { %5851 = vrot.lane.b32.xlu0 %v9409_v33, %s8880_s6 }
0x18d7   :  { %5929 = vrot.lane.b32.xlu0 %v9407_v31, %s8880_s6 }
0x18e4   :  { %v9556_v25 = vpop.f32.mrb[46].mxu1 }
0x18e5   :  { %v8380_v12 = vpop.f32.mrb[47].mxu1 }
0x18e8   :  { %v9558_v54 = vpop.f32.mrb[48].mxu1 }
0x18e9   :  { %v8390_v13 = vpop.f32.mrb[49].mxu1 }
0x18ef   :  { %v4906_v14 = vpop.f32.mrb[50].mxu1 }
0x18f0   :  { %v8400_v27 = vpop.f32.mrb[51].mxu1  ;;  %v5144_v17 = vsel %vm946_vm8, %v4906_v14, -inf }
0x18f3   :  { %v5062_v15 = vpop.f32.mrb[52].mxu1 }
0x18f4   :  { %v8410_v58 = vpop.f32.mrb[53].mxu1  ;;  %v5150_v16 = vsel %vm946_vm8, %v5062_v15, -inf }
0x18f5   :  { %5151 = vmax.xlane.f32.xlu1 %v5150_v16 }
0x18f6   :  { %5145 = vmax.xlane.f32.xlu0 %v5144_v17 }
0x1906   :  { %5188 = vrot.lane.b32.xlu1 %v9403_v29, %s8879_s5 }
0x193e   :  { %v5173_v18 = vpop.xlane.xlu0 %5172 }
0x193f   :  { %8792 = vrcp.f32 %v5173_v18 }
0x1942   :  { %v5179_v20 = vpop.xlane.xlu0 %5178 }
0x1943   :  { %8794 = vrcp.f32 %v5179_v20 }
0x1946   :  { %v5417_v28 = vpop.permute.xlu0 %5416 }
0x1949   :  { %v8793_v23 = vpop.eup %8792 }
0x194a   :  { %v5185_v26 = vmul.f32 %v8793_v23, %v8789_v59  ;;  %v5774_v32 = vpop.permute.xlu0 %5773  ;;  %v5492_v23 = vld [vmem:[#allocation2 + $0xcc] sm:$0xf] }
0x194c   :  { %8424 = vmatmul.mubr.msk.f32.vlgmr.msra.gmra.mrb[66].mxu0 %vm946_vm8, %v5185_v26 }
0x194d   :  { %v8795_v51 = vpop.eup %8794  ;;  %8432 = vmatpush3.msra.mxu0 %v5417_v28  ;;  %8433 = vmatprep.mubr.msk.f32.mxu0 %vm8874_vm5, %v8873_v19 }
0x194e   :  { %v5187_v50 = vmul.f32 %v8795_v51, %v8791_v61  ;;  %8452 = vmatprep.subr.mxu0 %v8873_v19  ;;  %v5852_v42 = vpop.permute.xlu0 %5851 }
0x1950   :  { %8434 = vmatmul.mubr.msk.f32.vlgmr.msra.gmra.mrb[68].mxu0 %vm946_vm8, %v5187_v50 }
0x1951   :  { %8454 = vmatprep.mubr.msk.f32.mxu0 %vm8874_vm5, %v8873_v19 }
0x1952   :  { %v5930_v38 = vpop.permute.xlu0 %5929 }
0x1954   :  { %8453 = vmatpush3.xpose.msk.msra.mxu0 %vm636_vm7, %v5696_v24  ;;  %v4831_v24 = vld [vmem:[#allocation2 + $0xc8] sm:$0xf] }
0x1955   :  { %8457 = vmatprep.subr.mxu0 %v8873_v19 }
0x1957   :  { %8455 = vmatmul.mubr.msk.f32.vlgmr.msra.gmra.mrb[70].mxu0 %vm636_vm7, %v5694_v43 }
0x1958   :  { %8458 = vmatpush3.xpose.msk.msra.mxu0 %vm636_vm7, %v5774_v32  ;;  %8459 = vmatprep.mubr.msk.f32.mxu0 %vm8874_vm5, %v8873_v19 }
0x1959   :  { %8462 = vmatprep.subr.mxu0 %v8873_v19 }
0x195b   :  { %8460 = vmatmul.mubr.msk.f32.vlgmr.msra.gmra.mrb[72].mxu0 %vm636_vm7, %v5772_v2 }
0x195c   :  { %8463 = vmatpush3.xpose.msk.msra.mxu0 %vm636_vm7, %v5852_v42  ;;  %8464 = vmatprep.mubr.msk.f32.mxu0 %vm8874_vm5, %v8873_v19 }
0x195d   :  { %8467 = vmatprep.subr.mxu0 %v8873_v19 }
0x195f   :  { %8465 = vmatmul.mubr.msk.f32.vlgmr.msra.gmra.mrb[74].mxu0 %vm636_vm7, %v5850_v47 }
0x1960   :  { %8468 = vmatpush3.xpose.msk.msra.mxu0 %vm636_vm7, %v5930_v38  ;;  %8469 = vmatprep.mubr.msk.f32.mxu0 %vm8874_vm5, %v8873_v19 }
0x1961   :  { %8477 = vmatprep.subr.mxu0 %v8873_v19 }
0x1963   :  { %8470 = vmatmul.mubr.msk.f32.vlgmr.msra.gmra.mrb[76].mxu0 %vm636_vm7, %v5928_v40 }
0x1964   :  { %8479 = vmatprep.mubr.msk.f32.mxu0 %vm8874_vm5, %v8873_v19 }
0x1982   :  { %v5152_v41 = vpop.xlane.xlu1 %5151 }
0x1983   :  { %v5158_v44 = vsub.f32 %v5062_v15, %v5152_v41  ;;  %v5146_v45 = vpop.xlane.xlu0 %5145 }
0x1984   :  { %v5156_v48 = vsub.f32 %v4906_v14, %v5146_v45 }
0x1985   :  { %v5164_v56 = vmul.f32 1.442695, %v5158_v44 }
0x1986   :  { %v5160_v60 = vmul.f32 1.442695, %v5156_v48  ;;  %v5189_v62 = vpop.permute.xlu1 %5188 }
0x1987   :  { %8417 = vmatpush3.msra.mxu1 %v5189_v62 }
0x1988   :  { %8796 = vpow2.f32 %v5160_v60  ;;  %8426 = vmatprep.subr.mxu1 %v8873_v19 }
0x1989   :  { %8798 = vpow2.f32 %v5164_v56 }
0x1992   :  { %v8797_v63 = vpop.eup %8796 }
0x1993   :  { %v5168_v0 = vsel %vm946_vm8, %v8797_v63, 0.0  ;;  %v8799_v1 = vpop.eup %8798 }
0x1994   :  { %5169 = vadd.xlane.f32.xlu0 %v5168_v0  ;;  %v5174_v4 = vsel %vm946_vm8, %v8799_v1, 0.0 }
0x1998   :  { %5175 = vadd.xlane.f32.xlu0 %v5174_v4 }
0x19ae   :  { %5340 = vrot.lane.b32.xlu0 %v9409_v33, %s8879_s5 }
0x1a1f   :  { %v9596_v5 = vpop.f32.mrb[66].mxu0 }
0x1a20   :  { %v8425_v6 = vpop.f32.mrb[67].mxu0 }
0x1a21   :  { %v5170_v7 = vpop.xlane.xlu0 %5169 }
0x1a22   :  { %8800 = vrcp.f32 %v5170_v7 }
0x1a23   :  { %v9598_v8 = vpop.f32.mrb[68].mxu0 }
0x1a24   :  { %v8435_v55 = vpop.f32.mrb[69].mxu0 }
0x1a25   :  { %v5176_v57 = vpop.xlane.xlu0 %5175 }
0x1a26   :  { %8802 = vrcp.f32 %v5176_v57 }
0x1a29   :  { %v5341_v11 = vpop.permute.xlu0 %5340 }
0x1a2a   :  { %v5767_v9 = vpop.f32.mrb[70].mxu0 }
0x1a2b   :  { %v8456_v10 = vpop.f32.mrb[71].mxu0  ;;  %v6005_v49 = vsel %vm946_vm8, %v5767_v9, -inf }
0x1a2c   :  { %v8801_v59 = vpop.eup %8800  ;;  %6006 = vmax.xlane.f32.xlu1 %v6005_v49 }
0x1a2d   :  { %v5184_v53 = vmul.f32 %v8801_v59, %v8797_v63 }
0x1a2e   :  { %v5845_v61 = vpop.f32.mrb[72].mxu0 }
0x1a2f   :  { %v8461_v12 = vpop.f32.mrb[73].mxu0  ;;  %v6008_v13 = vsel %vm946_vm8, %v5845_v61, -inf  ;;  %8419 = vmatmul.mubr.msk.f32.vlgmr.msra.gmra.mrb[54].mxu1 %vm946_vm8, %v5184_v53 }
0x1a30   :  { %v8803_v14 = vpop.eup %8802  ;;  %6009 = vmax.xlane.f32.xlu0 %v6008_v13  ;;  %8427 = vmatpush3.msra.mxu1 %v5341_v11 }
0x1a31   :  { %v5186_v27 = vmul.f32 %v8803_v14, %v8799_v1  ;;  %8428 = vmatprep.mubr.msk.f32.mxu1 %vm8874_vm5, %v8873_v19  ;;  %8436 = vmatprep.subr.msk.mxu1 %vm1969_vm9, %v5492_v23 }
0x1a32   :  { %v5923_v15 = vpop.f32.mrb[74].mxu0 }
0x1a33   :  { %v8466_v58 = vpop.f32.mrb[75].mxu0  ;;  %v6011_v16 = vsel %vm946_vm8, %v5923_v15, -inf  ;;  %8429 = vmatmul.mubr.msk.f32.vlgmr.msra.gmra.mrb[56].mxu1 %vm946_vm8, %v5186_v27 }
0x1a34   :  { %6012 = vmax.xlane.f32.xlu1 %v6011_v16  ;;  %8437 = vmatpush3.msk.msra.mxu1 %vm1969_vm9, %v5492_v23 }
0x1a35   :  { %8444 = vmatprep.subr.msk.mxu1 %vm1969_vm9, %v4831_v24 }
0x1a36   :  { %v6001_v17 = vpop.f32.mrb[76].mxu0 }
0x1a37   :  { %v8471_v18 = vpop.f32.mrb[77].mxu0  ;;  %v6014_v20 = vsel %vm946_vm8, %v6001_v17, -inf }
0x1a38   :  { %6015 = vmax.xlane.f32.xlu0 %v6014_v20 }
0x1a45   :  { %6049 = vrot.lane.b32.xlu1 %v9403_v29, %s8882_s8 }
0x1ab9   :  { %v6007_v26 = vpop.xlane.xlu1 %6006 }
0x1aba   :  { %v6017_v28 = vsub.f32 %v5767_v9, %v6007_v26 }
0x1abc   :  { %v6021_v51 = vmul.f32 1.442695, %v6017_v28 }
0x1abd   :  { %v6010_v50 = vpop.xlane.xlu0 %6009 }
0x1abe   :  { %8804 = vpow2.f32 %v6021_v51  ;;  %v6018_v43 = vsub.f32 %v5845_v61, %v6010_v50 }
0x1ac0   :  { %v6023_v32 = vmul.f32 1.442695, %v6018_v43 }
0x1ac1   :  { %v6013_v2 = vpop.xlane.xlu1 %6012 }
0x1ac2   :  { %8806 = vpow2.f32 %v6023_v32  ;;  %v6019_v42 = vsub.f32 %v5923_v15, %v6013_v2 }
0x1ac4   :  { %v6025_v47 = vmul.f32 1.442695, %v6019_v42 }
0x1ac5   :  { %v6016_v38 = vpop.xlane.xlu0 %6015 }
0x1ac6   :  { %8808 = vpow2.f32 %v6025_v47  ;;  %v6020_v40 = vsub.f32 %v6001_v17, %v6016_v38 }
0x1ac8   :  { %v8805_v41 = vpop.eup %8804  ;;  %v6027_v44 = vmul.f32 1.442695, %v6020_v40 }
0x1ac9   :  { %v6029_v45 = vsel %vm946_vm8, %v8805_v41, 0.0 }
0x1aca   :  { %8810 = vpow2.f32 %v6027_v44  ;;  %6030 = vadd.xlane.f32.xlu1 %v6029_v45 }
0x1acc   :  { %v8807_v48 = vpop.eup %8806 }
0x1acd   :  { %v6032_v56 = vsel %vm946_vm8, %v8807_v48, 0.0 }
0x1ace   :  { %6033 = vadd.xlane.f32.xlu0 %v6032_v56 }
0x1ad0   :  { %v8809_v60 = vpop.eup %8808 }
0x1ad1   :  { %v6035_v62 = vsel %vm946_vm8, %v8809_v60, 0.0 }
0x1ad2   :  { %6036 = vadd.xlane.f32.xlu1 %v6035_v62 }
0x1ad4   :  { %v9616_v63 = vpop.eup %8810 }
0x1ad5   :  { %v6038_v0 = vsel %vm946_vm8, %v9616_v63, 0.0 }
0x1ad6   :  { %6039 = vadd.xlane.f32.xlu0 %v6038_v0 }
0x1ae3   :  { %6201 = vrot.lane.b32.xlu1 %v9409_v33, %s8882_s8 }
0x1ae7   :  { %6277 = vrot.lane.b32.xlu1 %v9407_v31, %s8882_s8 }
0x1aeb   :  { %6458 = vrot.lane.b32.xlu1 %v9426_v34, %s8883_s9 }
0x1aec   :  { %6125 = vrot.lane.b32.xlu0 %v9399_v52, %s8882_s8 }
0x1aef   :  { %6536 = vrot.lane.b32.xlu1 %v9417_v3, %s8883_s9 }
0x1af0   :  { %6460 = vrot.lane.b32.xlu0 %v9403_v29, %s8884_s10 }
0x1af3   :  { %6694 = vrot.lane.b32.xlu1 %v9407_v31, %s8884_s10 }
0x1af4   :  { %6538 = vrot.lane.b32.xlu0 %v9399_v52, %s8884_s10 }
0x1af7   :  { %6692 = vrot.lane.b32.xlu1 %v9436_v36, %s8883_s9  ;;  %v6050_v36 = vpop.permute.xlu1 %6049 }
0x1af8   :  { %6616 = vrot.lane.b32.xlu0 %v9409_v33, %s8884_s10 }
0x1afc   :  { %6614 = vrot.lane.b32.xlu0 %v9440_v37, %s8883_s9 }
0x1b02   :  { %v5260_v34 = vpop.f32.mrb[54].mxu1 }
0x1b03   :  { %v8420_v3 = vpop.f32.mrb[55].mxu1  ;;  %8438 = vmatprep.mubr.msk.f32.mxu1 %vm636_vm7, %v5260_v34 }
0x1b04   :  { %8439 = vmatmul.mubr.msk.f32.vlgmr.msra.gmra.mrb[58].mxu1 %vm636_vm7, %v9596_v5 }
0x1b05   :  { %8445 = vmatpush3.msk.msra.mxu1 %vm1969_vm9, %v4831_v24 }
0x1b06   :  { %v5412_v1 = vpop.f32.mrb[56].mxu1  ;;  %8472 = vmatprep.subr.mxu1 %v8873_v19 }
0x1b07   :  { %v8430_v4 = vpop.f32.mrb[57].mxu1  ;;  %8441 = vmatprep.mubr.msk.f32.mxu1 %vm636_vm7, %v5412_v1 }
0x1b08   :  { %8442 = vmatmul.mubr.msk.f32.gmra.mrb[60].mxu1 %vm636_vm7, %v9598_v8 }
0x1b09   :  { %8446 = vmatprep.mubr.msk.f32.mxu1 %vm636_vm7, %v9556_v25 }
0x1b0c   :  { %8447 = vmatmul.mubr.msk.f32.vlgmr.msra.gmra.mrb[58].mxu1 %vm636_vm7, %v9510_v30 }
0x1b0d   :  { %8473 = vmatpush3.msra.mxu1 %v6050_v36  ;;  %8449 = vmatprep.mubr.msk.f32.mxu1 %vm636_vm7, %v9558_v54  ;;  %v6353_v54 = vld [vmem:[#allocation2 + $0xd0] sm:$0xf] }
0x1b0e   :  { %8482 = vmatprep.subr.mxu1 %v8873_v19 }
0x1b10   :  { %8450 = vmatmul.mubr.msk.f32.gmra.mrb[60].mxu1 %vm636_vm7, %v9512_v35 }
0x1b11   :  { %8474 = vmatprep.mubr.msk.f32.mxu1 %vm8874_vm5, %v8873_v19 }
0x1b57   :  { %v6031_v37 = vpop.xlane.xlu1 %6030 }
0x1b58   :  { %8812 = vrcp.f32 %v6031_v37 }
0x1b5b   :  { %v6034_v5 = vpop.xlane.xlu0 %6033 }
0x1b5c   :  { %8814 = vrcp.f32 %v6034_v5 }
0x1b5f   :  { %v6037_v25 = vpop.xlane.xlu1 %6036 }
0x1b60   :  { %8816 = vrcp.f32 %v6037_v25 }
0x1b62   :  { %v8813_v6 = vpop.eup %8812 }
0x1b63   :  { %v6045_v30 = vmul.f32 %v8813_v6, %v8805_v41  ;;  %v6040_v7 = vpop.xlane.xlu0 %6039  ;;  %v6202_v8 = vpop.permute.xlu1 %6201 }
0x1b64   :  { %8818 = vrcp.f32 %v6040_v7 }
0x1b65   :  { %8475 = vmatmul.mubr.msk.f32.vlgmr.msra.gmra.mrb[62].mxu1 %vm946_vm8, %v6045_v30 }
0x1b66   :  { %v8815_v55 = vpop.eup %8814  ;;  %8483 = vmatpush3.msra.mxu1 %v6202_v8  ;;  %8484 = vmatprep.mubr.msk.f32.mxu1 %vm8874_vm5, %v8873_v19 }
0x1b67   :  { %v6046_v35 = vmul.f32 %v8815_v55, %v8807_v48  ;;  %v6126_v57 = vpop.permute.xlu0 %6125  ;;  %v6278_v9 = vpop.permute.xlu1 %6277  ;;  %8492 = vmatprep.subr.msk.mxu1 %vm1969_vm9, %v6353_v54 }
0x1b68   :  { %8478 = vmatpush3.msra.mxu0 %v6126_v57 }
0x1b69   :  { %8480 = vmatmul.mubr.msk.f32.vlgmr.msra.gmra.mrb[78].mxu0 %vm946_vm8, %v6046_v35  ;;  %8487 = vmatprep.subr.mxu0 %v8873_v19 }
0x1b6a   :  { %v8817_v10 = vpop.eup %8816  ;;  %8488 = vmatpush3.msra.mxu0 %v6278_v9  ;;  %8489 = vmatprep.mubr.msk.f32.mxu0 %vm8874_vm5, %v8873_v19 }
0x1b6b   :  { %v6047_v49 = vmul.f32 %v8817_v10, %v8809_v60  ;;  %v6459_v59 = vpop.permute.xlu1 %6458  ;;  %8500 = vmatprep.subr.mxu0 %v8873_v19  ;;  %v6461_v11 = vpop.permute.xlu0 %6460  ;;  %v7118_v10 = vld [vmem:[#allocation2 + $0xd4] sm:$0xf] }
0x1b6d   :  { %8485 = vmatmul.mubr.msk.f32.vlgmr.msra.gmra.mrb[64].mxu1 %vm946_vm8, %v6047_v49 }
0x1b6e   :  { %v8819_v53 = vpop.eup %8818  ;;  %8493 = vmatpush3.msk.msra.mxu1 %vm1969_vm9, %v6353_v54 }
0x1b6f   :  { %v6048_v61 = vmul.f32 %v8819_v53, %v9616_v63  ;;  %8510 = vmatprep.subr.mxu1 %v8873_v19  ;;  %v6537_v12 = vpop.permute.xlu1 %6536  ;;  %v6539_v13 = vpop.permute.xlu0 %6538 }
0x1b71   :  { %8490 = vmatmul.mubr.msk.f32.vlgmr.msra.gmra.mrb[80].mxu0 %vm946_vm8, %v6048_v61 }
0x1b72   :  { %8501 = vmatpush3.xpose.msk.msra.mxu0 %vm636_vm7, %v6461_v11  ;;  %8502 = vmatprep.mubr.msk.f32.mxu0 %vm8874_vm5, %v8873_v19 }
0x1b73   :  { %8505 = vmatprep.subr.mxu0 %v8873_v19  ;;  %v6695_v14 = vpop.permute.xlu1 %6694  ;;  %v6617_v17 = vpop.permute.xlu0 %6616 }
0x1b75   :  { %8503 = vmatmul.mubr.msk.f32.vlgmr.msra.gmra.mrb[82].mxu0 %vm636_vm7, %v6459_v59 }
0x1b76   :  { %8506 = vmatpush3.xpose.msk.msra.mxu0 %vm636_vm7, %v6539_v13  ;;  %8507 = vmatprep.mubr.msk.f32.mxu0 %vm8874_vm5, %v8873_v19 }
0x1b77   :  { %8515 = vmatprep.subr.mxu0 %v8873_v19  ;;  %v6693_v27 = vpop.permute.xlu1 %6692  ;;  %v6615_v28 = vpop.permute.xlu0 %6614 }
0x1b79   :  { %8508 = vmatmul.mubr.msk.f32.vlgmr.msra.gmra.mrb[84].mxu0 %vm636_vm7, %v6537_v12 }
0x1b7a   :  { %8516 = vmatpush3.xpose.msk.msra.mxu0 %vm636_vm7, %v6695_v14  ;;  %8517 = vmatprep.mubr.msk.f32.mxu0 %vm8874_vm5, %v8873_v19 }
0x1b7b   :  { %8525 = vmatprep.subr.mxu0 %v8873_v19 }
0x1b7d   :  { %8518 = vmatmul.mubr.msk.f32.vlgmr.msra.gmra.mrb[86].mxu0 %vm636_vm7, %v6693_v27 }
0x1b7e   :  { %8527 = vmatprep.mubr.msk.f32.mxu0 %vm8874_vm5, %v8873_v19 }
0x1c38   :  { %v6121_v15 = vpop.f32.mrb[62].mxu1 }
0x1c39   :  { %v8476_v58 = vpop.f32.mrb[63].mxu1  ;;  %8494 = vmatprep.mubr.msk.f32.mxu1 %vm636_vm7, %v6121_v15 }
0x1c3c   :  { %v6197_v16 = vpop.f32.mrb[78].mxu0 }
0x1c3d   :  { %v8481_v18 = vpop.f32.mrb[79].mxu0  ;;  %8495 = vmatmul.mubr.msk.f32.vlgmr.msra.gmra.mrb[58].mxu1 %vm636_vm7, %v6197_v16 }
0x1c3e   :  { %8511 = vmatpush3.xpose.msk.msra.mxu1 %vm636_vm7, %v6617_v17 }
0x1c3f   :  { %8520 = vmatprep.subr.mxu1 %v8873_v19 }
0x1c40   :  { %v6273_v20 = vpop.f32.mrb[64].mxu1 }
0x1c41   :  { %v8486_v23 = vpop.f32.mrb[65].mxu1  ;;  %8497 = vmatprep.mubr.msk.f32.mxu1 %vm636_vm7, %v6273_v20 }
0x1c44   :  { %v6349_v24 = vpop.f32.mrb[80].mxu0 }
0x1c45   :  { %v8491_v26 = vpop.f32.mrb[81].mxu0  ;;  %8498 = vmatmul.mubr.msk.f32.gmra.mrb[60].mxu1 %vm636_vm7, %v6349_v24  ;;  %v7826_v24 = vld [vmem:[#allocation2 + $0x10b] ss:$0 sm:$0xff] }
0x1c46   :  { %8512 = vmatprep.mubr.msk.f32.mxu1 %vm8874_vm5, %v8873_v19 }
0x1c48   :  { %v6532_v51 = vpop.f32.mrb[82].mxu0 }
0x1c49   :  { %v8504_v50 = vpop.f32.mrb[83].mxu0  ;;  %8513 = vmatmul.mubr.msk.f32.vlgmr.msra.gmra.mrb[66].mxu1 %vm636_vm7, %v6615_v28  ;;  %v6770_v43 = vsel %vm946_vm8, %v6532_v51, -inf }
0x1c4a   :  { %6771 = vmax.xlane.f32.xlu0 %v6770_v43  ;;  %8522 = vmatprep.mubr.msk.f32.mxu1 %vm8874_vm5, %v8873_v19 }
0x1c4c   :  { %v6610_v32 = vpop.f32.mrb[84].mxu0 }
0x1c4d   :  { %v8509_v2 = vpop.f32.mrb[85].mxu0  ;;  %v6773_v42 = vsel %vm946_vm8, %v6610_v32, -inf }
0x1c4e   :  { %6774 = vmax.xlane.f32.xlu1 %v6773_v42 }
0x1c50   :  { %v6766_v47 = vpop.f32.mrb[86].mxu0 }
0x1c51   :  { %v8519_v38 = vpop.f32.mrb[87].mxu0  ;;  %v6779_v3 = vsel %vm946_vm8, %v6766_v47, -inf }
0x1cd7   :  { %v6772_v40 = vpop.xlane.xlu0 %6771 }
0x1cd8   :  { %v6782_v41 = vsub.f32 %v6532_v51, %v6772_v40 }
0x1cda   :  { %v6786_v44 = vmul.f32 1.442695, %v6782_v41 }
0x1cdb   :  { %v6775_v56 = vpop.xlane.xlu1 %6774 }
0x1cdc   :  { %8820 = vpow2.f32 %v6786_v44  ;;  %v6783_v60 = vsub.f32 %v6610_v32, %v6775_v56 }
0x1cde   :  { %v6788_v62 = vmul.f32 1.442695, %v6783_v60 }
0x1ce0   :  { %8822 = vpow2.f32 %v6788_v62 }
0x1ce6   :  { %v8821_v45 = vpop.eup %8820 }
0x1ce7   :  { %v6794_v48 = vsel %vm946_vm8, %v8821_v45, 0.0 }
0x1ce8   :  { %6795 = vadd.xlane.f32.xlu1 %v6794_v48 }
0x1cea   :  { %v8823_v1 = vpop.eup %8822 }
0x1ceb   :  { %v6797_v4 = vsel %vm946_vm8, %v8823_v1, 0.0 }
0x1cf9   :  { %6814 = vrot.lane.b32.xlu1 %v9403_v29, %s8885_s11 }
0x1cfd   :  { %6966 = vrot.lane.b32.xlu1 %v9409_v33, %s8885_s11 }
0x1d1c   :  { %v6688_v63 = vpop.f32.mrb[66].mxu1 }
0x1d1d   :  { %v8514_v0 = vpop.f32.mrb[67].mxu1  ;;  %v6776_v34 = vsel %vm946_vm8, %v6688_v63, -inf }
0x1d1e   :  { %6777 = vmax.xlane.f32.xlu0 %v6776_v34 }
0x1d22   :  { %6780 = vmax.xlane.f32.xlu0 %v6779_v3 }
0x1d26   :  { %6798 = vadd.xlane.f32.xlu0 %v6797_v4 }
0x1d75   :  { %v6796_v29 = vpop.xlane.xlu1 %6795 }
0x1d76   :  { %8824 = vrcp.f32 %v6796_v29 }
0x1d79   :  { %v6815_v36 = vpop.permute.xlu1 %6814 }
0x1d7a   :  { %8521 = vmatpush3.msra.mxu1 %v6815_v36 }
0x1d7b   :  { %8530 = vmatprep.subr.mxu1 %v8873_v19 }
0x1d7d   :  { %v6967_v5 = vpop.permute.xlu1 %6966 }
0x1d80   :  { %v8825_v33 = vpop.eup %8824 }
0x1d81   :  { %v6810_v37 = vmul.f32 %v8825_v33, %v8821_v45 }
0x1d83   :  { %8523 = vmatmul.mubr.msk.f32.vlgmr.msra.gmra.mrb[68].mxu1 %vm946_vm8, %v6810_v37 }
0x1d84   :  { %8531 = vmatpush3.msra.mxu1 %v6967_v5  ;;  %8532 = vmatprep.mubr.msk.f32.mxu1 %vm8874_vm5, %v8873_v19 }
0x1d85   :  { %8540 = vmatprep.subr.msk.mxu1 %vm1969_vm9, %v7118_v10 }
0x1dab   :  { %v6778_v25 = vpop.xlane.xlu0 %6777 }
0x1dac   :  { %v6784_v6 = vsub.f32 %v6688_v63, %v6778_v25 }
0x1dae   :  { %v6790_v30 = vmul.f32 1.442695, %v6784_v6 }
0x1daf   :  { %v6781_v7 = vpop.xlane.xlu0 %6780 }
0x1db0   :  { %8826 = vpow2.f32 %v6790_v30  ;;  %v6785_v8 = vsub.f32 %v6766_v47, %v6781_v7 }
0x1db2   :  { %v6792_v54 = vmul.f32 1.442695, %v6785_v8 }
0x1db3   :  { %v6799_v49 = vpop.xlane.xlu0 %6798 }
0x1db4   :  { %8828 = vpow2.f32 %v6792_v54 }
0x1db5   :  { %8830 = vrcp.f32 %v6799_v49  ;;  %v7415_v49 = vld [vmem:[#allocation2 + $0xf0] sm:$0xff] }
0x1dba   :  { %v8827_v55 = vpop.eup %8826 }
0x1dbb   :  { %v6800_v35 = vsel %vm946_vm8, %v8827_v55, 0.0 }
0x1dbc   :  { %6801 = vadd.xlane.f32.xlu1 %v6800_v35  ;;  %v7306_v35 = vld [vmem:[#allocation2 + $0xd8] sm:$0xff] }
0x1dbe   :  { %v8829_v57 = vpop.eup %8828 }
0x1dbf   :  { %v6803_v9 = vsel %vm946_vm8, %v8829_v57, 0.0  ;;  %v8831_v61 = vpop.eup %8830 }
0x1dc0   :  { %6804 = vadd.xlane.f32.xlu0 %v6803_v9  ;;  %v6811_v11 = vmul.f32 %v8831_v61, %v8823_v1 }
0x1dcd   :  { %7042 = vrot.lane.b32.xlu1 %v9407_v31, %s8885_s11 }
0x1dd6   :  { %6890 = vrot.lane.b32.xlu0 %v9399_v52, %s8885_s11 }
0x1e49   :  { %v6802_v59 = vpop.xlane.xlu1 %6801 }
0x1e4a   :  { %8832 = vrcp.f32 %v6802_v59 }
0x1e4d   :  { %v6805_v53 = vpop.xlane.xlu0 %6804  ;;  %v7043_v13 = vpop.permute.xlu1 %7042 }
0x1e4e   :  { %8834 = vrcp.f32 %v6805_v53 }
0x1e51   :  { %v6891_v12 = vpop.permute.xlu0 %6890 }
0x1e52   :  { %8526 = vmatpush3.msra.mxu0 %v6891_v12 }
0x1e53   :  { %8528 = vmatmul.mubr.msk.f32.vlgmr.msra.gmra.mrb[88].mxu0 %vm946_vm8, %v6811_v11  ;;  %8535 = vmatprep.subr.mxu0 %v8873_v19 }
0x1e54   :  { %v8833_v31 = vpop.eup %8832  ;;  %8536 = vmatpush3.msra.mxu0 %v7043_v13  ;;  %8537 = vmatprep.mubr.msk.f32.mxu0 %vm8874_vm5, %v8873_v19 }
0x1e55   :  { %v6812_v52 = vmul.f32 %v8833_v31, %v8827_v55 }
0x1e56   :  { %v6886_v14 = vpop.f32.mrb[68].mxu1 }
0x1e57   :  { %v8524_v27 = vpop.f32.mrb[69].mxu1  ;;  %8533 = vmatmul.mubr.msk.f32.vlgmr.msra.gmra.mrb[70].mxu1 %vm946_vm8, %v6812_v52 }
0x1e58   :  { %v8835_v15 = vpop.eup %8834  ;;  %8542 = vmatprep.mubr.msk.f32.mxu1 %vm636_vm7, %v6886_v14  ;;  %8541 = vmatpush3.msk.msra.mxu1 %vm1969_vm9, %v7118_v10  ;;  %v7414_v10 = vld [vmem:[#allocation2 + $0xe8] sm:$0xff] }
0x1e59   :  { %v6813_v58 = vmul.f32 %v8835_v15, %v8829_v57  ;;  %v7307_v57 = vld [vmem:[#allocation2 + $0xe0] sm:$0xff]  ;;  %v8626_v59 = vpack.c.bf16 %v7415_v49, %v7414_v10 }
0x1e5a   :  { %v8622_v9 = vpack.c.bf16 %v7307_v57, %v7306_v35 }
0x1e5b   :  { %8538 = vmatmul.mubr.msk.f32.vlgmr.msra.gmra.mrb[90].mxu0 %vm946_vm8, %v6813_v58  ;;  %8627 = vmatprep.subr.bf16.mxu1 %v8626_v59 }
0x1e5c   :  { %8623 = vmatprep.subr.bf16.mxu0 %v8622_v9 }
0x1e5d   :  { %8625 = vmatpush3.bf16.msra.mxu0 %v8622_v9 }
0x1f26   :  { %v6962_v16 = vpop.f32.mrb[88].mxu0 }
0x1f27   :  { %v8529_v17 = vpop.f32.mrb[89].mxu0  ;;  %8543 = vmatmul.mubr.msk.f32.vlgmr.msra.gmra.mrb[58].mxu1 %vm636_vm7, %v6962_v16 }
0x1f28   :  { %8629 = vmatpush3.bf16.msra.mxu1 %v8626_v59  ;;  %v7827_v17 = vld [vmem:[#allocation2 + $0x10c] ss:$0 sm:$0xff] }
0x1f2a   :  { %v7038_v18 = vpop.f32.mrb[70].mxu1 }
0x1f2b   :  { %v8534_v20 = vpop.f32.mrb[71].mxu1  ;;  %8545 = vmatprep.mubr.msk.f32.mxu1 %vm636_vm7, %v7038_v18 }
0x1f2e   :  { %v7114_v19 = vpop.f32.mrb[90].mxu0 }
0x1f2f   :  { %v8539_v23 = vpop.f32.mrb[91].mxu0  ;;  %8546 = vmatmul.mubr.msk.f32.gmra.mrb[60].mxu1 %vm636_vm7, %v7114_v19 }
0x1ffa   :  { %v8544_v26 = vpop.f32.mrb[58].mxu1 }
0x1ffb   :  { %v7229_v28 = vadd.f32 %v8544_v26, %v7826_v24  ;;  %v7200_v51 = vpop.f32.mrb[59].mxu1 }
0x1ffc   :  { %v7228_v50 = vadd.f32 %v7826_v24, %v7200_v51 }
0x1ffd   :  { %v9736_v43 = vadd.f32 %v7229_v28, %v9363_v21 }
0x1ffe   :  { %v9739_v32 = vadd.f32 %v7228_v50, %v9366_v22 }
0x1fff   :  { %v7241_v2 = vsel %vm161_vm6, %v9736_v43, 0.0 }
0x2000   :  { %7242 = vadd.xlane.f32.xlu1 %v7241_v2  ;;  %v7238_v42 = vsel %vm161_vm6, %v9739_v32, 0.0 }
0x2001   :  { %7239 = vadd.xlane.f32.xlu0 %v7238_v42 }
0x2002   :  { %v8547_v47 = vpop.f32.mrb[60].mxu1 }
0x2003   :  { %v7210_v38 = vpop.f32.mrb[61].mxu1  ;;  %v7231_v40 = vadd.f32 %v8547_v47, %v7826_v24 }
0x2004   :  { %v7230_v41 = vadd.f32 %v7826_v24, %v7210_v38  ;;  %v7828_v24 = vld [vmem:[#allocation2 + $0x10d] ss:$0 sm:$0xff] }
0x2005   :  { %v9749_v45 = vadd.f32 %v7231_v40, %v9375_v46 }
0x2006   :  { %v9746_v44 = vadd.f32 %v7230_v41, %v9378_v39 }
0x2007   :  { %v7247_v56 = vsel %vm161_vm6, %v9749_v45, 0.0 }
0x2008   :  { %v7244_v48 = vsel %vm161_vm6, %v9746_v44, 0.0 }
0x2009   :  { %7245 = vadd.xlane.f32.xlu0 %v7244_v48 }
0x200d   :  { %7248 = vadd.xlane.f32.xlu0 %v7247_v56 }
0x208d   :  { %v7243_v60 = vpop.xlane.xlu1 %7242 }
0x208e   :  { %v7251_v62 = vmul.f32 0.0625, %v7243_v60  ;;  %v7240_v63 = vpop.xlane.xlu0 %7239  ;;  %v7416_v60 = vld [vmem:[#allocation2 + $0xf8] sm:$0xff] }
0x208f   :  { %v7250_v0 = vmul.f32 0.0625, %v7240_v63 }
0x2090   :  { %v7255_v34 = vsub.f32 %v9736_v43, %v7251_v62  ;;  %v7417_v62 = vld [vmem:[#allocation2 + $0x100] sm:$0xff] }
0x2091   :  { %v7254_v3 = vsub.f32 %v9739_v32, %v7250_v0  ;;  %v8630_v63 = vpack.c.bf16 %v7417_v62, %v7416_v60  ;;  %v7829_v0 = vld [vmem:[#allocation2 + $0x10e] ss:$0 sm:$0xff] }
0x2092   :  { %v7259_v1 = vmul.f32 %v7255_v34, %v7255_v34 }
0x2093   :  { %v7258_v4 = vmul.f32 %v7254_v3, %v7254_v3  ;;  %8631 = vmatprep.subr.bf16.mxu1 %v8630_v63 }
0x2094   :  { %v7265_v29 = vsel %vm161_vm6, %v7259_v1, 0.0  ;;  %8633 = vmatpush3.bf16.msra.mxu1 %v8630_v63 }
0x2095   :  { %7266 = vadd.xlane.f32.xlu0 %v7265_v29  ;;  %v7262_v36 = vsel %vm161_vm6, %v7258_v4, 0.0 }
0x2096   :  { %7263 = vadd.xlane.f32.xlu1 %v7262_v36  ;;  %v7246_v33 = vpop.xlane.xlu0 %7245 }
0x2097   :  { %v7252_v37 = vmul.f32 0.0625, %v7246_v33 }
0x2099   :  { %v7256_v5 = vsub.f32 %v9746_v44, %v7252_v37 }
0x209a   :  { %v7249_v25 = vpop.xlane.xlu0 %7248 }
0x209b   :  { %v7253_v6 = vmul.f32 0.0625, %v7249_v25  ;;  %v7260_v30 = vmul.f32 %v7256_v5, %v7256_v5 }
0x209d   :  { %v7257_v7 = vsub.f32 %v9749_v45, %v7253_v6  ;;  %v7268_v8 = vsel %vm161_vm6, %v7260_v30, 0.0 }
0x209e   :  { %7269 = vadd.xlane.f32.xlu1 %v7268_v8  ;;  %v7529_v8 = vld [vmem:[#allocation2 + $0x118] sm:$0xff] }
0x209f   :  { %v7261_v54 = vmul.f32 %v7257_v7, %v7257_v7 }
0x20a1   :  { %v7271_v55 = vsel %vm161_vm6, %v7261_v54, 0.0 }
0x20a2   :  { %7272 = vadd.xlane.f32.xlu0 %v7271_v55  ;;  %v7834_v55 = vld [vmem:[#allocation2 + $0x10f] ss:$0 sm:$0xff] }
0x2122   :  { %v7267_v53 = vpop.xlane.xlu0 %7266 }
0x2123   :  { %v7275_v61 = vmul.f32 0.0625, %v7267_v53  ;;  %v7264_v11 = vpop.xlane.xlu1 %7263 }
0x2124   :  { %v7274_v12 = vmul.f32 0.0625, %v7264_v11 }
0x2125   :  { %v7279_v13 = vadd.f32 1e-05, %v7275_v61 }
0x2126   :  { %v7278_v31 = vadd.f32 1e-05, %v7274_v12 }
0x2127   :  { %8836 = vrsqrt.f32 %v7279_v13 }
0x2128   :  { %8838 = vrsqrt.f32 %v7278_v31 }
0x212b   :  { %v7270_v52 = vpop.xlane.xlu1 %7269 }
0x212c   :  { %v7276_v14 = vmul.f32 0.0625, %v7270_v52 }
0x212e   :  { %v7280_v27 = vadd.f32 1e-05, %v7276_v14 }
0x212f   :  { %v7273_v15 = vpop.xlane.xlu0 %7272 }
0x2130   :  { %8840 = vrsqrt.f32 %v7280_v27  ;;  %v7277_v58 = vmul.f32 0.0625, %v7273_v15 }
0x2131   :  { %v8837_v16 = vpop.eup %8836 }
0x2132   :  { %v8839_v18 = vpop.eup %8838  ;;  %v7287_v20 = vmul.f32 %v8837_v16, %v7255_v34  ;;  %v7281_v19 = vadd.f32 1e-05, %v7277_v58 }
0x2133   :  { %v7286_v23 = vmul.f32 %v8839_v18, %v7254_v3 }
0x2134   :  { %8842 = vrsqrt.f32 %v7281_v19  ;;  %v7295_v26 = vmul.f32 %v7827_v17, %v7287_v20 }
0x2135   :  { %v7294_v28 = vmul.f32 %v7827_v17, %v7286_v23 }
0x2136   :  { %v7303_v50 = vadd.f32 %v7828_v24, %v7295_v26 }
0x2137   :  { %v7302_v51 = vadd.f32 %v7828_v24, %v7294_v28 }
0x2139   :  { %8552 = vmatprep.mubr.msk.f32.mxu0 %vm161_vm6, %v7302_v51 }
0x213a   :  { %v8841_v2 = vpop.eup %8840  ;;  %8553 = vmatmul.mubr.msk.f32.vlgmr.msra.gmra.mrb[92].mxu0 %vm161_vm6, %v7303_v50 }
0x213b   :  { %v7288_v42 = vmul.f32 %v8841_v2, %v7256_v5 }
0x213d   :  { %v7296_v47 = vmul.f32 %v7827_v17, %v7288_v42 }
0x213e   :  { %v8843_v38 = vpop.eup %8842 }
0x213f   :  { %v7304_v40 = vadd.f32 %v7828_v24, %v7296_v47  ;;  %v7289_v41 = vmul.f32 %v8843_v38, %v7257_v7  ;;  %v7528_v7 = vld [vmem:[#allocation2 + $0x110] sm:$0xff] }
0x2140   :  { %v8634_v54 = vpack.c.bf16 %v7529_v8, %v7528_v7 }
0x2141   :  { %8555 = vmatprep.mubr.msk.f32.mxu0 %vm161_vm6, %v7304_v40  ;;  %v7297_v48 = vmul.f32 %v7827_v17, %v7289_v41 }
0x2142   :  { %8635 = vmatprep.subr.bf16.mxu0 %v8634_v54 }
0x2143   :  { %v7305_v56 = vadd.f32 %v7828_v24, %v7297_v48  ;;  %8637 = vmatpush3.bf16.msra.mxu0 %v8634_v54 }
0x2145   :  { %8556 = vmatmul.mubr.msk.f32.gmra.mrb[94].mxu0 %vm161_vm6, %v7305_v56 }
0x220d   :  { %v8554_v34 = vpop.f32.mrb[92].mxu0 }
0x220e   :  { %v7397_v3 = vadd.f32 %v8554_v34, %v7829_v0  ;;  %v7391_v1 = vpop.f32.mrb[93].mxu0 }
0x220f   :  { %v7392_v4 = vadd.f32 %v7829_v0, %v7391_v1 }
0x2210   :  { %v7411_v36 = vmax.f32 %v7397_v3, 0.0 }
0x2211   :  { %v7410_v29 = vmax.f32 %v7392_v4, 0.0 }
0x2213   :  { %8566 = vmatprep.mubr.msk.f32.mxu1 %vm55_vm0, %v7410_v29 }
0x2214   :  { %8567 = vmatmul.mubr.msk.f32.vlgmr.msra.gmra.mrb[72].mxu1 %vm55_vm0, %v7411_v36 }
0x2218   :  { %v8557_v33 = vpop.f32.mrb[94].mxu0 }
0x2219   :  { %v7407_v37 = vadd.f32 %v8557_v33, %v7829_v0  ;;  %v7401_v5 = vpop.f32.mrb[95].mxu0 }
0x221a   :  { %v7402_v25 = vadd.f32 %v7829_v0, %v7401_v5 }
0x221b   :  { %v7413_v30 = vmax.f32 %v7407_v37, 0.0 }
0x221c   :  { %v7412_v6 = vmax.f32 %v7402_v25, 0.0 }
0x221e   :  { %8569 = vmatprep.mubr.msk.f32.mxu1 %vm55_vm0, %v7412_v6 }
0x221f   :  { %8570 = vmatmul.mubr.msk.f32.gmra.mrb[74].mxu1 %vm55_vm0, %v7413_v30 }
0x22e7   :  { %v8568_v35 = vpop.f32.mrb[72].mxu1 }
0x22e8   :  { %v7507_v57 = vadd.f32 %v8568_v35, %v7834_v55  ;;  %v7501_v9 = vpop.f32.mrb[73].mxu1 }
0x22e9   :  { %v7502_v10 = vadd.f32 %v7834_v55, %v7501_v9 }
0x22ea   :  { %v7521_v49 = vadd.f32 %v7507_v57, %v9736_v43 }
0x22eb   :  { %v7520_v59 = vadd.f32 %v7502_v10, %v9739_v32 }
0x22ec   :  { %v7525_v61 = vadd.f32 %v7521_v49, %v9363_v21  ;;  %v7839_v21 = vld [vmem:[#allocation2 + $0x120] ss:$0 sm:$0xff] }
0x22ed   :  { %v7524_v53 = vadd.f32 %v7520_v59, %v9366_v22 }
0x22ef   :  { %8576 = vmatprep.mubr.msk.f32.mxu0 %vm161_vm6, %v7524_v53 }
0x22f0   :  { %8577 = vmatmul.mubr.msk.f32.vlgmr.msra.gmra.mrb[96].mxu0 %vm161_vm6, %v7525_v61 }
0x22f2   :  { %v8571_v11 = vpop.f32.mrb[74].mxu1 }
0x22f3   :  { %v7517_v12 = vadd.f32 %v8571_v11, %v7834_v55  ;;  %v7511_v13 = vpop.f32.mrb[75].mxu1 }
0x22f4   :  { %v7512_v31 = vadd.f32 %v7834_v55, %v7511_v13 }
0x22f5   :  { %v7523_v52 = vadd.f32 %v7517_v12, %v9749_v45 }
0x22f6   :  { %v7522_v14 = vadd.f32 %v7512_v31, %v9746_v44 }
0x22f7   :  { %v7527_v32 = vadd.f32 %v7523_v52, %v9375_v46 }
0x22f8   :  { %v7526_v43 = vadd.f32 %v7522_v14, %v9378_v39 }
0x22fa   :  { %8579 = vmatprep.mubr.msk.f32.mxu0 %vm161_vm6, %v7526_v43 }
0x22fb   :  { %8580 = vmatmul.mubr.msk.f32.gmra.mrb[98].mxu0 %vm161_vm6, %v7527_v32 }
0x23c3   :  { %v8578_v22 = vpop.f32.mrb[96].mxu0 }
0x23c4   :  { %v7619_v27 = vadd.f32 %v8578_v22, %v7839_v21  ;;  %v7613_v15 = vpop.f32.mrb[97].mxu0 }
0x23c5   :  { %v7614_v58 = vadd.f32 %v7839_v21, %v7613_v15 }
0x23c6   :  { %7633 = vrot.lane.b32.xlu1 %v7619_v27, %s8886_s12 }
0x23ce   :  { %v8581_v16 = vpop.f32.mrb[98].mxu0 }
0x23cf   :  { %v7629_v17 = vadd.f32 %v8581_v16, %v7839_v21  ;;  %v7623_v45 = vpop.f32.mrb[99].mxu0 }
0x23d0   :  { %v7624_v18 = vadd.f32 %v7839_v21, %v7623_v45 }
0x23d1   :  { %7641 = vrot.lane.b32.xlu1 %v7629_v17, %s8876_s30 }
0x23d2   :  { %7637 = vrot.lane.b32.xlu0 %v7624_v18, %s8887_s13 }
0x2438   :  { %v7634_v46 = vpop.permute.xlu1 %7633 }
0x2439   :  { %v7644_v39 = vsel %vm55_vm0, %v7614_v58, %v7634_v46 }
0x2443   :  { %v7642_v20 = vpop.permute.xlu1 %7641 }
0x2444   :  { %v7638_v44 = vpop.permute.xlu0 %7637 }
0x2445   :  { %v7646_v19 = vsel %vm7645_vm10, %v7644_v39, %v7638_v44 }
0x2446   :  { %v7648_v23 = vsel %vm7647_vm11, %v7646_v19, %v7642_v20 }
0x2447   :  { %7649 = vst [vmem:[%s9790_s2] sm:$0xff] %v7648_v23 }
0x2448   :  { %7654 = vsyncpa [#allocation3], 1 }

</bundles_post_ra>
